<compile_context>
chip_gen: v7x
topology: tpu7x:2x2x1
jax: 0.10.0
libtpu: 0.0.40
codegen_flags: <defaults>
</compile_context>

<pallas_src>
import jax
import jax.numpy as jnp
from jax import lax
from jax.experimental import pallas as pl
from jax.experimental.pallas import tpu as pltpu

# ---- problem sizes (small but valid for the 4x (conv+pool) + 2x conv stack) ----
C_IN = 4              # input_size[0]
L_IN = 128            # input_size[1]; 128 -> final conv length 1, flat features = 32
NUM_ACTIONS = 6
CH = 32               # conv channels
HID = 512             # fc hidden

P = 4                 # batch elements packed along lanes (P * CH == 128)
G = 16                # lane-packed groups per grid step
BB = P * G            # batch elements per grid step (64)
A_PAD = 128 // P      # per-element padded Q width (32) -> lane-dense (G, 128) output

L1 = L_IN - 2                 # conv1 output length (126)
L_P1 = (L1 - 3) // 2 + 1      # pool1 output length (62)

F32 = jnp.float32
BF16 = jnp.bfloat16


# -------------------------- Pallas kernel --------------------------------------
def dqn_kernel(x_ref,
               w1, b1, w2, b2, w3, b3, w4, b4, w5, b5, w6, b6,
               w1c, b1c, wq, bq,
               out_ref,
               buf_a0, buf_b0, buf_a1, buf_b1, feat):

    def conv3(src, dst, l_in, w, b, relu):
        l_out = l_in - 2
        acc = jnp.dot(src[pl.ds(0, l_out), :].astype(BF16), w[0],
                      preferred_element_type=F32)
        acc = acc + jnp.dot(src[pl.ds(1, l_out), :].astype(BF16), w[1],
                            preferred_element_type=F32)
        acc = acc + jnp.dot(src[pl.ds(2, l_out), :].astype(BF16), w[2],
                            preferred_element_type=F32)
        acc = acc + b[...]
        if relu:
            acc = jnp.maximum(acc, 0.0)
        dst[pl.ds(0, l_out), :] = acc
        return l_out

    def pool3s2_relu(src, dst, l_in):
        # pooled[l] = max(src[2l], src[2l+1], src[2l+2]); two strided reads.
        l_out = (l_in - 3) // 2 + 1
        e = src[pl.ds(0, l_out + 1, 2), :]      # rows 0, 2, ..., 2*l_out
        o = src[pl.ds(1, l_out, 2), :]          # rows 1, 3, ..., 2*l_out - 1
        m = jnp.maximum(jnp.maximum(e[:l_out], o), e[1:])
        dst[pl.ds(0, l_out), :] = jnp.maximum(m, 0.0)
        return l_out

    def run_group(g, buf_a, buf_b):
        # conv1: single im2col matmul (126, 48) @ (48, 128)
        y = jnp.dot(x_ref[g].astype(BF16), w1[...], preferred_element_type=F32)
        buf_a[...] = y + b1[...]

        l = pool3s2_relu(buf_a, buf_b, L1)                  # pool1 + relu (62)
        l = conv3(buf_b, buf_a, l, w2, b2, relu=False)      # conv2        (60)
        l = pool3s2_relu(buf_a, buf_b, l)                   # pool2 + relu (29)
        l = conv3(buf_b, buf_a, l, w3, b3, relu=False)      # conv3        (27)
        l = pool3s2_relu(buf_a, buf_b, l)                   # pool3 + relu (13)
        l = conv3(buf_b, buf_a, l, w4, b4, relu=False)      # conv4        (11)
        l = pool3s2_relu(buf_a, buf_b, l)                   # pool4 + relu (5)
        l = conv3(buf_b, buf_a, l, w5, b5, relu=True)       # conv5 + relu (3)

        # conv6 + relu: block-diagonal like conv2-5 -> one lane-packed (1, 128) row.
        r = jnp.dot(buf_a[pl.ds(0, 1), :].astype(BF16), w6[0],
                    preferred_element_type=F32)
        r = r + jnp.dot(buf_a[pl.ds(1, 1), :].astype(BF16), w6[1],
                        preferred_element_type=F32)
        r = r + jnp.dot(buf_a[pl.ds(2, 1), :].astype(BF16), w6[2],
                        preferred_element_type=F32)
        feat[pl.ds(g, 1), :] = jnp.maximum(r + b6[...], 0.0)

    def pair_body(j, carry):
        # Two groups per iteration on independent buffer sets so their work
        # can interleave (one group's pools under the other's matmuls).
        run_group(2 * j, buf_a0, buf_b0)
        run_group(2 * j + 1, buf_a1, buf_b1)
        return carry

    lax.fori_loop(0, G // 2, pair_body, 0)

    # ---- dueling heads, batched over the G lane-packed rows (M = G) ----
    # Per packed slot p: features live in lanes [p*CH, (p+1)*CH).  The dueling
    # combine val + adv - mean(adv) is pre-folded into wq / bq host-side, so
    # q_p = relu(f_p @ w1c + b1c) @ wq + bq, giving a lane-dense (G, 128) store.
    feats = feat[...]                                                     # (G, 128)
    q_blocks = []
    for p in range(P):
        fp = feats[:, p * CH:(p + 1) * CH].astype(BF16)                   # (G, CH)
        hp = jnp.dot(fp, w1c[...], preferred_element_type=F32) + b1c[...]
        hp = jnp.maximum(hp, 0.0).astype(BF16)                            # (G, 2*HID)
        qp = jnp.dot(hp, wq[...], preferred_element_type=F32) + bq[...]   # (G, A_PAD)
        q_blocks.append(qp)
    out_ref[...] = jnp.concatenate(q_blocks, axis=-1)                     # (G, 128)


# -------------------------- one-time weight packing -----------------------------
def pack_params(params):
    """Host-side packing (kron block-diag, head fusion, dueling-combine fold).

    Run ONCE outside the per-step call path; only the input packing and
    pallas_call run per forward.
    """
    eye = jnp.eye(P, dtype=F32)

    def blockdiag(w):          # torch (Cout, Cin, 3) -> (3, P*Cin, P*Cout) block-diag
        wt = jnp.transpose(w, (2, 1, 0)).astype(F32)        # (3, Cin, Cout)
        return jnp.stack([jnp.kron(eye, wt[t]) for t in range(3)], axis=0)

    def tile_bias(b):          # (CH,) -> (1, P*CH)
        return jnp.tile(b.astype(F32), P).reshape(1, P * CH)

    # conv1: im2col weight (3*P*C_IN, P*CH), taps stacked along rows.
    w1 = blockdiag(params["cw1"]).reshape(3 * P * C_IN, P * CH)

    # fused dueling-head first layer: [value | advantage]
    w1c = jnp.concatenate([params["vw1"].T, params["aw1"].T], axis=1).astype(F32)  # (CH, 2*HID)
    b1c = jnp.concatenate([params["vb1"], params["ab1"]]).reshape(1, 2 * HID).astype(F32)

    # second layer with the dueling combine folded in:  q = h @ wq + bq
    A = params["aw2"].shape[0]
    cmat = jnp.eye(A, dtype=F32) - 1.0 / A                   # centering: adv - mean(adv)
    wq = jnp.zeros((2 * HID, A_PAD), F32)
    wq = wq.at[:HID, :A].set(jnp.tile(params["vw2"].T.astype(F32), (1, A)))
    wq = wq.at[HID:, :A].set(params["aw2"].T.astype(F32) @ cmat)
    bq = jnp.zeros((1, A_PAD), F32)
    bq = bq.at[0, :A].set(params["vb2"].astype(F32)[0] + params["ab2"].astype(F32) @ cmat)

    return {
        "w1": w1.astype(BF16), "b1": tile_bias(params["cb1"]),
        "w2": blockdiag(params["cw2"]).astype(BF16), "b2": tile_bias(params["cb2"]),
        "w3": blockdiag(params["cw3"]).astype(BF16), "b3": tile_bias(params["cb3"]),
        "w4": blockdiag(params["cw4"]).astype(BF16), "b4": tile_bias(params["cb4"]),
        "w5": blockdiag(params["cw5"]).astype(BF16), "b5": tile_bias(params["cb5"]),
        "w6": blockdiag(params["cw6"]).astype(BF16), "b6": tile_bias(params["cb6"]),
        "w1c": w1c.astype(BF16), "b1c": b1c,
        "wq": wq.astype(BF16), "bq": bq,
    }


# -------------------------- wrapper (jitted per-call path) ----------------------
@jax.jit
def dqn_forward(x_ncl, packed):
    """x_ncl: (B, C_IN, L_IN) float32 (PyTorch NCW).  Returns (B, NUM_ACTIONS)."""
    B = x_ncl.shape[0]
    n_blocks = pl.cdiv(B, BB)
    B_pad = n_blocks * BB

    # ---- batch packing: pad to multiple of BB, lane-pack P elements/group ----
    x = x_ncl.astype(F32)
    if B_pad != B:
        x = jnp.pad(x, ((0, B_pad - B), (0, 0), (0, 0)))
    x = jnp.transpose(x, (0, 2, 1))                                     # (B_pad, L, C)
    x = x.reshape(B_pad // P, P, L_IN, C_IN)
    x = jnp.transpose(x, (0, 2, 1, 3)).reshape(B_pad // P, L_IN, P * C_IN)
    # host-side im2col for conv1: stack the 3 taps along the channel axis.
    x = jnp.concatenate([x[:, 0:L1], x[:, 1:L1 + 1], x[:, 2:L1 + 2]], axis=-1)  # (NB*G, 126, 48)

    kparams = [packed[k] for k in ("w1", "b1", "w2", "b2", "w3", "b3", "w4", "b4",
                                   "w5", "b5", "w6", "b6", "w1c", "b1c", "wq", "bq")]

    def full_spec(arr):
        nd = arr.ndim
        return pl.BlockSpec(arr.shape, lambda i, _n=nd: (0,) * _n)

    in_specs = [pl.BlockSpec((G, L1, 3 * P * C_IN), lambda i: (i, 0, 0))]
    in_specs += [full_spec(a) for a in kparams]

    out = pl.pallas_call(
        dqn_kernel,
        out_shape=jax.ShapeDtypeStruct((n_blocks * G, P * A_PAD), F32),
        grid_spec=pltpu.PrefetchScalarGridSpec(
            num_scalar_prefetch=0,
            grid=(n_blocks,),
            in_specs=in_specs,
            out_specs=pl.BlockSpec((G, P * A_PAD), lambda i: (i, 0)),
            scratch_shapes=[
                pltpu.VMEM((L1, P * CH), F32),     # ping buffer, group slot 0
                pltpu.VMEM((L_P1, P * CH), F32),   # pong buffer, group slot 0
                pltpu.VMEM((L1, P * CH), F32),     # ping buffer, group slot 1
                pltpu.VMEM((L_P1, P * CH), F32),   # pong buffer, group slot 1
                pltpu.VMEM((G, P * CH), F32),      # per-step lane-packed features
            ],
        ),
        compiler_params=pltpu.CompilerParams(dimension_semantics=("parallel",)),
    )(x, *kparams)

    q = out.reshape(B_pad, A_PAD)         # lane-dense (G,128) blocks -> per-element rows
    return q[:B, :NUM_ACTIONS]


# -------------------------- pure-JAX reference ----------------------------------
def ref_forward(x_ncl, p):
    relu = lambda t: jnp.maximum(t, 0.0)

    def conv1d(x, w, b):
        y = lax.conv_general_dilated(
            x, w, window_strides=(1,), padding="VALID",
            dimension_numbers=("NCH", "OIH", "NCH"))
        return y + b[None, :, None]

    def maxpool(x):
        return lax.reduce_window(x, -jnp.inf, lax.max, (1, 1, 3), (1, 1, 2), "VALID")

    y = conv1d(x_ncl, p["cw1"], p["cb1"]); y = relu(maxpool(y))
    y = conv1d(y, p["cw2"], p["cb2"]);     y = relu(maxpool(y))
    y = conv1d(y, p["cw3"], p["cb3"]);     y = relu(maxpool(y))
    y = conv1d(y, p["cw4"], p["cb4"]);     y = relu(maxpool(y))
    y = relu(conv1d(y, p["cw5"], p["cb5"]))
    y = relu(conv1d(y, p["cw6"], p["cb6"]))
    f = y.reshape(y.shape[0], -1)
    hv = relu(f @ p["vw1"].T + p["vb1"]); val = hv @ p["vw2"].T + p["vb2"]
    ha = relu(f @ p["aw1"].T + p["ab1"]); adv = ha @ p["aw2"].T + p["ab2"]
    return val + adv - adv.mean(axis=1, keepdims=True)


# -------------------------- params / main ---------------------------------------
def make_params(key):
    keys = iter(jax.random.split(key, 32))
    p = {}

    def dense(shape, fan_in):
        return (jax.random.normal(next(keys), shape, jnp.float32) / jnp.sqrt(fan_in))

    # conv stack
    p["cw1"] = dense((CH, C_IN, 3), C_IN * 3); p["cb1"] = dense((CH,), C_IN * 3)
    for i in range(2, 7):
        p[f"cw{i}"] = dense((CH, CH, 3), CH * 3)
        p[f"cb{i}"] = dense((CH,), CH * 3)
    flat = CH * 1   # conv output is (B, 32, 1) for L_IN=128
    # value head
    p["vw1"] = dense((HID, flat), flat); p["vb1"] = dense((HID,), flat)
    p["vw2"] = dense((1, HID), HID);     p["vb2"] = dense((1,), HID)
    # advantage head
    p["aw1"] = dense((HID, flat), flat); p["ab1"] = dense((HID,), flat)
    p["aw2"] = dense((NUM_ACTIONS, HID), HID); p["ab2"] = dense((NUM_ACTIONS,), HID)
    return p


if __name__ == "__main__":
    key = jax.random.PRNGKey(0)
    kx, kp = jax.random.split(key)
    params = make_params(kp)
    packed = pack_params(params)   # one-time host-side weight packing

    # B = 96: two grid steps (>=2 parallel steps for v7x's two TensorCores) with the
    # second block half-padded, exercising the batch-padding path.
    B = 96
    x = jax.random.normal(kx, (B, C_IN, L_IN), jnp.float32)   # PyTorch NCW input

    out = jax.block_until_ready(dqn_forward(x, packed))
    ref = jax.block_until_ready(ref_forward(x, params))

    assert out.shape == (B, NUM_ACTIONS), out.shape
    # bf16 matmul operands (f32 accumulate) vs the f32 reference -> loosened tolerance.
    err = jnp.max(jnp.abs(out - ref))
    if not jnp.allclose(out, ref, rtol=1e-1, atol=1e-1):
        raise AssertionError(f"mismatch: max abs err {err}")
    print("KERNEL_OK")
</pallas_src>

<mosaic_0001>
module attributes {stable_mosaic.version = 11 : i64} {
  func.func @dqn_kernel(%arg0: i32, %arg1: memref<16x126x48xf32, #tpu.memory_space<vmem>>, %arg2: memref<48x128xbf16, #tpu.memory_space<vmem>>, %arg3: memref<1x128xf32, #tpu.memory_space<vmem>>, %arg4: memref<3x128x128xbf16, #tpu.memory_space<vmem>>, %arg5: memref<1x128xf32, #tpu.memory_space<vmem>>, %arg6: memref<3x128x128xbf16, #tpu.memory_space<vmem>>, %arg7: memref<1x128xf32, #tpu.memory_space<vmem>>, %arg8: memref<3x128x128xbf16, #tpu.memory_space<vmem>>, %arg9: memref<1x128xf32, #tpu.memory_space<vmem>>, %arg10: memref<3x128x128xbf16, #tpu.memory_space<vmem>>, %arg11: memref<1x128xf32, #tpu.memory_space<vmem>>, %arg12: memref<3x128x128xbf16, #tpu.memory_space<vmem>>, %arg13: memref<1x128xf32, #tpu.memory_space<vmem>>, %arg14: memref<32x1024xbf16, #tpu.memory_space<vmem>>, %arg15: memref<1x1024xf32, #tpu.memory_space<vmem>>, %arg16: memref<1024x32xbf16, #tpu.memory_space<vmem>>, %arg17: memref<1x32xf32, #tpu.memory_space<vmem>>, %arg18: memref<16x128xf32, #tpu.memory_space<vmem>>, %arg19: memref<126x128xf32, #tpu.memory_space<vmem>>, %arg20: memref<62x128xf32, #tpu.memory_space<vmem>>, %arg21: memref<126x128xf32, #tpu.memory_space<vmem>>, %arg22: memref<62x128xf32, #tpu.memory_space<vmem>>, %arg23: memref<16x128xf32, #tpu.memory_space<vmem>>) attributes {dimension_semantics = [#tpu.dimension_semantics<parallel>], iteration_bounds = array<i64: 2>, scalar_prefetch = 0 : i64, scratch_operands = 5 : i64, tpu.core_type = #tpu.core_type<tc>, window_params = [{transform_indices = @transform_0, window_bounds = array<i64: 16, 126, 48>}, {pipeline_mode = #tpu.pipeline_mode<synchronous>, transform_indices = @transform_1, window_bounds = array<i64: 48, 128>}, {pipeline_mode = #tpu.pipeline_mode<synchronous>, transform_indices = @transform_2, window_bounds = array<i64: 1, 128>}, {pipeline_mode = #tpu.pipeline_mode<synchronous>, transform_indices = @transform_3, window_bounds = array<i64: 3, 128, 128>}, {pipeline_mode = #tpu.pipeline_mode<synchronous>, transform_indices = @transform_4, window_bounds = array<i64: 1, 128>}, {pipeline_mode = #tpu.pipeline_mode<synchronous>, transform_indices = @transform_5, window_bounds = array<i64: 3, 128, 128>}, {pipeline_mode = #tpu.pipeline_mode<synchronous>, transform_indices = @transform_6, window_bounds = array<i64: 1, 128>}, {pipeline_mode = #tpu.pipeline_mode<synchronous>, transform_indices = @transform_7, window_bounds = array<i64: 3, 128, 128>}, {pipeline_mode = #tpu.pipeline_mode<synchronous>, transform_indices = @transform_8, window_bounds = array<i64: 1, 128>}, {pipeline_mode = #tpu.pipeline_mode<synchronous>, transform_indices = @transform_9, window_bounds = array<i64: 3, 128, 128>}, {pipeline_mode = #tpu.pipeline_mode<synchronous>, transform_indices = @transform_10, window_bounds = array<i64: 1, 128>}, {pipeline_mode = #tpu.pipeline_mode<synchronous>, transform_indices = @transform_11, window_bounds = array<i64: 3, 128, 128>}, {pipeline_mode = #tpu.pipeline_mode<synchronous>, transform_indices = @transform_12, window_bounds = array<i64: 1, 128>}, {pipeline_mode = #tpu.pipeline_mode<synchronous>, transform_indices = @transform_13, window_bounds = array<i64: 32, 1024>}, {pipeline_mode = #tpu.pipeline_mode<synchronous>, transform_indices = @transform_14, window_bounds = array<i64: 1, 1024>}, {pipeline_mode = #tpu.pipeline_mode<synchronous>, transform_indices = @transform_15, window_bounds = array<i64: 1024, 32>}, {pipeline_mode = #tpu.pipeline_mode<synchronous>, transform_indices = @transform_16, window_bounds = array<i64: 1, 32>}, {transform_indices = @transform_17, window_bounds = array<i64: 16, 128>}]} {
    %c0_i32 = arith.constant 0 : i32
    %c8_i32 = arith.constant 8 : i32
    %0 = arith.addi %c0_i32, %c8_i32 : i32
    %c1_i32 = arith.constant 1 : i32
    scf.for %arg24 = %c0_i32 to %0 step %c1_i32  : i32 {
      %c2_i32 = arith.constant 2 : i32
      %64 = arith.muli %c2_i32, %arg24 : i32
      %65 = arith.index_cast %64 : i32 to index
      %c0_47 = arith.constant 0 : index
      %c0_48 = arith.constant 0 : index
      %66 = vector.load %arg1[%65, %c0_47, %c0_48] : memref<16x126x48xf32, #tpu.memory_space<vmem>>, vector<1x126x48xf32>
      %67 = vector.shape_cast %66 : vector<1x126x48xf32> to vector<126x48xf32>
      %68 = arith.truncf %67 : vector<126x48xf32> to vector<126x48xbf16>
      %c0_49 = arith.constant 0 : index
      %c0_50 = arith.constant 0 : index
      %69 = vector.load %arg2[%c0_49, %c0_50] : memref<48x128xbf16, #tpu.memory_space<vmem>>, vector<48x128xbf16>
      %cst_51 = arith.constant dense<0.000000e+00> : vector<126x128xf32>
      %70 = tpu.matmul %68, %69, %cst_51 {dimension_numbers = #tpu.dot_dimension_numbers<[1], [0], [0], [1], [0, 0, 1, 1], [], []>} : vector<126x48xbf16>, vector<48x128xbf16>, vector<126x128xf32> -> vector<126x128xf32>
      %c0_52 = arith.constant 0 : index
      %c0_53 = arith.constant 0 : index
      %71 = vector.load %arg3[%c0_52, %c0_53] : memref<1x128xf32, #tpu.memory_space<vmem>>, vector<1x128xf32>
      %72 = vector.broadcast %71 : vector<1x128xf32> to vector<126x128xf32>
      %73 = arith.addf %70, %72 : vector<126x128xf32>
      %c0_54 = arith.constant 0 : index
      %c0_55 = arith.constant 0 : index
      %74 = vector.load %arg19[%c0_54, %c0_55] : memref<126x128xf32, #tpu.memory_space<vmem>>, vector<126x128xf32>
      tpu.vector_store %arg19[%c0_54, %c0_55], %73 {strides = array<i32>} : memref<126x128xf32, #tpu.memory_space<vmem>>, vector<126x128xf32>,
      %c0_56 = arith.constant 0 : index
      %c0_57 = arith.constant 0 : index
      %75 = tpu.strided_load %arg19[%c0_56, %c0_57] {strides = array<i32: 2, 1>} : memref<126x128xf32, #tpu.memory_space<vmem>>, vector<63x128xf32>
      %c1 = arith.constant 1 : index
      %c0_58 = arith.constant 0 : index
      %76 = tpu.strided_load %arg19[%c1, %c0_58] {strides = array<i32: 2, 1>} : memref<126x128xf32, #tpu.memory_space<vmem>>, vector<62x128xf32>
      %77 = vector.extract_strided_slice %75 {offsets = [0, 0], sizes = [62, 128], strides = [1, 1]} : vector<63x128xf32> to vector<62x128xf32>
      %78 = arith.maximumf %77, %76 : vector<62x128xf32>
      %79 = vector.extract_strided_slice %75 {offsets = [1, 0], sizes = [62, 128], strides = [1, 1]} : vector<63x128xf32> to vector<62x128xf32>
      %80 = arith.maximumf %78, %79 : vector<62x128xf32>
      %cst_59 = arith.constant 0.000000e+00 : f32
      %81 = vector.broadcast %cst_59 : f32 to vector<62x128xf32>
      %82 = arith.maximumf %80, %81 : vector<62x128xf32>
      %c0_60 = arith.constant 0 : index
      %c0_61 = arith.constant 0 : index
      %83 = vector.load %arg20[%c0_60, %c0_61] : memref<62x128xf32, #tpu.memory_space<vmem>>, vector<62x128xf32>
      tpu.vector_store %arg20[%c0_60, %c0_61], %82 {strides = array<i32>} : memref<62x128xf32, #tpu.memory_space<vmem>>, vector<62x128xf32>,
      %c0_62 = arith.constant 0 : index
      %c0_63 = arith.constant 0 : index
      %84 = vector.load %arg20[%c0_62, %c0_63] : memref<62x128xf32, #tpu.memory_space<vmem>>, vector<60x128xf32>
      %85 = arith.truncf %84 : vector<60x128xf32> to vector<60x128xbf16>
      %c0_64 = arith.constant 0 : index
      %c0_65 = arith.constant 0 : index
      %c0_66 = arith.constant 0 : index
      %86 = vector.load %arg4[%c0_64, %c0_65, %c0_66] : memref<3x128x128xbf16, #tpu.memory_space<vmem>>, vector<1x128x128xbf16>
      %87 = vector.shape_cast %86 : vector<1x128x128xbf16> to vector<128x128xbf16>
      %cst_67 = arith.constant dense<0.000000e+00> : vector<60x128xf32>
      %88 = tpu.matmul %85, %87, %cst_67 {dimension_numbers = #tpu.dot_dimension_numbers<[1], [0], [0], [1], [0, 0, 1, 1], [], []>} : vector<60x128xbf16>, vector<128x128xbf16>, vector<60x128xf32> -> vector<60x128xf32>
      %c1_68 = arith.constant 1 : index
      %c0_69 = arith.constant 0 : index
      %89 = vector.load %arg20[%c1_68, %c0_69] : memref<62x128xf32, #tpu.memory_space<vmem>>, vector<60x128xf32>
      %90 = arith.truncf %89 : vector<60x128xf32> to vector<60x128xbf16>
      %c1_70 = arith.constant 1 : index
      %c0_71 = arith.constant 0 : index
      %c0_72 = arith.constant 0 : index
      %91 = vector.load %arg4[%c1_70, %c0_71, %c0_72] : memref<3x128x128xbf16, #tpu.memory_space<vmem>>, vector<1x128x128xbf16>
      %92 = vector.shape_cast %91 : vector<1x128x128xbf16> to vector<128x128xbf16>
      %cst_73 = arith.constant dense<0.000000e+00> : vector<60x128xf32>
      %93 = tpu.matmul %90, %92, %cst_73 {dimension_numbers = #tpu.dot_dimension_numbers<[1], [0], [0], [1], [0, 0, 1, 1], [], []>} : vector<60x128xbf16>, vector<128x128xbf16>, vector<60x128xf32> -> vector<60x128xf32>
      %94 = arith.addf %88, %93 : vector<60x128xf32>
      %c2 = arith.constant 2 : index
      %c0_74 = arith.constant 0 : index
      %95 = vector.load %arg20[%c2, %c0_74] : memref<62x128xf32, #tpu.memory_space<vmem>>, vector<60x128xf32>
      %96 = arith.truncf %95 : vector<60x128xf32> to vector<60x128xbf16>
      %c2_75 = arith.constant 2 : index
      %c0_76 = arith.constant 0 : index
      %c0_77 = arith.constant 0 : index
      %97 = vector.load %arg4[%c2_75, %c0_76, %c0_77] : memref<3x128x128xbf16, #tpu.memory_space<vmem>>, vector<1x128x128xbf16>
      %98 = vector.shape_cast %97 : vector<1x128x128xbf16> to vector<128x128xbf16>
      %cst_78 = arith.constant dense<0.000000e+00> : vector<60x128xf32>
      %99 = tpu.matmul %96, %98, %cst_78 {dimension_numbers = #tpu.dot_dimension_numbers<[1], [0], [0], [1], [0, 0, 1, 1], [], []>} : vector<60x128xbf16>, vector<128x128xbf16>, vector<60x128xf32> -> vector<60x128xf32>
      %100 = arith.addf %94, %99 : vector<60x128xf32>
      %c0_79 = arith.constant 0 : index
      %c0_80 = arith.constant 0 : index
      %101 = vector.load %arg5[%c0_79, %c0_80] : memref<1x128xf32, #tpu.memory_space<vmem>>, vector<1x128xf32>
      %102 = vector.broadcast %101 : vector<1x128xf32> to vector<60x128xf32>
      %103 = arith.addf %100, %102 : vector<60x128xf32>
      %c0_81 = arith.constant 0 : index
      %c0_82 = arith.constant 0 : index
      %104 = vector.load %arg19[%c0_81, %c0_82] : memref<126x128xf32, #tpu.memory_space<vmem>>, vector<60x128xf32>
      tpu.vector_store %arg19[%c0_81, %c0_82], %103 {strides = array<i32>} : memref<126x128xf32, #tpu.memory_space<vmem>>, vector<60x128xf32>,
      %c0_83 = arith.constant 0 : index
      %c0_84 = arith.constant 0 : index
      %105 = tpu.strided_load %arg19[%c0_83, %c0_84] {strides = array<i32: 2, 1>} : memref<126x128xf32, #tpu.memory_space<vmem>>, vector<30x128xf32>
      %c1_85 = arith.constant 1 : index
      %c0_86 = arith.constant 0 : index
      %106 = tpu.strided_load %arg19[%c1_85, %c0_86] {strides = array<i32: 2, 1>} : memref<126x128xf32, #tpu.memory_space<vmem>>, vector<29x128xf32>
      %107 = vector.extract_strided_slice %105 {offsets = [0, 0], sizes = [29, 128], strides = [1, 1]} : vector<30x128xf32> to vector<29x128xf32>
      %108 = arith.maximumf %107, %106 : vector<29x128xf32>
      %109 = vector.extract_strided_slice %105 {offsets = [1, 0], sizes = [29, 128], strides = [1, 1]} : vector<30x128xf32> to vector<29x128xf32>
      %110 = arith.maximumf %108, %109 : vector<29x128xf32>
      %cst_87 = arith.constant 0.000000e+00 : f32
      %111 = vector.broadcast %cst_87 : f32 to vector<29x128xf32>
      %112 = arith.maximumf %110, %111 : vector<29x128xf32>
      %c0_88 = arith.constant 0 : index
      %c0_89 = arith.constant 0 : index
      %113 = vector.load %arg20[%c0_88, %c0_89] : memref<62x128xf32, #tpu.memory_space<vmem>>, vector<29x128xf32>
      tpu.vector_store %arg20[%c0_88, %c0_89], %112 {strides = array<i32>} : memref<62x128xf32, #tpu.memory_space<vmem>>, vector<29x128xf32>,
      %c0_90 = arith.constant 0 : index
      %c0_91 = arith.constant 0 : index
      %114 = vector.load %arg20[%c0_90, %c0_91] : memref<62x128xf32, #tpu.memory_space<vmem>>, vector<27x128xf32>
      %115 = arith.truncf %114 : vector<27x128xf32> to vector<27x128xbf16>
      %c0_92 = arith.constant 0 : index
      %c0_93 = arith.constant 0 : index
      %c0_94 = arith.constant 0 : index
      %116 = vector.load %arg6[%c0_92, %c0_93, %c0_94] : memref<3x128x128xbf16, #tpu.memory_space<vmem>>, vector<1x128x128xbf16>
      %117 = vector.shape_cast %116 : vector<1x128x128xbf16> to vector<128x128xbf16>
      %cst_95 = arith.constant dense<0.000000e+00> : vector<27x128xf32>
      %118 = tpu.matmul %115, %117, %cst_95 {dimension_numbers = #tpu.dot_dimension_numbers<[1], [0], [0], [1], [0, 0, 1, 1], [], []>} : vector<27x128xbf16>, vector<128x128xbf16>, vector<27x128xf32> -> vector<27x128xf32>
      %c1_96 = arith.constant 1 : index
      %c0_97 = arith.constant 0 : index
      %119 = vector.load %arg20[%c1_96, %c0_97] : memref<62x128xf32, #tpu.memory_space<vmem>>, vector<27x128xf32>
      %120 = arith.truncf %119 : vector<27x128xf32> to vector<27x128xbf16>
      %c1_98 = arith.constant 1 : index
      %c0_99 = arith.constant 0 : index
      %c0_100 = arith.constant 0 : index
      %121 = vector.load %arg6[%c1_98, %c0_99, %c0_100] : memref<3x128x128xbf16, #tpu.memory_space<vmem>>, vector<1x128x128xbf16>
      %122 = vector.shape_cast %121 : vector<1x128x128xbf16> to vector<128x128xbf16>
      %cst_101 = arith.constant dense<0.000000e+00> : vector<27x128xf32>
      %123 = tpu.matmul %120, %122, %cst_101 {dimension_numbers = #tpu.dot_dimension_numbers<[1], [0], [0], [1], [0, 0, 1, 1], [], []>} : vector<27x128xbf16>, vector<128x128xbf16>, vector<27x128xf32> -> vector<27x128xf32>
      %124 = arith.addf %118, %123 : vector<27x128xf32>
      %c2_102 = arith.constant 2 : index
      %c0_103 = arith.constant 0 : index
      %125 = vector.load %arg20[%c2_102, %c0_103] : memref<62x128xf32, #tpu.memory_space<vmem>>, vector<27x128xf32>
      %126 = arith.truncf %125 : vector<27x128xf32> to vector<27x128xbf16>
      %c2_104 = arith.constant 2 : index
      %c0_105 = arith.constant 0 : index
      %c0_106 = arith.constant 0 : index
      %127 = vector.load %arg6[%c2_104, %c0_105, %c0_106] : memref<3x128x128xbf16, #tpu.memory_space<vmem>>, vector<1x128x128xbf16>
      %128 = vector.shape_cast %127 : vector<1x128x128xbf16> to vector<128x128xbf16>
      %cst_107 = arith.constant dense<0.000000e+00> : vector<27x128xf32>
      %129 = tpu.matmul %126, %128, %cst_107 {dimension_numbers = #tpu.dot_dimension_numbers<[1], [0], [0], [1], [0, 0, 1, 1], [], []>} : vector<27x128xbf16>, vector<128x128xbf16>, vector<27x128xf32> -> vector<27x128xf32>
      %130 = arith.addf %124, %129 : vector<27x128xf32>
      %c0_108 = arith.constant 0 : index
      %c0_109 = arith.constant 0 : index
      %131 = vector.load %arg7[%c0_108, %c0_109] : memref<1x128xf32, #tpu.memory_space<vmem>>, vector<1x128xf32>
      %132 = vector.broadcast %131 : vector<1x128xf32> to vector<27x128xf32>
      %133 = arith.addf %130, %132 : vector<27x128xf32>
      %c0_110 = arith.constant 0 : index
      %c0_111 = arith.constant 0 : index
      %134 = vector.load %arg19[%c0_110, %c0_111] : memref<126x128xf32, #tpu.memory_space<vmem>>, vector<27x128xf32>
      tpu.vector_store %arg19[%c0_110, %c0_111], %133 {strides = array<i32>} : memref<126x128xf32, #tpu.memory_space<vmem>>, vector<27x128xf32>,
      %c0_112 = arith.constant 0 : index
      %c0_113 = arith.constant 0 : index
      %135 = tpu.strided_load %arg19[%c0_112, %c0_113] {strides = array<i32: 2, 1>} : memref<126x128xf32, #tpu.memory_space<vmem>>, vector<14x128xf32>
      %c1_114 = arith.constant 1 : index
      %c0_115 = arith.constant 0 : index
      %136 = tpu.strided_load %arg19[%c1_114, %c0_115] {strides = array<i32: 2, 1>} : memref<126x128xf32, #tpu.memory_space<vmem>>, vector<13x128xf32>
      %137 = vector.extract_strided_slice %135 {offsets = [0, 0], sizes = [13, 128], strides = [1, 1]} : vector<14x128xf32> to vector<13x128xf32>
      %138 = arith.maximumf %137, %136 : vector<13x128xf32>
      %139 = vector.extract_strided_slice %135 {offsets = [1, 0], sizes = [13, 128], strides = [1, 1]} : vector<14x128xf32> to vector<13x128xf32>
      %140 = arith.maximumf %138, %139 : vector<13x128xf32>
      %cst_116 = arith.constant 0.000000e+00 : f32
      %141 = vector.broadcast %cst_116 : f32 to vector<13x128xf32>
      %142 = arith.maximumf %140, %141 : vector<13x128xf32>
      %c0_117 = arith.constant 0 : index
      %c0_118 = arith.constant 0 : index
      %143 = vector.load %arg20[%c0_117, %c0_118] : memref<62x128xf32, #tpu.memory_space<vmem>>, vector<13x128xf32>
      tpu.vector_store %arg20[%c0_117, %c0_118], %142 {strides = array<i32>} : memref<62x128xf32, #tpu.memory_space<vmem>>, vector<13x128xf32>,
      %c0_119 = arith.constant 0 : index
      %c0_120 = arith.constant 0 : index
      %144 = vector.load %arg20[%c0_119, %c0_120] : memref<62x128xf32, #tpu.memory_space<vmem>>, vector<11x128xf32>
      %145 = arith.truncf %144 : vector<11x128xf32> to vector<11x128xbf16>
      %c0_121 = arith.constant 0 : index
      %c0_122 = arith.constant 0 : index
      %c0_123 = arith.constant 0 : index
      %146 = vector.load %arg8[%c0_121, %c0_122, %c0_123] : memref<3x128x128xbf16, #tpu.memory_space<vmem>>, vector<1x128x128xbf16>
      %147 = vector.shape_cast %146 : vector<1x128x128xbf16> to vector<128x128xbf16>
      %cst_124 = arith.constant dense<0.000000e+00> : vector<11x128xf32>
      %148 = tpu.matmul %145, %147, %cst_124 {dimension_numbers = #tpu.dot_dimension_numbers<[1], [0], [0], [1], [0, 0, 1, 1], [], []>} : vector<11x128xbf16>, vector<128x128xbf16>, vector<11x128xf32> -> vector<11x128xf32>
      %c1_125 = arith.constant 1 : index
      %c0_126 = arith.constant 0 : index
      %149 = vector.load %arg20[%c1_125, %c0_126] : memref<62x128xf32, #tpu.memory_space<vmem>>, vector<11x128xf32>
      %150 = arith.truncf %149 : vector<11x128xf32> to vector<11x128xbf16>
      %c1_127 = arith.constant 1 : index
      %c0_128 = arith.constant 0 : index
      %c0_129 = arith.constant 0 : index
      %151 = vector.load %arg8[%c1_127, %c0_128, %c0_129] : memref<3x128x128xbf16, #tpu.memory_space<vmem>>, vector<1x128x128xbf16>
      %152 = vector.shape_cast %151 : vector<1x128x128xbf16> to vector<128x128xbf16>
      %cst_130 = arith.constant dense<0.000000e+00> : vector<11x128xf32>
      %153 = tpu.matmul %150, %152, %cst_130 {dimension_numbers = #tpu.dot_dimension_numbers<[1], [0], [0], [1], [0, 0, 1, 1], [], []>} : vector<11x128xbf16>, vector<128x128xbf16>, vector<11x128xf32> -> vector<11x128xf32>
      %154 = arith.addf %148, %153 : vector<11x128xf32>
      %c2_131 = arith.constant 2 : index
      %c0_132 = arith.constant 0 : index
      %155 = vector.load %arg20[%c2_131, %c0_132] : memref<62x128xf32, #tpu.memory_space<vmem>>, vector<11x128xf32>
      %156 = arith.truncf %155 : vector<11x128xf32> to vector<11x128xbf16>
      %c2_133 = arith.constant 2 : index
      %c0_134 = arith.constant 0 : index
      %c0_135 = arith.constant 0 : index
      %157 = vector.load %arg8[%c2_133, %c0_134, %c0_135] : memref<3x128x128xbf16, #tpu.memory_space<vmem>>, vector<1x128x128xbf16>
      %158 = vector.shape_cast %157 : vector<1x128x128xbf16> to vector<128x128xbf16>
      %cst_136 = arith.constant dense<0.000000e+00> : vector<11x128xf32>
      %159 = tpu.matmul %156, %158, %cst_136 {dimension_numbers = #tpu.dot_dimension_numbers<[1], [0], [0], [1], [0, 0, 1, 1], [], []>} : vector<11x128xbf16>, vector<128x128xbf16>, vector<11x128xf32> -> vector<11x128xf32>
      %160 = arith.addf %154, %159 : vector<11x128xf32>
      %c0_137 = arith.constant 0 : index
      %c0_138 = arith.constant 0 : index
      %161 = vector.load %arg9[%c0_137, %c0_138] : memref<1x128xf32, #tpu.memory_space<vmem>>, vector<1x128xf32>
      %162 = vector.broadcast %161 : vector<1x128xf32> to vector<11x128xf32>
      %163 = arith.addf %160, %162 : vector<11x128xf32>
      %c0_139 = arith.constant 0 : index
      %c0_140 = arith.constant 0 : index
      %164 = vector.load %arg19[%c0_139, %c0_140] : memref<126x128xf32, #tpu.memory_space<vmem>>, vector<11x128xf32>
      tpu.vector_store %arg19[%c0_139, %c0_140], %163 {strides = array<i32>} : memref<126x128xf32, #tpu.memory_space<vmem>>, vector<11x128xf32>,
      %c0_141 = arith.constant 0 : index
      %c0_142 = arith.constant 0 : index
      %165 = tpu.strided_load %arg19[%c0_141, %c0_142] {strides = array<i32: 2, 1>} : memref<126x128xf32, #tpu.memory_space<vmem>>, vector<6x128xf32>
      %c1_143 = arith.constant 1 : index
      %c0_144 = arith.constant 0 : index
      %166 = tpu.strided_load %arg19[%c1_143, %c0_144] {strides = array<i32: 2, 1>} : memref<126x128xf32, #tpu.memory_space<vmem>>, vector<5x128xf32>
      %167 = vector.extract_strided_slice %165 {offsets = [0, 0], sizes = [5, 128], strides = [1, 1]} : vector<6x128xf32> to vector<5x128xf32>
      %168 = arith.maximumf %167, %166 : vector<5x128xf32>
      %169 = vector.extract_strided_slice %165 {offsets = [1, 0], sizes = [5, 128], strides = [1, 1]} : vector<6x128xf32> to vector<5x128xf32>
      %170 = arith.maximumf %168, %169 : vector<5x128xf32>
      %cst_145 = arith.constant 0.000000e+00 : f32
      %171 = vector.broadcast %cst_145 : f32 to vector<5x128xf32>
      %172 = arith.maximumf %170, %171 : vector<5x128xf32>
      %c0_146 = arith.constant 0 : index
      %c0_147 = arith.constant 0 : index
      %173 = vector.load %arg20[%c0_146, %c0_147] : memref<62x128xf32, #tpu.memory_space<vmem>>, vector<5x128xf32>
      tpu.vector_store %arg20[%c0_146, %c0_147], %172 {strides = array<i32>} : memref<62x128xf32, #tpu.memory_space<vmem>>, vector<5x128xf32>,
      %c0_148 = arith.constant 0 : index
      %c0_149 = arith.constant 0 : index
      %174 = vector.load %arg20[%c0_148, %c0_149] : memref<62x128xf32, #tpu.memory_space<vmem>>, vector<3x128xf32>
      %175 = arith.truncf %174 : vector<3x128xf32> to vector<3x128xbf16>
      %c0_150 = arith.constant 0 : index
      %c0_151 = arith.constant 0 : index
      %c0_152 = arith.constant 0 : index
      %176 = vector.load %arg10[%c0_150, %c0_151, %c0_152] : memref<3x128x128xbf16, #tpu.memory_space<vmem>>, vector<1x128x128xbf16>
      %177 = vector.shape_cast %176 : vector<1x128x128xbf16> to vector<128x128xbf16>
      %cst_153 = arith.constant dense<0.000000e+00> : vector<3x128xf32>
      %178 = tpu.matmul %175, %177, %cst_153 {dimension_numbers = #tpu.dot_dimension_numbers<[1], [0], [0], [1], [0, 0, 1, 1], [], []>} : vector<3x128xbf16>, vector<128x128xbf16>, vector<3x128xf32> -> vector<3x128xf32>
      %c1_154 = arith.constant 1 : index
      %c0_155 = arith.constant 0 : index
      %179 = vector.load %arg20[%c1_154, %c0_155] : memref<62x128xf32, #tpu.memory_space<vmem>>, vector<3x128xf32>
      %180 = arith.truncf %179 : vector<3x128xf32> to vector<3x128xbf16>
      %c1_156 = arith.constant 1 : index
      %c0_157 = arith.constant 0 : index
      %c0_158 = arith.constant 0 : index
      %181 = vector.load %arg10[%c1_156, %c0_157, %c0_158] : memref<3x128x128xbf16, #tpu.memory_space<vmem>>, vector<1x128x128xbf16>
      %182 = vector.shape_cast %181 : vector<1x128x128xbf16> to vector<128x128xbf16>
      %cst_159 = arith.constant dense<0.000000e+00> : vector<3x128xf32>
      %183 = tpu.matmul %180, %182, %cst_159 {dimension_numbers = #tpu.dot_dimension_numbers<[1], [0], [0], [1], [0, 0, 1, 1], [], []>} : vector<3x128xbf16>, vector<128x128xbf16>, vector<3x128xf32> -> vector<3x128xf32>
      %184 = arith.addf %178, %183 : vector<3x128xf32>
      %c2_160 = arith.constant 2 : index
      %c0_161 = arith.constant 0 : index
      %185 = vector.load %arg20[%c2_160, %c0_161] : memref<62x128xf32, #tpu.memory_space<vmem>>, vector<3x128xf32>
      %186 = arith.truncf %185 : vector<3x128xf32> to vector<3x128xbf16>
      %c2_162 = arith.constant 2 : index
      %c0_163 = arith.constant 0 : index
      %c0_164 = arith.constant 0 : index
      %187 = vector.load %arg10[%c2_162, %c0_163, %c0_164] : memref<3x128x128xbf16, #tpu.memory_space<vmem>>, vector<1x128x128xbf16>
      %188 = vector.shape_cast %187 : vector<1x128x128xbf16> to vector<128x128xbf16>
      %cst_165 = arith.constant dense<0.000000e+00> : vector<3x128xf32>
      %189 = tpu.matmul %186, %188, %cst_165 {dimension_numbers = #tpu.dot_dimension_numbers<[1], [0], [0], [1], [0, 0, 1, 1], [], []>} : vector<3x128xbf16>, vector<128x128xbf16>, vector<3x128xf32> -> vector<3x128xf32>
      %190 = arith.addf %184, %189 : vector<3x128xf32>
      %c0_166 = arith.constant 0 : index
      %c0_167 = arith.constant 0 : index
      %191 = vector.load %arg11[%c0_166, %c0_167] : memref<1x128xf32, #tpu.memory_space<vmem>>, vector<1x128xf32>
      %192 = vector.broadcast %191 : vector<1x128xf32> to vector<3x128xf32>
      %193 = arith.addf %190, %192 : vector<3x128xf32>
      %cst_168 = arith.constant 0.000000e+00 : f32
      %194 = vector.broadcast %cst_168 : f32 to vector<3x128xf32>
      %195 = arith.maximumf %193, %194 : vector<3x128xf32>
      %c0_169 = arith.constant 0 : index
      %c0_170 = arith.constant 0 : index
      %196 = vector.load %arg19[%c0_169, %c0_170] : memref<126x128xf32, #tpu.memory_space<vmem>>, vector<3x128xf32>
      tpu.vector_store %arg19[%c0_169, %c0_170], %195 {strides = array<i32>} : memref<126x128xf32, #tpu.memory_space<vmem>>, vector<3x128xf32>,
      %c0_171 = arith.constant 0 : index
      %c0_172 = arith.constant 0 : index
      %197 = vector.load %arg19[%c0_171, %c0_172] : memref<126x128xf32, #tpu.memory_space<vmem>>, vector<1x128xf32>
      %198 = arith.truncf %197 : vector<1x128xf32> to vector<1x128xbf16>
      %c0_173 = arith.constant 0 : index
      %c0_174 = arith.constant 0 : index
      %c0_175 = arith.constant 0 : index
      %199 = vector.load %arg12[%c0_173, %c0_174, %c0_175] : memref<3x128x128xbf16, #tpu.memory_space<vmem>>, vector<1x128x128xbf16>
      %200 = vector.shape_cast %199 : vector<1x128x128xbf16> to vector<128x128xbf16>
      %cst_176 = arith.constant dense<0.000000e+00> : vector<1x128xf32>
      %201 = tpu.matmul %198, %200, %cst_176 {dimension_numbers = #tpu.dot_dimension_numbers<[1], [0], [0], [1], [0, 0, 1, 1], [], []>} : vector<1x128xbf16>, vector<128x128xbf16>, vector<1x128xf32> -> vector<1x128xf32>
      %c1_177 = arith.constant 1 : index
      %c0_178 = arith.constant 0 : index
      %202 = vector.load %arg19[%c1_177, %c0_178] : memref<126x128xf32, #tpu.memory_space<vmem>>, vector<1x128xf32>
      %203 = arith.truncf %202 : vector<1x128xf32> to vector<1x128xbf16>
      %c1_179 = arith.constant 1 : index
      %c0_180 = arith.constant 0 : index
      %c0_181 = arith.constant 0 : index
      %204 = vector.load %arg12[%c1_179, %c0_180, %c0_181] : memref<3x128x128xbf16, #tpu.memory_space<vmem>>, vector<1x128x128xbf16>
      %205 = vector.shape_cast %204 : vector<1x128x128xbf16> to vector<128x128xbf16>
      %cst_182 = arith.constant dense<0.000000e+00> : vector<1x128xf32>
      %206 = tpu.matmul %203, %205, %cst_182 {dimension_numbers = #tpu.dot_dimension_numbers<[1], [0], [0], [1], [0, 0, 1, 1], [], []>} : vector<1x128xbf16>, vector<128x128xbf16>, vector<1x128xf32> -> vector<1x128xf32>
      %207 = arith.addf %201, %206 : vector<1x128xf32>
      %c2_183 = arith.constant 2 : index
      %c0_184 = arith.constant 0 : index
      %208 = vector.load %arg19[%c2_183, %c0_184] : memref<126x128xf32, #tpu.memory_space<vmem>>, vector<1x128xf32>
      %209 = arith.truncf %208 : vector<1x128xf32> to vector<1x128xbf16>
      %c2_185 = arith.constant 2 : index
      %c0_186 = arith.constant 0 : index
      %c0_187 = arith.constant 0 : index
      %210 = vector.load %arg12[%c2_185, %c0_186, %c0_187] : memref<3x128x128xbf16, #tpu.memory_space<vmem>>, vector<1x128x128xbf16>
      %211 = vector.shape_cast %210 : vector<1x128x128xbf16> to vector<128x128xbf16>
      %cst_188 = arith.constant dense<0.000000e+00> : vector<1x128xf32>
      %212 = tpu.matmul %209, %211, %cst_188 {dimension_numbers = #tpu.dot_dimension_numbers<[1], [0], [0], [1], [0, 0, 1, 1], [], []>} : vector<1x128xbf16>, vector<128x128xbf16>, vector<1x128xf32> -> vector<1x128xf32>
      %213 = arith.addf %207, %212 : vector<1x128xf32>
      %c0_189 = arith.constant 0 : index
      %c0_190 = arith.constant 0 : index
      %214 = vector.load %arg13[%c0_189, %c0_190] : memref<1x128xf32, #tpu.memory_space<vmem>>, vector<1x128xf32>
      %215 = arith.addf %213, %214 : vector<1x128xf32>
      %cst_191 = arith.constant 0.000000e+00 : f32
      %216 = vector.broadcast %cst_191 : f32 to vector<1x128xf32>
      %217 = arith.maximumf %215, %216 : vector<1x128xf32>
      %218 = arith.index_cast %64 : i32 to index
      %c0_192 = arith.constant 0 : index
      %219 = vector.load %arg23[%218, %c0_192] : memref<16x128xf32, #tpu.memory_space<vmem>>, vector<1x128xf32>
      tpu.vector_store %arg23[%218, %c0_192], %217 {strides = array<i32>} : memref<16x128xf32, #tpu.memory_space<vmem>>, vector<1x128xf32>,
      %c2_i32_193 = arith.constant 2 : i32
      %220 = arith.muli %c2_i32_193, %arg24 : i32
      %c1_i32_194 = arith.constant 1 : i32
      %221 = arith.addi %220, %c1_i32_194 : i32
      %222 = arith.index_cast %221 : i32 to index
      %c0_195 = arith.constant 0 : index
      %c0_196 = arith.constant 0 : index
      %223 = vector.load %arg1[%222, %c0_195, %c0_196] : memref<16x126x48xf32, #tpu.memory_space<vmem>>, vector<1x126x48xf32>
      %224 = vector.shape_cast %223 : vector<1x126x48xf32> to vector<126x48xf32>
      %225 = arith.truncf %224 : vector<126x48xf32> to vector<126x48xbf16>
      %c0_197 = arith.constant 0 : index
      %c0_198 = arith.constant 0 : index
      %226 = vector.load %arg2[%c0_197, %c0_198] : memref<48x128xbf16, #tpu.memory_space<vmem>>, vector<48x128xbf16>
      %cst_199 = arith.constant dense<0.000000e+00> : vector<126x128xf32>
      %227 = tpu.matmul %225, %226, %cst_199 {dimension_numbers = #tpu.dot_dimension_numbers<[1], [0], [0], [1], [0, 0, 1, 1], [], []>} : vector<126x48xbf16>, vector<48x128xbf16>, vector<126x128xf32> -> vector<126x128xf32>
      %c0_200 = arith.constant 0 : index
      %c0_201 = arith.constant 0 : index
      %228 = vector.load %arg3[%c0_200, %c0_201] : memref<1x128xf32, #tpu.memory_space<vmem>>, vector<1x128xf32>
      %229 = vector.broadcast %228 : vector<1x128xf32> to vector<126x128xf32>
      %230 = arith.addf %227, %229 : vector<126x128xf32>
      %c0_202 = arith.constant 0 : index
      %c0_203 = arith.constant 0 : index
      %231 = vector.load %arg21[%c0_202, %c0_203] : memref<126x128xf32, #tpu.memory_space<vmem>>, vector<126x128xf32>
      tpu.vector_store %arg21[%c0_202, %c0_203], %230 {strides = array<i32>} : memref<126x128xf32, #tpu.memory_space<vmem>>, vector<126x128xf32>,
      %c0_204 = arith.constant 0 : index
      %c0_205 = arith.constant 0 : index
      %232 = tpu.strided_load %arg21[%c0_204, %c0_205] {strides = array<i32: 2, 1>} : memref<126x128xf32, #tpu.memory_space<vmem>>, vector<63x128xf32>
      %c1_206 = arith.constant 1 : index
      %c0_207 = arith.constant 0 : index
      %233 = tpu.strided_load %arg21[%c1_206, %c0_207] {strides = array<i32: 2, 1>} : memref<126x128xf32, #tpu.memory_space<vmem>>, vector<62x128xf32>
      %234 = vector.extract_strided_slice %232 {offsets = [0, 0], sizes = [62, 128], strides = [1, 1]} : vector<63x128xf32> to vector<62x128xf32>
      %235 = arith.maximumf %234, %233 : vector<62x128xf32>
      %236 = vector.extract_strided_slice %232 {offsets = [1, 0], sizes = [62, 128], strides = [1, 1]} : vector<63x128xf32> to vector<62x128xf32>
      %237 = arith.maximumf %235, %236 : vector<62x128xf32>
      %cst_208 = arith.constant 0.000000e+00 : f32
      %238 = vector.broadcast %cst_208 : f32 to vector<62x128xf32>
      %239 = arith.maximumf %237, %238 : vector<62x128xf32>
      %c0_209 = arith.constant 0 : index
      %c0_210 = arith.constant 0 : index
      %240 = vector.load %arg22[%c0_209, %c0_210] : memref<62x128xf32, #tpu.memory_space<vmem>>, vector<62x128xf32>
      tpu.vector_store %arg22[%c0_209, %c0_210], %239 {strides = array<i32>} : memref<62x128xf32, #tpu.memory_space<vmem>>, vector<62x128xf32>,
      %c0_211 = arith.constant 0 : index
      %c0_212 = arith.constant 0 : index
      %241 = vector.load %arg22[%c0_211, %c0_212] : memref<62x128xf32, #tpu.memory_space<vmem>>, vector<60x128xf32>
      %242 = arith.truncf %241 : vector<60x128xf32> to vector<60x128xbf16>
      %c0_213 = arith.constant 0 : index
      %c0_214 = arith.constant 0 : index
      %c0_215 = arith.constant 0 : index
      %243 = vector.load %arg4[%c0_213, %c0_214, %c0_215] : memref<3x128x128xbf16, #tpu.memory_space<vmem>>, vector<1x128x128xbf16>
      %244 = vector.shape_cast %243 : vector<1x128x128xbf16> to vector<128x128xbf16>
      %cst_216 = arith.constant dense<0.000000e+00> : vector<60x128xf32>
      %245 = tpu.matmul %242, %244, %cst_216 {dimension_numbers = #tpu.dot_dimension_numbers<[1], [0], [0], [1], [0, 0, 1, 1], [], []>} : vector<60x128xbf16>, vector<128x128xbf16>, vector<60x128xf32> -> vector<60x128xf32>
      %c1_217 = arith.constant 1 : index
      %c0_218 = arith.constant 0 : index
      %246 = vector.load %arg22[%c1_217, %c0_218] : memref<62x128xf32, #tpu.memory_space<vmem>>, vector<60x128xf32>
      %247 = arith.truncf %246 : vector<60x128xf32> to vector<60x128xbf16>
      %c1_219 = arith.constant 1 : index
      %c0_220 = arith.constant 0 : index
      %c0_221 = arith.constant 0 : index
      %248 = vector.load %arg4[%c1_219, %c0_220, %c0_221] : memref<3x128x128xbf16, #tpu.memory_space<vmem>>, vector<1x128x128xbf16>
      %249 = vector.shape_cast %248 : vector<1x128x128xbf16> to vector<128x128xbf16>
      %cst_222 = arith.constant dense<0.000000e+00> : vector<60x128xf32>
      %250 = tpu.matmul %247, %249, %cst_222 {dimension_numbers = #tpu.dot_dimension_numbers<[1], [0], [0], [1], [0, 0, 1, 1], [], []>} : vector<60x128xbf16>, vector<128x128xbf16>, vector<60x128xf32> -> vector<60x128xf32>
      %251 = arith.addf %245, %250 : vector<60x128xf32>
      %c2_223 = arith.constant 2 : index
      %c0_224 = arith.constant 0 : index
      %252 = vector.load %arg22[%c2_223, %c0_224] : memref<62x128xf32, #tpu.memory_space<vmem>>, vector<60x128xf32>
      %253 = arith.truncf %252 : vector<60x128xf32> to vector<60x128xbf16>
      %c2_225 = arith.constant 2 : index
      %c0_226 = arith.constant 0 : index
      %c0_227 = arith.constant 0 : index
      %254 = vector.load %arg4[%c2_225, %c0_226, %c0_227] : memref<3x128x128xbf16, #tpu.memory_space<vmem>>, vector<1x128x128xbf16>
      %255 = vector.shape_cast %254 : vector<1x128x128xbf16> to vector<128x128xbf16>
      %cst_228 = arith.constant dense<0.000000e+00> : vector<60x128xf32>
      %256 = tpu.matmul %253, %255, %cst_228 {dimension_numbers = #tpu.dot_dimension_numbers<[1], [0], [0], [1], [0, 0, 1, 1], [], []>} : vector<60x128xbf16>, vector<128x128xbf16>, vector<60x128xf32> -> vector<60x128xf32>
      %257 = arith.addf %251, %256 : vector<60x128xf32>
      %c0_229 = arith.constant 0 : index
      %c0_230 = arith.constant 0 : index
      %258 = vector.load %arg5[%c0_229, %c0_230] : memref<1x128xf32, #tpu.memory_space<vmem>>, vector<1x128xf32>
      %259 = vector.broadcast %258 : vector<1x128xf32> to vector<60x128xf32>
      %260 = arith.addf %257, %259 : vector<60x128xf32>
      %c0_231 = arith.constant 0 : index
      %c0_232 = arith.constant 0 : index
      %261 = vector.load %arg21[%c0_231, %c0_232] : memref<126x128xf32, #tpu.memory_space<vmem>>, vector<60x128xf32>
      tpu.vector_store %arg21[%c0_231, %c0_232], %260 {strides = array<i32>} : memref<126x128xf32, #tpu.memory_space<vmem>>, vector<60x128xf32>,
      %c0_233 = arith.constant 0 : index
      %c0_234 = arith.constant 0 : index
      %262 = tpu.strided_load %arg21[%c0_233, %c0_234] {strides = array<i32: 2, 1>} : memref<126x128xf32, #tpu.memory_space<vmem>>, vector<30x128xf32>
      %c1_235 = arith.constant 1 : index
      %c0_236 = arith.constant 0 : index
      %263 = tpu.strided_load %arg21[%c1_235, %c0_236] {strides = array<i32: 2, 1>} : memref<126x128xf32, #tpu.memory_space<vmem>>, vector<29x128xf32>
      %264 = vector.extract_strided_slice %262 {offsets = [0, 0], sizes = [29, 128], strides = [1, 1]} : vector<30x128xf32> to vector<29x128xf32>
      %265 = arith.maximumf %264, %263 : vector<29x128xf32>
      %266 = vector.extract_strided_slice %262 {offsets = [1, 0], sizes = [29, 128], strides = [1, 1]} : vector<30x128xf32> to vector<29x128xf32>
      %267 = arith.maximumf %265, %266 : vector<29x128xf32>
      %cst_237 = arith.constant 0.000000e+00 : f32
      %268 = vector.broadcast %cst_237 : f32 to vector<29x128xf32>
      %269 = arith.maximumf %267, %268 : vector<29x128xf32>
      %c0_238 = arith.constant 0 : index
      %c0_239 = arith.constant 0 : index
      %270 = vector.load %arg22[%c0_238, %c0_239] : memref<62x128xf32, #tpu.memory_space<vmem>>, vector<29x128xf32>
      tpu.vector_store %arg22[%c0_238, %c0_239], %269 {strides = array<i32>} : memref<62x128xf32, #tpu.memory_space<vmem>>, vector<29x128xf32>,
      %c0_240 = arith.constant 0 : index
      %c0_241 = arith.constant 0 : index
      %271 = vector.load %arg22[%c0_240, %c0_241] : memref<62x128xf32, #tpu.memory_space<vmem>>, vector<27x128xf32>
      %272 = arith.truncf %271 : vector<27x128xf32> to vector<27x128xbf16>
      %c0_242 = arith.constant 0 : index
      %c0_243 = arith.constant 0 : index
      %c0_244 = arith.constant 0 : index
      %273 = vector.load %arg6[%c0_242, %c0_243, %c0_244] : memref<3x128x128xbf16, #tpu.memory_space<vmem>>, vector<1x128x128xbf16>
      %274 = vector.shape_cast %273 : vector<1x128x128xbf16> to vector<128x128xbf16>
      %cst_245 = arith.constant dense<0.000000e+00> : vector<27x128xf32>
      %275 = tpu.matmul %272, %274, %cst_245 {dimension_numbers = #tpu.dot_dimension_numbers<[1], [0], [0], [1], [0, 0, 1, 1], [], []>} : vector<27x128xbf16>, vector<128x128xbf16>, vector<27x128xf32> -> vector<27x128xf32>
      %c1_246 = arith.constant 1 : index
      %c0_247 = arith.constant 0 : index
      %276 = vector.load %arg22[%c1_246, %c0_247] : memref<62x128xf32, #tpu.memory_space<vmem>>, vector<27x128xf32>
      %277 = arith.truncf %276 : vector<27x128xf32> to vector<27x128xbf16>
      %c1_248 = arith.constant 1 : index
      %c0_249 = arith.constant 0 : index
      %c0_250 = arith.constant 0 : index
      %278 = vector.load %arg6[%c1_248, %c0_249, %c0_250] : memref<3x128x128xbf16, #tpu.memory_space<vmem>>, vector<1x128x128xbf16>
      %279 = vector.shape_cast %278 : vector<1x128x128xbf16> to vector<128x128xbf16>
      %cst_251 = arith.constant dense<0.000000e+00> : vector<27x128xf32>
      %280 = tpu.matmul %277, %279, %cst_251 {dimension_numbers = #tpu.dot_dimension_numbers<[1], [0], [0], [1], [0, 0, 1, 1], [], []>} : vector<27x128xbf16>, vector<128x128xbf16>, vector<27x128xf32> -> vector<27x128xf32>
      %281 = arith.addf %275, %280 : vector<27x128xf32>
      %c2_252 = arith.constant 2 : index
      %c0_253 = arith.constant 0 : index
      %282 = vector.load %arg22[%c2_252, %c0_253] : memref<62x128xf32, #tpu.memory_space<vmem>>, vector<27x128xf32>
      %283 = arith.truncf %282 : vector<27x128xf32> to vector<27x128xbf16>
      %c2_254 = arith.constant 2 : index
      %c0_255 = arith.constant 0 : index
      %c0_256 = arith.constant 0 : index
      %284 = vector.load %arg6[%c2_254, %c0_255, %c0_256] : memref<3x128x128xbf16, #tpu.memory_space<vmem>>, vector<1x128x128xbf16>
      %285 = vector.shape_cast %284 : vector<1x128x128xbf16> to vector<128x128xbf16>
      %cst_257 = arith.constant dense<0.000000e+00> : vector<27x128xf32>
      %286 = tpu.matmul %283, %285, %cst_257 {dimension_numbers = #tpu.dot_dimension_numbers<[1], [0], [0], [1], [0, 0, 1, 1], [], []>} : vector<27x128xbf16>, vector<128x128xbf16>, vector<27x128xf32> -> vector<27x128xf32>
      %287 = arith.addf %281, %286 : vector<27x128xf32>
      %c0_258 = arith.constant 0 : index
      %c0_259 = arith.constant 0 : index
      %288 = vector.load %arg7[%c0_258, %c0_259] : memref<1x128xf32, #tpu.memory_space<vmem>>, vector<1x128xf32>
      %289 = vector.broadcast %288 : vector<1x128xf32> to vector<27x128xf32>
      %290 = arith.addf %287, %289 : vector<27x128xf32>
      %c0_260 = arith.constant 0 : index
      %c0_261 = arith.constant 0 : index
      %291 = vector.load %arg21[%c0_260, %c0_261] : memref<126x128xf32, #tpu.memory_space<vmem>>, vector<27x128xf32>
      tpu.vector_store %arg21[%c0_260, %c0_261], %290 {strides = array<i32>} : memref<126x128xf32, #tpu.memory_space<vmem>>, vector<27x128xf32>,
      %c0_262 = arith.constant 0 : index
      %c0_263 = arith.constant 0 : index
      %292 = tpu.strided_load %arg21[%c0_262, %c0_263] {strides = array<i32: 2, 1>} : memref<126x128xf32, #tpu.memory_space<vmem>>, vector<14x128xf32>
      %c1_264 = arith.constant 1 : index
      %c0_265 = arith.constant 0 : index
      %293 = tpu.strided_load %arg21[%c1_264, %c0_265] {strides = array<i32: 2, 1>} : memref<126x128xf32, #tpu.memory_space<vmem>>, vector<13x128xf32>
      %294 = vector.extract_strided_slice %292 {offsets = [0, 0], sizes = [13, 128], strides = [1, 1]} : vector<14x128xf32> to vector<13x128xf32>
      %295 = arith.maximumf %294, %293 : vector<13x128xf32>
      %296 = vector.extract_strided_slice %292 {offsets = [1, 0], sizes = [13, 128], strides = [1, 1]} : vector<14x128xf32> to vector<13x128xf32>
      %297 = arith.maximumf %295, %296 : vector<13x128xf32>
      %cst_266 = arith.constant 0.000000e+00 : f32
      %298 = vector.broadcast %cst_266 : f32 to vector<13x128xf32>
      %299 = arith.maximumf %297, %298 : vector<13x128xf32>
      %c0_267 = arith.constant 0 : index
      %c0_268 = arith.constant 0 : index
      %300 = vector.load %arg22[%c0_267, %c0_268] : memref<62x128xf32, #tpu.memory_space<vmem>>, vector<13x128xf32>
      tpu.vector_store %arg22[%c0_267, %c0_268], %299 {strides = array<i32>} : memref<62x128xf32, #tpu.memory_space<vmem>>, vector<13x128xf32>,
      %c0_269 = arith.constant 0 : index
      %c0_270 = arith.constant 0 : index
      %301 = vector.load %arg22[%c0_269, %c0_270] : memref<62x128xf32, #tpu.memory_space<vmem>>, vector<11x128xf32>
      %302 = arith.truncf %301 : vector<11x128xf32> to vector<11x128xbf16>
      %c0_271 = arith.constant 0 : index
      %c0_272 = arith.constant 0 : index
      %c0_273 = arith.constant 0 : index
      %303 = vector.load %arg8[%c0_271, %c0_272, %c0_273] : memref<3x128x128xbf16, #tpu.memory_space<vmem>>, vector<1x128x128xbf16>
      %304 = vector.shape_cast %303 : vector<1x128x128xbf16> to vector<128x128xbf16>
      %cst_274 = arith.constant dense<0.000000e+00> : vector<11x128xf32>
      %305 = tpu.matmul %302, %304, %cst_274 {dimension_numbers = #tpu.dot_dimension_numbers<[1], [0], [0], [1], [0, 0, 1, 1], [], []>} : vector<11x128xbf16>, vector<128x128xbf16>, vector<11x128xf32> -> vector<11x128xf32>
      %c1_275 = arith.constant 1 : index
      %c0_276 = arith.constant 0 : index
      %306 = vector.load %arg22[%c1_275, %c0_276] : memref<62x128xf32, #tpu.memory_space<vmem>>, vector<11x128xf32>
      %307 = arith.truncf %306 : vector<11x128xf32> to vector<11x128xbf16>
      %c1_277 = arith.constant 1 : index
      %c0_278 = arith.constant 0 : index
      %c0_279 = arith.constant 0 : index
      %308 = vector.load %arg8[%c1_277, %c0_278, %c0_279] : memref<3x128x128xbf16, #tpu.memory_space<vmem>>, vector<1x128x128xbf16>
      %309 = vector.shape_cast %308 : vector<1x128x128xbf16> to vector<128x128xbf16>
      %cst_280 = arith.constant dense<0.000000e+00> : vector<11x128xf32>
      %310 = tpu.matmul %307, %309, %cst_280 {dimension_numbers = #tpu.dot_dimension_numbers<[1], [0], [0], [1], [0, 0, 1, 1], [], []>} : vector<11x128xbf16>, vector<128x128xbf16>, vector<11x128xf32> -> vector<11x128xf32>
      %311 = arith.addf %305, %310 : vector<11x128xf32>
      %c2_281 = arith.constant 2 : index
      %c0_282 = arith.constant 0 : index
      %312 = vector.load %arg22[%c2_281, %c0_282] : memref<62x128xf32, #tpu.memory_space<vmem>>, vector<11x128xf32>
      %313 = arith.truncf %312 : vector<11x128xf32> to vector<11x128xbf16>
      %c2_283 = arith.constant 2 : index
      %c0_284 = arith.constant 0 : index
      %c0_285 = arith.constant 0 : index
      %314 = vector.load %arg8[%c2_283, %c0_284, %c0_285] : memref<3x128x128xbf16, #tpu.memory_space<vmem>>, vector<1x128x128xbf16>
      %315 = vector.shape_cast %314 : vector<1x128x128xbf16> to vector<128x128xbf16>
      %cst_286 = arith.constant dense<0.000000e+00> : vector<11x128xf32>
      %316 = tpu.matmul %313, %315, %cst_286 {dimension_numbers = #tpu.dot_dimension_numbers<[1], [0], [0], [1], [0, 0, 1, 1], [], []>} : vector<11x128xbf16>, vector<128x128xbf16>, vector<11x128xf32> -> vector<11x128xf32>
      %317 = arith.addf %311, %316 : vector<11x128xf32>
      %c0_287 = arith.constant 0 : index
      %c0_288 = arith.constant 0 : index
      %318 = vector.load %arg9[%c0_287, %c0_288] : memref<1x128xf32, #tpu.memory_space<vmem>>, vector<1x128xf32>
      %319 = vector.broadcast %318 : vector<1x128xf32> to vector<11x128xf32>
      %320 = arith.addf %317, %319 : vector<11x128xf32>
      %c0_289 = arith.constant 0 : index
      %c0_290 = arith.constant 0 : index
      %321 = vector.load %arg21[%c0_289, %c0_290] : memref<126x128xf32, #tpu.memory_space<vmem>>, vector<11x128xf32>
      tpu.vector_store %arg21[%c0_289, %c0_290], %320 {strides = array<i32>} : memref<126x128xf32, #tpu.memory_space<vmem>>, vector<11x128xf32>,
      %c0_291 = arith.constant 0 : index
      %c0_292 = arith.constant 0 : index
      %322 = tpu.strided_load %arg21[%c0_291, %c0_292] {strides = array<i32: 2, 1>} : memref<126x128xf32, #tpu.memory_space<vmem>>, vector<6x128xf32>
      %c1_293 = arith.constant 1 : index
      %c0_294 = arith.constant 0 : index
      %323 = tpu.strided_load %arg21[%c1_293, %c0_294] {strides = array<i32: 2, 1>} : memref<126x128xf32, #tpu.memory_space<vmem>>, vector<5x128xf32>
      %324 = vector.extract_strided_slice %322 {offsets = [0, 0], sizes = [5, 128], strides = [1, 1]} : vector<6x128xf32> to vector<5x128xf32>
      %325 = arith.maximumf %324, %323 : vector<5x128xf32>
      %326 = vector.extract_strided_slice %322 {offsets = [1, 0], sizes = [5, 128], strides = [1, 1]} : vector<6x128xf32> to vector<5x128xf32>
      %327 = arith.maximumf %325, %326 : vector<5x128xf32>
      %cst_295 = arith.constant 0.000000e+00 : f32
      %328 = vector.broadcast %cst_295 : f32 to vector<5x128xf32>
      %329 = arith.maximumf %327, %328 : vector<5x128xf32>
      %c0_296 = arith.constant 0 : index
      %c0_297 = arith.constant 0 : index
      %330 = vector.load %arg22[%c0_296, %c0_297] : memref<62x128xf32, #tpu.memory_space<vmem>>, vector<5x128xf32>
      tpu.vector_store %arg22[%c0_296, %c0_297], %329 {strides = array<i32>} : memref<62x128xf32, #tpu.memory_space<vmem>>, vector<5x128xf32>,
      %c0_298 = arith.constant 0 : index
      %c0_299 = arith.constant 0 : index
      %331 = vector.load %arg22[%c0_298, %c0_299] : memref<62x128xf32, #tpu.memory_space<vmem>>, vector<3x128xf32>
      %332 = arith.truncf %331 : vector<3x128xf32> to vector<3x128xbf16>
      %c0_300 = arith.constant 0 : index
      %c0_301 = arith.constant 0 : index
      %c0_302 = arith.constant 0 : index
      %333 = vector.load %arg10[%c0_300, %c0_301, %c0_302] : memref<3x128x128xbf16, #tpu.memory_space<vmem>>, vector<1x128x128xbf16>
      %334 = vector.shape_cast %333 : vector<1x128x128xbf16> to vector<128x128xbf16>
      %cst_303 = arith.constant dense<0.000000e+00> : vector<3x128xf32>
      %335 = tpu.matmul %332, %334, %cst_303 {dimension_numbers = #tpu.dot_dimension_numbers<[1], [0], [0], [1], [0, 0, 1, 1], [], []>} : vector<3x128xbf16>, vector<128x128xbf16>, vector<3x128xf32> -> vector<3x128xf32>
      %c1_304 = arith.constant 1 : index
      %c0_305 = arith.constant 0 : index
      %336 = vector.load %arg22[%c1_304, %c0_305] : memref<62x128xf32, #tpu.memory_space<vmem>>, vector<3x128xf32>
      %337 = arith.truncf %336 : vector<3x128xf32> to vector<3x128xbf16>
      %c1_306 = arith.constant 1 : index
      %c0_307 = arith.constant 0 : index
      %c0_308 = arith.constant 0 : index
      %338 = vector.load %arg10[%c1_306, %c0_307, %c0_308] : memref<3x128x128xbf16, #tpu.memory_space<vmem>>, vector<1x128x128xbf16>
      %339 = vector.shape_cast %338 : vector<1x128x128xbf16> to vector<128x128xbf16>
      %cst_309 = arith.constant dense<0.000000e+00> : vector<3x128xf32>
      %340 = tpu.matmul %337, %339, %cst_309 {dimension_numbers = #tpu.dot_dimension_numbers<[1], [0], [0], [1], [0, 0, 1, 1], [], []>} : vector<3x128xbf16>, vector<128x128xbf16>, vector<3x128xf32> -> vector<3x128xf32>
      %341 = arith.addf %335, %340 : vector<3x128xf32>
      %c2_310 = arith.constant 2 : index
      %c0_311 = arith.constant 0 : index
      %342 = vector.load %arg22[%c2_310, %c0_311] : memref<62x128xf32, #tpu.memory_space<vmem>>, vector<3x128xf32>
      %343 = arith.truncf %342 : vector<3x128xf32> to vector<3x128xbf16>
      %c2_312 = arith.constant 2 : index
      %c0_313 = arith.constant 0 : index
      %c0_314 = arith.constant 0 : index
      %344 = vector.load %arg10[%c2_312, %c0_313, %c0_314] : memref<3x128x128xbf16, #tpu.memory_space<vmem>>, vector<1x128x128xbf16>
      %345 = vector.shape_cast %344 : vector<1x128x128xbf16> to vector<128x128xbf16>
      %cst_315 = arith.constant dense<0.000000e+00> : vector<3x128xf32>
      %346 = tpu.matmul %343, %345, %cst_315 {dimension_numbers = #tpu.dot_dimension_numbers<[1], [0], [0], [1], [0, 0, 1, 1], [], []>} : vector<3x128xbf16>, vector<128x128xbf16>, vector<3x128xf32> -> vector<3x128xf32>
      %347 = arith.addf %341, %346 : vector<3x128xf32>
      %c0_316 = arith.constant 0 : index
      %c0_317 = arith.constant 0 : index
      %348 = vector.load %arg11[%c0_316, %c0_317] : memref<1x128xf32, #tpu.memory_space<vmem>>, vector<1x128xf32>
      %349 = vector.broadcast %348 : vector<1x128xf32> to vector<3x128xf32>
      %350 = arith.addf %347, %349 : vector<3x128xf32>
      %cst_318 = arith.constant 0.000000e+00 : f32
      %351 = vector.broadcast %cst_318 : f32 to vector<3x128xf32>
      %352 = arith.maximumf %350, %351 : vector<3x128xf32>
      %c0_319 = arith.constant 0 : index
      %c0_320 = arith.constant 0 : index
      %353 = vector.load %arg21[%c0_319, %c0_320] : memref<126x128xf32, #tpu.memory_space<vmem>>, vector<3x128xf32>
      tpu.vector_store %arg21[%c0_319, %c0_320], %352 {strides = array<i32>} : memref<126x128xf32, #tpu.memory_space<vmem>>, vector<3x128xf32>,
      %c0_321 = arith.constant 0 : index
      %c0_322 = arith.constant 0 : index
      %354 = vector.load %arg21[%c0_321, %c0_322] : memref<126x128xf32, #tpu.memory_space<vmem>>, vector<1x128xf32>
      %355 = arith.truncf %354 : vector<1x128xf32> to vector<1x128xbf16>
      %c0_323 = arith.constant 0 : index
      %c0_324 = arith.constant 0 : index
      %c0_325 = arith.constant 0 : index
      %356 = vector.load %arg12[%c0_323, %c0_324, %c0_325] : memref<3x128x128xbf16, #tpu.memory_space<vmem>>, vector<1x128x128xbf16>
      %357 = vector.shape_cast %356 : vector<1x128x128xbf16> to vector<128x128xbf16>
      %cst_326 = arith.constant dense<0.000000e+00> : vector<1x128xf32>
      %358 = tpu.matmul %355, %357, %cst_326 {dimension_numbers = #tpu.dot_dimension_numbers<[1], [0], [0], [1], [0, 0, 1, 1], [], []>} : vector<1x128xbf16>, vector<128x128xbf16>, vector<1x128xf32> -> vector<1x128xf32>
      %c1_327 = arith.constant 1 : index
      %c0_328 = arith.constant 0 : index
      %359 = vector.load %arg21[%c1_327, %c0_328] : memref<126x128xf32, #tpu.memory_space<vmem>>, vector<1x128xf32>
      %360 = arith.truncf %359 : vector<1x128xf32> to vector<1x128xbf16>
      %c1_329 = arith.constant 1 : index
      %c0_330 = arith.constant 0 : index
      %c0_331 = arith.constant 0 : index
      %361 = vector.load %arg12[%c1_329, %c0_330, %c0_331] : memref<3x128x128xbf16, #tpu.memory_space<vmem>>, vector<1x128x128xbf16>
      %362 = vector.shape_cast %361 : vector<1x128x128xbf16> to vector<128x128xbf16>
      %cst_332 = arith.constant dense<0.000000e+00> : vector<1x128xf32>
      %363 = tpu.matmul %360, %362, %cst_332 {dimension_numbers = #tpu.dot_dimension_numbers<[1], [0], [0], [1], [0, 0, 1, 1], [], []>} : vector<1x128xbf16>, vector<128x128xbf16>, vector<1x128xf32> -> vector<1x128xf32>
      %364 = arith.addf %358, %363 : vector<1x128xf32>
      %c2_333 = arith.constant 2 : index
      %c0_334 = arith.constant 0 : index
      %365 = vector.load %arg21[%c2_333, %c0_334] : memref<126x128xf32, #tpu.memory_space<vmem>>, vector<1x128xf32>
      %366 = arith.truncf %365 : vector<1x128xf32> to vector<1x128xbf16>
      %c2_335 = arith.constant 2 : index
      %c0_336 = arith.constant 0 : index
      %c0_337 = arith.constant 0 : index
      %367 = vector.load %arg12[%c2_335, %c0_336, %c0_337] : memref<3x128x128xbf16, #tpu.memory_space<vmem>>, vector<1x128x128xbf16>
      %368 = vector.shape_cast %367 : vector<1x128x128xbf16> to vector<128x128xbf16>
      %cst_338 = arith.constant dense<0.000000e+00> : vector<1x128xf32>
      %369 = tpu.matmul %366, %368, %cst_338 {dimension_numbers = #tpu.dot_dimension_numbers<[1], [0], [0], [1], [0, 0, 1, 1], [], []>} : vector<1x128xbf16>, vector<128x128xbf16>, vector<1x128xf32> -> vector<1x128xf32>
      %370 = arith.addf %364, %369 : vector<1x128xf32>
      %c0_339 = arith.constant 0 : index
      %c0_340 = arith.constant 0 : index
      %371 = vector.load %arg13[%c0_339, %c0_340] : memref<1x128xf32, #tpu.memory_space<vmem>>, vector<1x128xf32>
      %372 = arith.addf %370, %371 : vector<1x128xf32>
      %cst_341 = arith.constant 0.000000e+00 : f32
      %373 = vector.broadcast %cst_341 : f32 to vector<1x128xf32>
      %374 = arith.maximumf %372, %373 : vector<1x128xf32>
      %375 = arith.index_cast %221 : i32 to index
      %c0_342 = arith.constant 0 : index
      %376 = vector.load %arg23[%375, %c0_342] : memref<16x128xf32, #tpu.memory_space<vmem>>, vector<1x128xf32>
      tpu.vector_store %arg23[%375, %c0_342], %374 {strides = array<i32>} : memref<16x128xf32, #tpu.memory_space<vmem>>, vector<1x128xf32>,
    }
    %c8_i32_0 = arith.constant 8 : i32
    %c0 = arith.constant 0 : index
    %c0_1 = arith.constant 0 : index
    %1 = vector.load %arg23[%c0, %c0_1] : memref<16x128xf32, #tpu.memory_space<vmem>>, vector<16x128xf32>
    %2 = vector.extract_strided_slice %1 {offsets = [0, 0], sizes = [16, 32], strides = [1, 1]} : vector<16x128xf32> to vector<16x32xf32>
    %3 = arith.truncf %2 : vector<16x32xf32> to vector<16x32xbf16>
    %c0_2 = arith.constant 0 : index
    %c0_3 = arith.constant 0 : index
    %4 = vector.load %arg14[%c0_2, %c0_3] : memref<32x1024xbf16, #tpu.memory_space<vmem>>, vector<32x1024xbf16>
    %cst = arith.constant dense<0.000000e+00> : vector<16x1024xf32>
    %5 = tpu.matmul %3, %4, %cst {dimension_numbers = #tpu.dot_dimension_numbers<[1], [0], [0], [1], [0, 0, 1, 1], [], []>} : vector<16x32xbf16>, vector<32x1024xbf16>, vector<16x1024xf32> -> vector<16x1024xf32>
    %c0_4 = arith.constant 0 : index
    %c0_5 = arith.constant 0 : index
    %6 = vector.load %arg15[%c0_4, %c0_5] : memref<1x1024xf32, #tpu.memory_space<vmem>>, vector<1x1024xf32>
    %7 = vector.broadcast %6 : vector<1x1024xf32> to vector<16x1024xf32>
    %8 = arith.addf %5, %7 : vector<16x1024xf32>
    %cst_6 = arith.constant 0.000000e+00 : f32
    %9 = vector.broadcast %cst_6 : f32 to vector<16x1024xf32>
    %10 = arith.maximumf %8, %9 : vector<16x1024xf32>
    %11 = arith.truncf %10 : vector<16x1024xf32> to vector<16x1024xbf16>
    %c0_7 = arith.constant 0 : index
    %c0_8 = arith.constant 0 : index
    %12 = vector.load %arg16[%c0_7, %c0_8] : memref<1024x32xbf16, #tpu.memory_space<vmem>>, vector<1024x32xbf16>
    %cst_9 = arith.constant dense<0.000000e+00> : vector<16x32xf32>
    %13 = tpu.matmul %11, %12, %cst_9 {dimension_numbers = #tpu.dot_dimension_numbers<[1], [0], [0], [1], [0, 0, 1, 1], [], []>} : vector<16x1024xbf16>, vector<1024x32xbf16>, vector<16x32xf32> -> vector<16x32xf32>
    %c0_10 = arith.constant 0 : index
    %c0_11 = arith.constant 0 : index
    %14 = vector.load %arg17[%c0_10, %c0_11] : memref<1x32xf32, #tpu.memory_space<vmem>>, vector<1x32xf32>
    %15 = vector.broadcast %14 : vector<1x32xf32> to vector<16x32xf32>
    %16 = arith.addf %13, %15 : vector<16x32xf32>
    %17 = vector.extract_strided_slice %1 {offsets = [0, 32], sizes = [16, 32], strides = [1, 1]} : vector<16x128xf32> to vector<16x32xf32>
    %18 = arith.truncf %17 : vector<16x32xf32> to vector<16x32xbf16>
    %c0_12 = arith.constant 0 : index
    %c0_13 = arith.constant 0 : index
    %19 = vector.load %arg14[%c0_12, %c0_13] : memref<32x1024xbf16, #tpu.memory_space<vmem>>, vector<32x1024xbf16>
    %cst_14 = arith.constant dense<0.000000e+00> : vector<16x1024xf32>
    %20 = tpu.matmul %18, %19, %cst_14 {dimension_numbers = #tpu.dot_dimension_numbers<[1], [0], [0], [1], [0, 0, 1, 1], [], []>} : vector<16x32xbf16>, vector<32x1024xbf16>, vector<16x1024xf32> -> vector<16x1024xf32>
    %c0_15 = arith.constant 0 : index
    %c0_16 = arith.constant 0 : index
    %21 = vector.load %arg15[%c0_15, %c0_16] : memref<1x1024xf32, #tpu.memory_space<vmem>>, vector<1x1024xf32>
    %22 = vector.broadcast %21 : vector<1x1024xf32> to vector<16x1024xf32>
    %23 = arith.addf %20, %22 : vector<16x1024xf32>
    %cst_17 = arith.constant 0.000000e+00 : f32
    %24 = vector.broadcast %cst_17 : f32 to vector<16x1024xf32>
    %25 = arith.maximumf %23, %24 : vector<16x1024xf32>
    %26 = arith.truncf %25 : vector<16x1024xf32> to vector<16x1024xbf16>
    %c0_18 = arith.constant 0 : index
    %c0_19 = arith.constant 0 : index
    %27 = vector.load %arg16[%c0_18, %c0_19] : memref<1024x32xbf16, #tpu.memory_space<vmem>>, vector<1024x32xbf16>
    %cst_20 = arith.constant dense<0.000000e+00> : vector<16x32xf32>
    %28 = tpu.matmul %26, %27, %cst_20 {dimension_numbers = #tpu.dot_dimension_numbers<[1], [0], [0], [1], [0, 0, 1, 1], [], []>} : vector<16x1024xbf16>, vector<1024x32xbf16>, vector<16x32xf32> -> vector<16x32xf32>
    %c0_21 = arith.constant 0 : index
    %c0_22 = arith.constant 0 : index
    %29 = vector.load %arg17[%c0_21, %c0_22] : memref<1x32xf32, #tpu.memory_space<vmem>>, vector<1x32xf32>
    %30 = vector.broadcast %29 : vector<1x32xf32> to vector<16x32xf32>
    %31 = arith.addf %28, %30 : vector<16x32xf32>
    %32 = vector.extract_strided_slice %1 {offsets = [0, 64], sizes = [16, 32], strides = [1, 1]} : vector<16x128xf32> to vector<16x32xf32>
    %33 = arith.truncf %32 : vector<16x32xf32> to vector<16x32xbf16>
    %c0_23 = arith.constant 0 : index
    %c0_24 = arith.constant 0 : index
    %34 = vector.load %arg14[%c0_23, %c0_24] : memref<32x1024xbf16, #tpu.memory_space<vmem>>, vector<32x1024xbf16>
    %cst_25 = arith.constant dense<0.000000e+00> : vector<16x1024xf32>
    %35 = tpu.matmul %33, %34, %cst_25 {dimension_numbers = #tpu.dot_dimension_numbers<[1], [0], [0], [1], [0, 0, 1, 1], [], []>} : vector<16x32xbf16>, vector<32x1024xbf16>, vector<16x1024xf32> -> vector<16x1024xf32>
    %c0_26 = arith.constant 0 : index
    %c0_27 = arith.constant 0 : index
    %36 = vector.load %arg15[%c0_26, %c0_27] : memref<1x1024xf32, #tpu.memory_space<vmem>>, vector<1x1024xf32>
    %37 = vector.broadcast %36 : vector<1x1024xf32> to vector<16x1024xf32>
    %38 = arith.addf %35, %37 : vector<16x1024xf32>
    %cst_28 = arith.constant 0.000000e+00 : f32
    %39 = vector.broadcast %cst_28 : f32 to vector<16x1024xf32>
    %40 = arith.maximumf %38, %39 : vector<16x1024xf32>
    %41 = arith.truncf %40 : vector<16x1024xf32> to vector<16x1024xbf16>
    %c0_29 = arith.constant 0 : index
    %c0_30 = arith.constant 0 : index
    %42 = vector.load %arg16[%c0_29, %c0_30] : memref<1024x32xbf16, #tpu.memory_space<vmem>>, vector<1024x32xbf16>
    %cst_31 = arith.constant dense<0.000000e+00> : vector<16x32xf32>
    %43 = tpu.matmul %41, %42, %cst_31 {dimension_numbers = #tpu.dot_dimension_numbers<[1], [0], [0], [1], [0, 0, 1, 1], [], []>} : vector<16x1024xbf16>, vector<1024x32xbf16>, vector<16x32xf32> -> vector<16x32xf32>
    %c0_32 = arith.constant 0 : index
    %c0_33 = arith.constant 0 : index
    %44 = vector.load %arg17[%c0_32, %c0_33] : memref<1x32xf32, #tpu.memory_space<vmem>>, vector<1x32xf32>
    %45 = vector.broadcast %44 : vector<1x32xf32> to vector<16x32xf32>
    %46 = arith.addf %43, %45 : vector<16x32xf32>
    %47 = vector.extract_strided_slice %1 {offsets = [0, 96], sizes = [16, 32], strides = [1, 1]} : vector<16x128xf32> to vector<16x32xf32>
    %48 = arith.truncf %47 : vector<16x32xf32> to vector<16x32xbf16>
    %c0_34 = arith.constant 0 : index
    %c0_35 = arith.constant 0 : index
    %49 = vector.load %arg14[%c0_34, %c0_35] : memref<32x1024xbf16, #tpu.memory_space<vmem>>, vector<32x1024xbf16>
    %cst_36 = arith.constant dense<0.000000e+00> : vector<16x1024xf32>
    %50 = tpu.matmul %48, %49, %cst_36 {dimension_numbers = #tpu.dot_dimension_numbers<[1], [0], [0], [1], [0, 0, 1, 1], [], []>} : vector<16x32xbf16>, vector<32x1024xbf16>, vector<16x1024xf32> -> vector<16x1024xf32>
    %c0_37 = arith.constant 0 : index
    %c0_38 = arith.constant 0 : index
    %51 = vector.load %arg15[%c0_37, %c0_38] : memref<1x1024xf32, #tpu.memory_space<vmem>>, vector<1x1024xf32>
    %52 = vector.broadcast %51 : vector<1x1024xf32> to vector<16x1024xf32>
    %53 = arith.addf %50, %52 : vector<16x1024xf32>
    %cst_39 = arith.constant 0.000000e+00 : f32
    %54 = vector.broadcast %cst_39 : f32 to vector<16x1024xf32>
    %55 = arith.maximumf %53, %54 : vector<16x1024xf32>
    %56 = arith.truncf %55 : vector<16x1024xf32> to vector<16x1024xbf16>
    %c0_40 = arith.constant 0 : index
    %c0_41 = arith.constant 0 : index
    %57 = vector.load %arg16[%c0_40, %c0_41] : memref<1024x32xbf16, #tpu.memory_space<vmem>>, vector<1024x32xbf16>
    %cst_42 = arith.constant dense<0.000000e+00> : vector<16x32xf32>
    %58 = tpu.matmul %56, %57, %cst_42 {dimension_numbers = #tpu.dot_dimension_numbers<[1], [0], [0], [1], [0, 0, 1, 1], [], []>} : vector<16x1024xbf16>, vector<1024x32xbf16>, vector<16x32xf32> -> vector<16x32xf32>
    %c0_43 = arith.constant 0 : index
    %c0_44 = arith.constant 0 : index
    %59 = vector.load %arg17[%c0_43, %c0_44] : memref<1x32xf32, #tpu.memory_space<vmem>>, vector<1x32xf32>
    %60 = vector.broadcast %59 : vector<1x32xf32> to vector<16x32xf32>
    %61 = arith.addf %58, %60 : vector<16x32xf32>
    %62 = tpu.concatenate %16, %31, %46, %61 in 1 : vector<16x32xf32>, vector<16x32xf32>, vector<16x32xf32>, vector<16x32xf32> -> vector<16x128xf32>
    %c0_45 = arith.constant 0 : index
    %c0_46 = arith.constant 0 : index
    %63 = vector.load %arg18[%c0_45, %c0_46] : memref<16x128xf32, #tpu.memory_space<vmem>>, vector<16x128xf32>
    tpu.vector_store %arg18[%c0_45, %c0_46], %62 {strides = array<i32>} : memref<16x128xf32, #tpu.memory_space<vmem>>, vector<16x128xf32>,
    return
  }
  func.func @transform_0(%arg0: i32) -> (i32, i32, i32) {
    %c0_i32 = arith.constant 0 : i32
    %c0_i32_0 = arith.constant 0 : i32
    %c0_i32_1 = arith.constant 0 : i32
    return %arg0, %c0_i32, %c0_i32_0 : i32, i32, i32
  }
  func.func @transform_1(%arg0: i32) -> (i32, i32) {
    %c0_i32 = arith.constant 0 : i32
    %c0_i32_0 = arith.constant 0 : i32
    %c0_i32_1 = arith.constant 0 : i32
    return %c0_i32, %c0_i32_0 : i32, i32
  }
  func.func @transform_2(%arg0: i32) -> (i32, i32) {
    %c0_i32 = arith.constant 0 : i32
    %c0_i32_0 = arith.constant 0 : i32
    %c0_i32_1 = arith.constant 0 : i32
    return %c0_i32, %c0_i32_0 : i32, i32
  }
  func.func @transform_3(%arg0: i32) -> (i32, i32, i32) {
    %c0_i32 = arith.constant 0 : i32
    %c0_i32_0 = arith.constant 0 : i32
    %c0_i32_1 = arith.constant 0 : i32
    %c0_i32_2 = arith.constant 0 : i32
    return %c0_i32, %c0_i32_0, %c0_i32_1 : i32, i32, i32
  }
  func.func @transform_4(%arg0: i32) -> (i32, i32) {
    %c0_i32 = arith.constant 0 : i32
    %c0_i32_0 = arith.constant 0 : i32
    %c0_i32_1 = arith.constant 0 : i32
    return %c0_i32, %c0_i32_0 : i32, i32
  }
  func.func @transform_5(%arg0: i32) -> (i32, i32, i32) {
    %c0_i32 = arith.constant 0 : i32
    %c0_i32_0 = arith.constant 0 : i32
    %c0_i32_1 = arith.constant 0 : i32
    %c0_i32_2 = arith.constant 0 : i32
    return %c0_i32, %c0_i32_0, %c0_i32_1 : i32, i32, i32
  }
  func.func @transform_6(%arg0: i32) -> (i32, i32) {
    %c0_i32 = arith.constant 0 : i32
    %c0_i32_0 = arith.constant 0 : i32
    %c0_i32_1 = arith.constant 0 : i32
    return %c0_i32, %c0_i32_0 : i32, i32
  }
  func.func @transform_7(%arg0: i32) -> (i32, i32, i32) {
    %c0_i32 = arith.constant 0 : i32
    %c0_i32_0 = arith.constant 0 : i32
    %c0_i32_1 = arith.constant 0 : i32
    %c0_i32_2 = arith.constant 0 : i32
    return %c0_i32, %c0_i32_0, %c0_i32_1 : i32, i32, i32
  }
  func.func @transform_8(%arg0: i32) -> (i32, i32) {
    %c0_i32 = arith.constant 0 : i32
    %c0_i32_0 = arith.constant 0 : i32
    %c0_i32_1 = arith.constant 0 : i32
    return %c0_i32, %c0_i32_0 : i32, i32
  }
  func.func @transform_9(%arg0: i32) -> (i32, i32, i32) {
    %c0_i32 = arith.constant 0 : i32
    %c0_i32_0 = arith.constant 0 : i32
    %c0_i32_1 = arith.constant 0 : i32
    %c0_i32_2 = arith.constant 0 : i32
    return %c0_i32, %c0_i32_0, %c0_i32_1 : i32, i32, i32
  }
  func.func @transform_10(%arg0: i32) -> (i32, i32) {
    %c0_i32 = arith.constant 0 : i32
    %c0_i32_0 = arith.constant 0 : i32
    %c0_i32_1 = arith.constant 0 : i32
    return %c0_i32, %c0_i32_0 : i32, i32
  }
  func.func @transform_11(%arg0: i32) -> (i32, i32, i32) {
    %c0_i32 = arith.constant 0 : i32
    %c0_i32_0 = arith.constant 0 : i32
    %c0_i32_1 = arith.constant 0 : i32
    %c0_i32_2 = arith.constant 0 : i32
    return %c0_i32, %c0_i32_0, %c0_i32_1 : i32, i32, i32
  }
  func.func @transform_12(%arg0: i32) -> (i32, i32) {
    %c0_i32 = arith.constant 0 : i32
    %c0_i32_0 = arith.constant 0 : i32
    %c0_i32_1 = arith.constant 0 : i32
    return %c0_i32, %c0_i32_0 : i32, i32
  }
  func.func @transform_13(%arg0: i32) -> (i32, i32) {
    %c0_i32 = arith.constant 0 : i32
    %c0_i32_0 = arith.constant 0 : i32
    %c0_i32_1 = arith.constant 0 : i32
    return %c0_i32, %c0_i32_0 : i32, i32
  }
  func.func @transform_14(%arg0: i32) -> (i32, i32) {
    %c0_i32 = arith.constant 0 : i32
    %c0_i32_0 = arith.constant 0 : i32
    %c0_i32_1 = arith.constant 0 : i32
    return %c0_i32, %c0_i32_0 : i32, i32
  }
  func.func @transform_15(%arg0: i32) -> (i32, i32) {
    %c0_i32 = arith.constant 0 : i32
    %c0_i32_0 = arith.constant 0 : i32
    %c0_i32_1 = arith.constant 0 : i32
    return %c0_i32, %c0_i32_0 : i32, i32
  }
  func.func @transform_16(%arg0: i32) -> (i32, i32) {
    %c0_i32 = arith.constant 0 : i32
    %c0_i32_0 = arith.constant 0 : i32
    %c0_i32_1 = arith.constant 0 : i32
    return %c0_i32, %c0_i32_0 : i32, i32
  }
  func.func @transform_17(%arg0: i32) -> (i32, i32) {
    %c0_i32 = arith.constant 0 : i32
    %c0_i32_0 = arith.constant 0 : i32
    return %arg0, %c0_i32 : i32, i32
  }
}

</mosaic_0001>

<bundles_post_ra>
// kernel: dqn_forward.1
= control target key start
LH: loop header
LB: loop body
LE: loop exit
PB: predicated region body
PF: predicated region fallthrough
CT: control target
= control target key end

     0   :  { %s9777_s24 = smov 0   ;;  %s12003_s0 = inlined_call_operand.vmem [shape: f32[32,126,48], index: 0, kind: input, shape index: {}]   ;;  %s12004_s1 = inlined_call_operand.vmem [shape: bf16[48,128], index: 1, kind: input, shape index: {}]   ;;  %s12005_s2 = inlined_call_operand.vmem [shape: f32[1,128], index: 2, kind: input, shape index: {}]   ;;  %s12006_s3 = inlined_call_operand.vmem [shape: bf16[3,128,128], index: 3, kind: input, shape index: {}]   ;;  %s12007_s4 = inlined_call_operand.vmem [shape: f32[1,128], index: 4, kind: input, shape index: {}]   ;;  %s12008_s5 = inlined_call_operand.vmem [shape: bf16[3,128,128], index: 5, kind: input, shape index: {}]   ;;  %s12009_s6 = inlined_call_operand.vmem [shape: f32[1,128], index: 6, kind: input, shape index: {}]   ;;  %s12010_s7 = inlined_call_operand.vmem [shape: bf16[3,128,128], index: 7, kind: input, shape index: {}]   ;;  %s12011_s8 = inlined_call_operand.vmem [shape: f32[1,128], index: 8, kind: input, shape index: {}]   ;;  %s12012_s9 = inlined_call_operand.vmem [shape: bf16[3,128,128], index: 9, kind: input, shape index: {}]   ;;  %s12013_s10 = inlined_call_operand.vmem [shape: f32[1,128], index: 10, kind: input, shape index: {}]   ;;  %s12014_s11 = inlined_call_operand.vmem [shape: bf16[3,128,128], index: 11, kind: input, shape index: {}]   ;;  %s12015_s12 = inlined_call_operand.vmem [shape: f32[1,128], index: 12, kind: input, shape index: {}]   ;;  %s12016_s13 = inlined_call_operand.vmem [shape: bf16[32,1024], index: 13, kind: input, shape index: {}]   ;;  %s12017_s14 = inlined_call_operand.vmem [shape: f32[1,1024], index: 14, kind: input, shape index: {}]   ;;  %s12018_s15 = inlined_call_operand.vmem [shape: bf16[1024,32], index: 15, kind: input, shape index: {}]   ;;  %s12019_s16 = inlined_call_operand.vmem [shape: f32[1,32], index: 16, kind: input, shape index: {}]   ;;  %s12020_s17 = inlined_call_operand.vmem [shape: f32[32,128], index: 17, kind: output, shape index: {}]  }
   0x1   :  { %12124 = sst [smem:[#allocation59_spill]] %s12003_s0 }
   0x2   :  { %12125 = sst [smem:[#allocation60_spill]] %s12004_s1 }
   0x3 LB: > { %s7158_s25 = sadd.s32 4294967295, %s9675_s24   ;;  %p7162_p0 = scmp.ge.s32.totalorder %s9675_s24, 1  ;;  %s9675_s24 = sphi %s9777_s24, %s27_s24  }
   0x4   : > { %p489_p1 = scmp.lt.s32.totalorder %s9675_s24, 3 }
   0x6   : > { %p490_p2 = pnand %p7162_p0, %p489_p1 }
   0x8   : > { %493 = sbr.rel (%p490_p2) target bundleno = 4523 (0x11ab), region = 88 }
   0xf   : > { %s7163_s26 = sshll.u32 %s7158_s25, 4  ;;  %s7166_s27 = sshll.u32 %s7158_s25, 1 }
  0x10   : > { %p543_p3 = scmp.lt.s32.totalorder %s7163_s26, 31  ;;  %p550_p4 = scmp.lt.s32.totalorder %s7166_s27, 3 }
  0x11   : > { %s12126_s30 = sld [smem:[#allocation59_spill]]  ;;  %s9795_s22 = smov 0  }
  0x12   : > { %s12282_s26 = smov (!%p543_p3, %s7163_s26), 31  ;;  %s12284_s27 = smov (!%p550_p4, %s7166_s27), 3 }
  0x13   : > { %s7881_s28 = sshll.u32 %s12282_s26, 7  ;;  %s7167_s19 = sshll.u32 %s12284_s27, 3 }
  0x14   : > { %s9793_s21 = scalar_lea.vmem %s12020_s17, %s7167_s19 }
  0x17   : > { %s9788_s18 = scalar_lea.vmem %s12126_s30, %s7881_s28 }
  0x18 LB: >> { %s12127_s26 = sld [smem:[#allocation60_spill]]  ;;  %s7882_s29 = sshll.u32 %s9679_s22, 8  ;;  %vm620_vm0 = vcmask 392192   ;;  %v9293_v27 = vld [vmem:[%s12006_s3 + $0x40] sm:$0xff]   ;;  %v9294_v28 = vld [vmem:[%s12006_s3 + $0x48] sm:$0xff]   ;;  %v9295_v29 = vld [vmem:[%s12006_s3 + $0x50] sm:$0xff]   ;;  %s9679_s22 = sphi %s9795_s22, %s561_s22  }
  0x19   : >> { %s9808_s0 = scalar_lea.vmem %s9788_s18, %s7882_s29  ;;  %v9296_v30 = vld [vmem:[%s12006_s3 + $0x58] sm:$0xff]   ;;  %v9297_v31 = vld [vmem:[%s12006_s3 + $0x60] sm:$0xff]   ;;  %v9298_v32 = vld [vmem:[%s12006_s3 + $0x68] sm:$0xff]   ;;  %vm805_vm1 = vcmask 1046528   ;;  %vm9682_vm2 = vmmov 0   ;;  %s7168_s29 = sshll.u32 %s9679_s22, 1 }
  0x1a   : >> { %v565_v3 = vld [vmem:[%s9808_s0] sm:$0xff]  ;;  %v566_v4 = vld [vmem:[%s9808_s0 + $0x8] sm:$0xff]  ;;  %v567_v6 = vld [vmem:[%s9808_s0 + $0x10] sm:$0xff]  ;;  %s10473_s30 = scalar_lea.vmem [#allocation6], %s7168_s29  ;;  %s561_s22 = sadd.s32 1, %s9679_s22  }
  0x1b   : >> { %v581_v5 = vpack.c.bf16 %v566_v4, %v565_v3  ;;  %v568_v7 = vld [vmem:[%s9808_s0 + $0x18] sm:$0xff]  ;;  %v569_v8 = vld [vmem:[%s9808_s0 + $0x20] sm:$0xff]  ;;  %v570_v9 = vld [vmem:[%s9808_s0 + $0x28] sm:$0xff]  ;;  %p558_p5 = scmp.ge.s32.totalorder %s561_s22, 8  }
  0x1c   : >> { %v582_v10 = vpack.c.bf16 %v568_v7, %v567_v6  ;;  %v583_v11 = vpack.c.bf16 %v570_v9, %v569_v8  ;;  %v571_v12 = vld [vmem:[%s9808_s0 + $0x30] sm:$0xff]  ;;  %v572_v13 = vld [vmem:[%s9808_s0 + $0x38] sm:$0xff]  ;;  %v573_v14 = vld [vmem:[%s9808_s0 + $0x40] sm:$0xff]  ;;  %s9684_s18 = smov (%p558_p5), 96   ;;  %vm5073_vm3 = vcmask (%p558_p5), 261120   ;;  %s9685_s28 = smov (%p558_p5), 64  }
  0x1d   : >> { %8558 = vmatprep.mubr.msk.bf16.mxu1 %vm620_vm0, %v581_v5  ;;  %v574_v15 = vld [vmem:[%s9808_s0 + $0x48] sm:$0xff]  ;;  %v584_v16 = vpack.c.bf16 %v572_v13, %v571_v12  ;;  %v575_v18 = vld [vmem:[%s9808_s0 + $0x50] sm:$0xff]  ;;  %v576_v19 = vld [vmem:[%s9808_s0 + $0x58] sm:$0xff]  ;;  %s9686_s19 = smov (%p558_p5), 32   ;;  %vm7078_vm4 = vcmask (%p558_p5), 523264   ;;  %vm7081_vm5 = vcmask (%p558_p5), 785408  }
  0x1e   : >> { %v9290_v0 = vld [vmem:[%s12127_s26] sm:$0xff]   ;;  %v9291_v1 = vld [vmem:[%s12127_s26 + $0x8] sm:$0xff]   ;;  %v9292_v2 = vld [vmem:[%s12127_s26 + $0x10] sm:$0xff]   ;;  %v585_v17 = vpack.c.bf16 %v574_v15, %v573_v14  ;;  %v586_v22 = vpack.c.bf16 %v576_v19, %v575_v18 }
  0x1f   : >> { %8552 = vmatprep.subr.bf16.mxu1 %v9290_v0  ;;  %v577_v20 = vld [vmem:[%s9808_s0 + $0x60] sm:$0xff]  ;;  %v578_v21 = vld [vmem:[%s9808_s0 + $0x68] sm:$0xff]  ;;  %v579_v24 = vld [vmem:[%s9808_s0 + $0x70] sm:$0xff] }
  0x20   : >> { %8553 = vmatpush3.bf16.msra.mxu1 %v9290_v0  ;;  %v587_v23 = vpack.c.bf16 %v578_v21, %v577_v20  ;;  %v580_v25 = vld [vmem:[%s9808_s0 + $0x78] sm:$0x3f]  ;;  %v9299_v33 = vld [vmem:[%s12006_s3 + $0x70] sm:$0xff]   ;;  %v9864_v35 = vld [vmem:[%s12006_s3] sm:$0xff]  }
  0x21   : >> { %8554 = vmatprep.subr.bf16.mxu1 %v9291_v1  ;;  %v588_v26 = vpack.c.bf16 %v580_v25, %v579_v24  ;;  %v9300_v34 = vld [vmem:[%s12006_s3 + $0x78] sm:$0xff]   ;;  %v9870_v36 = vld [vmem:[%s12005_s2] ss:$0 sm:$0xff] }
  0x24   : >> { %8555 = vmatpush3.bf16.msra.mxu1 %v9291_v1 }
  0x25   : >> { %8556 = vmatprep.subr.bf16.mxu1 %v9292_v2 }
  0x28   : >> { %8557 = vmatpush3.bf16.msra.mxu1 %v9292_v2 }
  0x29   : >> { %8574 = vmatprep.subr.bf16.mxu1 %v9293_v27 }
  0x2b   : >> { %8559 = vmatmul.mubr.msk.bf16.vlgmr.msra.gmra.mrb[0].mxu1 %vm620_vm0, %v582_v10 }
  0x2c   : >> { %8562 = vmatprep.mubr.msk.bf16.mxu1 %vm620_vm0, %v583_v11  ;;  %8575 = vmatpush3.bf16.msra.mxu1 %v9293_v27 }
  0x2d   : >> { %8576 = vmatprep.subr.bf16.mxu1 %v9294_v28 }
  0x30   : >> { %8577 = vmatpush3.bf16.msra.mxu1 %v9294_v28 }
  0x31   : >> { %8578 = vmatprep.subr.bf16.mxu1 %v9295_v29 }
  0x33   : >> { %8563 = vmatmul.mubr.msk.bf16.gmra.mrb[4].mxu1 %vm620_vm0, %v584_v16 }
  0x34   : >> { %8566 = vmatprep.mubr.msk.bf16.mxu1 %vm620_vm0, %v585_v17  ;;  %8579 = vmatpush3.bf16.msra.mxu1 %v9295_v29 }
  0x35   : >> { %8580 = vmatprep.subr.bf16.mxu1 %v9296_v30 }
  0x38   : >> { %8581 = vmatpush3.bf16.msra.mxu1 %v9296_v30 }
  0x39   : >> { %8582 = vmatprep.subr.bf16.mxu1 %v9297_v31 }
  0x3b   : >> { %8567 = vmatmul.mubr.msk.bf16.gmra.mrb[8].mxu1 %vm620_vm0, %v586_v22 }
  0x3c   : >> { %8570 = vmatprep.mubr.msk.bf16.mxu1 %vm620_vm0, %v587_v23  ;;  %8583 = vmatpush3.bf16.msra.mxu1 %v9297_v31 }
  0x3d   : >> { %8584 = vmatprep.subr.bf16.mxu1 %v9298_v32 }
  0x40   : >> { %8585 = vmatpush3.bf16.msra.mxu1 %v9298_v32 }
  0x41   : >> { %8586 = vmatprep.subr.bf16.mxu1 %v9299_v33 }
  0x43   : >> { %8571 = vmatmul.mubr.msk.bf16.gmra.mrb[12].mxu1 %vm620_vm0, %v588_v26 }
  0x44   : >> { %8587 = vmatpush3.bf16.msra.mxu1 %v9299_v33 }
  0x45   : >> { %8588 = vmatprep.subr.bf16.mxu1 %v9300_v34 }
  0x48   : >> { %8589 = vmatpush3.bf16.msra.mxu1 %v9300_v34 }
  0x49   : >> { %8598 = vmatprep.subr.bf16.mxu1 %v9864_v35 }
  0xfe   : >> { %v8560_v37 = vpop.f32.mrb[0].mxu1 }
  0xff   : >> { %v688_v38 = vadd.f32 %v8560_v37, %v9870_v36  ;;  %v679_v39 = vpop.f32.mrb[1].mxu1 }
 0x100   : >> { %v680_v40 = vadd.f32 %v9870_v36, %v679_v39  ;;  %v8561_v41 = vpop.f32.mrb[2].mxu1 }
 0x101   : >> { %744 = vst [vmem:[#allocation2 + $0x10] sm:$0xff] %v688_v38  ;;  %v691_v42 = vadd.f32 %v8561_v41, %v9870_v36  ;;  %v682_v43 = vpop.f32.mrb[3].mxu1 }
 0x102   : >> { %742 = vst [vmem:[#allocation2] sm:$0xff] %v680_v40  ;;  %v683_v44 = vadd.f32 %v9870_v36, %v682_v43 }
 0x103   : >> { %745 = vst [vmem:[#allocation2 + $0x18] sm:$0xff] %v691_v42 }
 0x104   : >> { %743 = vst [vmem:[#allocation2 + $0x8] sm:$0xff] %v683_v44 }
 0x106   : >> { %v8564_v45 = vpop.f32.mrb[4].mxu1 }
 0x107   : >> { %v704_v46 = vadd.f32 %v8564_v45, %v9870_v36  ;;  %v695_v47 = vpop.f32.mrb[5].mxu1 }
 0x108   : >> { %v696_v48 = vadd.f32 %v9870_v36, %v695_v47  ;;  %v8565_v49 = vpop.f32.mrb[6].mxu1 }
 0x109   : >> { %748 = vst [vmem:[#allocation2 + $0x30] sm:$0xff] %v704_v46  ;;  %v707_v50 = vadd.f32 %v8565_v49, %v9870_v36  ;;  %v698_v51 = vpop.f32.mrb[7].mxu1 }
 0x10a   : >> { %v760_v52 = vld [vmem:[#allocation2 + $0x10] ss:$2 sm:$0xff]  ;;  %746 = vst [vmem:[#allocation2 + $0x20] sm:$0xff] %v696_v48  ;;  %v699_v53 = vadd.f32 %v9870_v36, %v698_v51  ;;  %v776_v5 = vld [vmem:[#allocation2 + $0x11] ss:$2 sm:$0xff] }
 0x10b   : >> { %v807_v54 = vrot.slane %v760_v52, 1  ;;  %v758_v55 = vld [vmem:[#allocation2] ss:$2 sm:$0xff]  ;;  %v774_v56 = vld [vmem:[#allocation2 + $0x1] ss:$2 sm:$0xff]  ;;  %749 = vst [vmem:[#allocation2 + $0x38] sm:$0xff] %v707_v50  ;;  %v790_v13 = vmax.f32 %v760_v52, %v776_v5 }
 0x10c   : >> { %747 = vst [vmem:[#allocation2 + $0x28] sm:$0xff] %v699_v53  ;;  %v789_v57 = vmax.f32 %v758_v55, %v774_v56  ;;  %v806_v58 = vrot.slane %v758_v55, 1  ;;  %v9302_v5 = vld [vmem:[%s12006_s3 + $0x8] sm:$0xff]  }
 0x10e   : >> { %v8568_v59 = vpop.f32.mrb[8].mxu1  ;;  %v808_v60 = vsel %vm805_vm1, %v806_v58, %v807_v54 }
 0x10f   : >> { %v720_v61 = vadd.f32 %v8568_v59, %v9870_v36  ;;  %v711_v62 = vpop.f32.mrb[9].mxu1  ;;  %v9882_v63 = vmax.f32 %v789_v57, %v808_v60 }
 0x110   : >> { %v712_v0 = vadd.f32 %v9870_v36, %v711_v62  ;;  %v8569_v1 = vpop.f32.mrb[10].mxu1 }
 0x111   : >> { %752 = vst [vmem:[#allocation2 + $0x50] sm:$0xff] %v720_v61  ;;  %v723_v2 = vadd.f32 %v8569_v1, %v9870_v36  ;;  %v714_v3 = vpop.f32.mrb[11].mxu1  ;;  %v837_v4 = vmax.f32 %v9882_v63, 0.0  ;;  %v9307_v63 = vld [vmem:[%s12006_s3 + $0x30] sm:$0xff]  }
 0x112   : >> { %v764_v6 = vld [vmem:[#allocation2 + $0x30] ss:$2 sm:$0xff]  ;;  %750 = vst [vmem:[#allocation2 + $0x40] sm:$0xff] %v712_v0  ;;  %v715_v7 = vadd.f32 %v9870_v36, %v714_v3  ;;  %v780_v27 = vld [vmem:[#allocation2 + $0x31] ss:$2 sm:$0xff] }
 0x113   : >> { %v811_v8 = vrot.slane %v764_v6, 1  ;;  %v762_v9 = vld [vmem:[#allocation2 + $0x20] ss:$2 sm:$0xff]  ;;  %v778_v10 = vld [vmem:[#allocation2 + $0x21] ss:$2 sm:$0xff]  ;;  %753 = vst [vmem:[#allocation2 + $0x58] sm:$0xff] %v723_v2  ;;  %v792_v37 = vmax.f32 %v764_v6, %v780_v27 }
 0x114   : >> { %845 = vst [vmem:[#allocation3] sm:$0xff] %v837_v4  ;;  %v791_v11 = vmax.f32 %v762_v9, %v778_v10  ;;  %v809_v12 = vrot.slane %v762_v9, 1  ;;  %751 = vst [vmem:[#allocation2 + $0x48] sm:$0xff] %v715_v7  ;;  %v9303_v6 = vld [vmem:[%s12006_s3 + $0x10] sm:$0xff]   ;;  %v9313_v27 = vld [vmem:[%s12006_s3 + $0xa0] sm:$0xff]  }
 0x116   : >> { %v810_v14 = vsel %vm805_vm1, %v807_v54, %v809_v12  ;;  %v812_v15 = vsel %vm805_vm1, %v809_v12, %v811_v8  ;;  %v8572_v16 = vpop.f32.mrb[12].mxu1 }
 0x117   : >> { %v9892_v17 = vmax.f32 %v791_v11, %v812_v15  ;;  %v736_v18 = vadd.f32 %v8572_v16, %v9870_v36  ;;  %v727_v19 = vpop.f32.mrb[13].mxu1  ;;  %v9895_v20 = vmax.f32 %v790_v13, %v810_v14  ;;  %v9304_v13 = vld [vmem:[%s12006_s3 + $0x18] sm:$0xff]   ;;  %v9305_v14 = vld [vmem:[%s12006_s3 + $0x20] sm:$0xff]   ;;  %v9306_v15 = vld [vmem:[%s12006_s3 + $0x28] sm:$0xff]  }
 0x118   : >> { %v728_v21 = vadd.f32 %v9870_v36, %v727_v19  ;;  %v8573_v22 = vpop.f32.mrb[14].mxu1  ;;  %v9309_v16 = vld [vmem:[%s12006_s3 + $0x80] sm:$0xff]   ;;  %v9310_v19 = vld [vmem:[%s12006_s3 + $0x88] sm:$0xff]  }
 0x119   : >> { %v839_v23 = vmax.f32 %v9892_v17, 0.0  ;;  %756 = vst [vmem:[#allocation2 + $0x70] sm:$0xff] %v736_v18  ;;  %v739_v24 = vadd.f32 %v8573_v22, %v9870_v36  ;;  %v730_v25 = vpop.f32.mrb[15].mxu1  ;;  %v838_v26 = vmax.f32 %v9895_v20, 0.0 }
 0x11a   : >> { %v768_v28 = vld [vmem:[#allocation2 + $0x50] ss:$2 sm:$0xff]  ;;  %754 = vst [vmem:[#allocation2 + $0x60] sm:$0xff] %v728_v21  ;;  %v731_v29 = vadd.f32 %v9870_v36, %v730_v25  ;;  %v784_v41 = vld [vmem:[#allocation2 + $0x51] ss:$2 sm:$0xff] }
 0x11b   : >> { %847 = vst [vmem:[#allocation3 + $0x10] sm:$0xff] %v839_v23  ;;  %v815_v30 = vrot.slane %v768_v28, 1  ;;  %v766_v31 = vld [vmem:[#allocation2 + $0x40] ss:$2 sm:$0xff]  ;;  %v782_v32 = vld [vmem:[#allocation2 + $0x41] ss:$2 sm:$0xff]  ;;  %v794_v54 = vmax.f32 %v768_v28, %v784_v41 }
 0x11c   : >> { %757 = vst [vmem:[#allocation2 + $0x78] sm:$0x3f] %v739_v24  ;;  %846 = vst [vmem:[#allocation3 + $0x8] sm:$0xff] %v838_v26  ;;  %v793_v33 = vmax.f32 %v766_v31, %v782_v32  ;;  %v813_v34 = vrot.slane %v766_v31, 1  ;;  %v9311_v21 = vld [vmem:[%s12006_s3 + $0x90] sm:$0xff]   ;;  %v9312_v25 = vld [vmem:[%s12006_s3 + $0x98] sm:$0xff]  }
 0x11d   : >> { %755 = vst [vmem:[#allocation2 + $0x68] sm:$0xff] %v731_v29  ;;  %v9314_v28 = vld [vmem:[%s12006_s3 + $0xa8] sm:$0xff]   ;;  %v9315_v29 = vld [vmem:[%s12006_s3 + $0xb0] sm:$0xff]   ;;  %v9317_v41 = vld [vmem:[%s12008_s5 + $0x40] sm:$0xff]  }
 0x11e   : >> { %v814_v38 = vsel %vm805_vm1, %v811_v8, %v813_v34  ;;  %v816_v39 = vsel %vm805_vm1, %v813_v34, %v815_v30  ;;  %8646 = vmatprep.subr.bf16.mxu0 %v9317_v41 }
 0x11f   : >> { %v9908_v40 = vmax.f32 %v792_v37, %v814_v38  ;;  %v9910_v36 = vmax.f32 %v793_v33, %v816_v39  ;;  %8647 = vmatpush3.bf16.msra.mxu0 %v9317_v41  ;;  %v9328_v41 = vld [vmem:[%s12008_s5 + $0x18] sm:$0xff]  }
 0x121   : >> { %v840_v42 = vmax.f32 %v9908_v40, 0.0  ;;  %v841_v43 = vmax.f32 %v9910_v36, 0.0 }
 0x123   : >> { %v772_v44 = vld [vmem:[#allocation2 + $0x70] ss:$2 sm:$0x7f]  ;;  %v788_v45 = vld [vmem:[#allocation2 + $0x71] ss:$2 sm:$0x3f]  ;;  %v862_v18 = vpack.c.bf16 %v840_v42, %v839_v23 }
 0x124   : >> { %848 = vst [vmem:[#allocation3 + $0x18] sm:$0xff] %v840_v42  ;;  %849 = vst [vmem:[#allocation3 + $0x20] sm:$0xff] %v841_v43  ;;  %v796_v46 = vmax.f32 %v772_v44, %v788_v45  ;;  %v819_v47 = vrot.slane %v772_v44, 1  ;;  %v770_v48 = vld [vmem:[#allocation2 + $0x60] ss:$2 sm:$0xff]  ;;  %v9320_v44 = vld [vmem:[%s12008_s5 + $0x58] sm:$0xff]  }
 0x125   : >> { %v786_v49 = vld [vmem:[#allocation2 + $0x61] ss:$2 sm:$0xff]  ;;  %v817_v52 = vrot.slane %v770_v48, 1 }
 0x126   : >> { %v881_v50 = vld [vmem:[#allocation3 + $0x1] sm:$0xff]  ;;  %v795_v51 = vmax.f32 %v770_v48, %v786_v49  ;;  %v882_v53 = vld [vmem:[#allocation3 + $0x9] sm:$0xff]  ;;  %v836_v55 = vmax.f32 %v796_v46, %v819_v47  ;;  %v9324_v48 = vld [vmem:[%s12008_s5 + $0x78] sm:$0xff]  }
 0x127   : >> { %v889_v56 = vpack.c.bf16 %v882_v53, %v881_v50  ;;  %v818_v57 = vsel %vm805_vm1, %v815_v30, %v817_v52  ;;  %v820_v58 = vsel %vm805_vm1, %v817_v52, %v819_v47  ;;  %v1136_v22 = vld [vmem:[#allocation3 + $0x2] sm:$0xff]  ;;  %v1137_v24 = vld [vmem:[#allocation3 + $0xa] sm:$0xff]  ;;  %v9316_v30 = vld [vmem:[%s12006_s3 + $0xb8] sm:$0xff]  }
 0x128   : >> { %v844_v59 = vmax.f32 %v836_v55, 0.0  ;;  %v835_v60 = vmax.f32 %v795_v51, %v820_v58  ;;  %v834_v61 = vmax.f32 %v794_v54, %v818_v57  ;;  %v9318_v42 = vld [vmem:[%s12008_s5 + $0x48] sm:$0xff]   ;;  %v9321_v45 = vld [vmem:[%s12008_s5 + $0x60] sm:$0xff]   ;;  %v9323_v47 = vld [vmem:[%s12008_s5 + $0x70] sm:$0xff]   ;;  %v9681_v51 = vmov 0.0  }
 0x129   : >> { %8590 = vmatprep.mubr.bf16.mxu1 %v889_v56  ;;  %8648 = vmatprep.subr.bf16.mxu0 %v9318_v42  ;;  %v9322_v46 = vld [vmem:[%s12008_s5 + $0x68] sm:$0xff]   ;;  %v10003_v49 = vld [vmem:[%s12008_s5] sm:$0xff]  }
 0x12a   : >> { %852 = vst [vmem:[#allocation3 + $0x38] sm:$0x3f] %v844_v59  ;;  %v843_v62 = vmax.f32 %v835_v60, 0.0  ;;  %v842_v0 = vmax.f32 %v834_v61, 0.0  ;;  %8649 = vmatpush3.bf16.msra.mxu0 %v9318_v42  ;;  %v9341_v50 = vld [vmem:[%s12010_s7 + $0x40] sm:$0xff]  }
 0x12b   : >> { %v883_v1 = vld [vmem:[#allocation3 + $0x11] sm:$0xff]  ;;  %v884_v2 = vld [vmem:[#allocation3 + $0x19] sm:$0xff] }
 0x12c   : >> { %851 = vst [vmem:[#allocation3 + $0x30] sm:$0xff] %v843_v62  ;;  %v890_v3 = vpack.c.bf16 %v884_v2, %v883_v1  ;;  %850 = vst [vmem:[#allocation3 + $0x28] sm:$0xff] %v842_v0  ;;  %v863_v20 = vpack.c.bf16 %v842_v0, %v841_v43  ;;  %v1138_v31 = vld [vmem:[#allocation3 + $0x12] sm:$0xff]  ;;  %v1139_v32 = vld [vmem:[#allocation3 + $0x1a] sm:$0xff] }
 0x12d   : >> { %v1145_v37 = vpack.c.bf16 %v1139_v32, %v1138_v31  ;;  %v9319_v43 = vld [vmem:[%s12008_s5 + $0x50] sm:$0xff]   ;;  %v7238_v52 = vld [vmem:[%s12007_s4] ss:$0 sm:$0xff] }
 0x12e   : >> { %8591 = vmatmul.mubr.bf16.vlgmr.msra.gmra.mrb[16].mxu1 %v890_v3  ;;  %8650 = vmatprep.subr.bf16.mxu0 %v9319_v43  ;;  %v9329_v42 = vld [vmem:[%s12008_s5 + $0x20] sm:$0xff]  }
 0x12f   : >> { %8599 = vmatpush3.bf16.msra.mxu1 %v9864_v35  ;;  %v861_v35 = vpack.c.bf16 %v838_v26, %v837_v4  ;;  %v9308_v4 = vld [vmem:[%s12006_s3 + $0x38] sm:$0xff]   ;;  %v1144_v26 = vpack.c.bf16 %v1137_v24, %v1136_v22  ;;  %8651 = vmatpush3.bf16.msra.mxu0 %v9319_v43  ;;  %v9330_v43 = vld [vmem:[%s12008_s5 + $0x28] sm:$0xff]  }
 0x130   : >> { %8600 = vmatprep.subr.bf16.mxu1 %v9302_v5  ;;  %8652 = vmatprep.subr.bf16.mxu0 %v9320_v44 }
 0x131   : >> { %v888_v7 = vld [vmem:[#allocation3 + $0x39] sm:$0xf] }
 0x132   : >> { %v860_v17 = vld [vmem:[#allocation3 + $0x38] sm:$0xf] }
 0x133   : >> { %8601 = vmatpush3.bf16.msra.mxu1 %v9302_v5  ;;  %v885_v8 = vld [vmem:[#allocation3 + $0x21] sm:$0xff]  ;;  %v886_v9 = vld [vmem:[#allocation3 + $0x29] sm:$0xff]  ;;  %v887_v10 = vld [vmem:[#allocation3 + $0x31] sm:$0xff]  ;;  %v864_v23 = vpack.c.bf16 %v860_v17, %v843_v62  ;;  %8653 = vmatpush3.bf16.msra.mxu0 %v9320_v44 }
 0x134   : >> { %8602 = vmatprep.subr.bf16.mxu1 %v9303_v6  ;;  %v891_v11 = vpack.c.bf16 %v886_v9, %v885_v8  ;;  %v892_v12 = vpack.c.bf16 %v888_v7, %v887_v10  ;;  %v1140_v33 = vld [vmem:[#allocation3 + $0x22] sm:$0xff]  ;;  %v1141_v34 = vld [vmem:[#allocation3 + $0x2a] sm:$0xff]  ;;  %v1142_v39 = vld [vmem:[#allocation3 + $0x32] sm:$0xff]  ;;  %8654 = vmatprep.subr.bf16.mxu0 %v9321_v45 }
 0x135   : >> { %v1146_v38 = vpack.c.bf16 %v1141_v34, %v1140_v33  ;;  %v1143_v40 = vld [vmem:[#allocation3 + $0x3a] sm:$0xf]  ;;  %v9331_v44 = vld [vmem:[%s12008_s5 + $0x30] sm:$0xff]  }
 0x136   : >> { %8594 = vmatprep.mubr.bf16.mxu1 %v891_v11  ;;  %v1147_v36 = vpack.c.bf16 %v1143_v40, %v1142_v39  ;;  %v9326_v39 = vld [vmem:[%s12008_s5 + $0x8] sm:$0xff]  }
 0x137   : >> { %8603 = vmatpush3.bf16.msra.mxu1 %v9303_v6  ;;  %8655 = vmatpush3.bf16.msra.mxu0 %v9321_v45  ;;  %v9332_v45 = vld [vmem:[%s12008_s5 + $0x38] sm:$0xff]  }
 0x138   : >> { %8595 = vmatmul.mubr.bf16.gmra.mrb[20].mxu1 %v892_v12  ;;  %8604 = vmatprep.subr.bf16.mxu1 %v9304_v13 }
 0x139   : >> { %8614 = vmatprep.mubr.bf16.mxu1 %v861_v35  ;;  %8656 = vmatprep.subr.bf16.mxu0 %v9322_v46 }
 0x13b   : >> { %8605 = vmatpush3.bf16.msra.mxu1 %v9304_v13  ;;  %8657 = vmatpush3.bf16.msra.mxu0 %v9322_v46  ;;  %v9333_v46 = vld [vmem:[%s12008_s5 + $0x80] sm:$0xff]  }
 0x13c   : >> { %8606 = vmatprep.subr.bf16.mxu1 %v9305_v14  ;;  %8658 = vmatprep.subr.bf16.mxu0 %v9323_v47 }
 0x13f   : >> { %8607 = vmatpush3.bf16.msra.mxu1 %v9305_v14  ;;  %8659 = vmatpush3.bf16.msra.mxu0 %v9323_v47 }
 0x140   : >> { %8608 = vmatprep.subr.bf16.mxu1 %v9306_v15  ;;  %8660 = vmatprep.subr.bf16.mxu0 %v9324_v48 }
 0x143   : >> { %8609 = vmatpush3.bf16.msra.mxu1 %v9306_v15  ;;  %8661 = vmatpush3.bf16.msra.mxu0 %v9324_v48 }
 0x144   : >> { %8610 = vmatprep.subr.bf16.mxu1 %v9307_v63  ;;  %8666 = vmatprep.subr.bf16.mxu0 %v10003_v49 }
 0x147   : >> { %8611 = vmatpush3.bf16.msra.mxu1 %v9307_v63 }
 0x148   : >> { %8612 = vmatprep.subr.bf16.mxu1 %v9308_v4 }
 0x14b   : >> { %8613 = vmatpush3.bf16.msra.mxu1 %v9308_v4 }
 0x14c   : >> { %8622 = vmatprep.subr.bf16.mxu1 %v9309_v16 }
 0x14e   : >> { %8615 = vmatmul.mubr.bf16.vlgmr.msra.gmra.mrb[16].mxu1 %v862_v18 }
 0x14f   : >> { %8618 = vmatprep.mubr.bf16.mxu1 %v863_v20  ;;  %8623 = vmatpush3.bf16.msra.mxu1 %v9309_v16 }
 0x150   : >> { %8624 = vmatprep.subr.bf16.mxu1 %v9310_v19 }
 0x153   : >> { %8625 = vmatpush3.bf16.msra.mxu1 %v9310_v19 }
 0x154   : >> { %8626 = vmatprep.subr.bf16.mxu1 %v9311_v21 }
 0x156   : >> { %8619 = vmatmul.mubr.bf16.gmra.mrb[20].mxu1 %v864_v23 }
 0x157   : >> { %8627 = vmatpush3.bf16.msra.mxu1 %v9311_v21  ;;  %8638 = vmatprep.mubr.bf16.mxu1 %v1144_v26 }
 0x158   : >> { %8628 = vmatprep.subr.bf16.mxu1 %v9312_v25 }
 0x15b   : >> { %8629 = vmatpush3.bf16.msra.mxu1 %v9312_v25 }
 0x15c   : >> { %8630 = vmatprep.subr.bf16.mxu1 %v9313_v27 }
 0x15f   : >> { %8631 = vmatpush3.bf16.msra.mxu1 %v9313_v27 }
 0x160   : >> { %8632 = vmatprep.subr.bf16.mxu1 %v9314_v28 }
 0x163   : >> { %8633 = vmatpush3.bf16.msra.mxu1 %v9314_v28 }
 0x164   : >> { %8634 = vmatprep.subr.bf16.mxu1 %v9315_v29 }
 0x167   : >> { %8635 = vmatpush3.bf16.msra.mxu1 %v9315_v29 }
 0x168   : >> { %8636 = vmatprep.subr.bf16.mxu1 %v9316_v30 }
 0x16b   : >> { %8637 = vmatpush3.bf16.msra.mxu1 %v9316_v30 }
 0x16c   : >> { %8706 = vmatprep.subr.bf16.mxu1 %v9681_v51 }
 0x16e   : >> { %8639 = vmatmul.mubr.bf16.vlgmr.msra.gmra.mrb[16].mxu1 %v1145_v37 }
 0x16f   : >> { %8642 = vmatprep.mubr.bf16.mxu1 %v1146_v38  ;;  %8707 = vmatpush3.bf16.msra.mxu1 %v9341_v50 }
 0x170   : >> { %8708 = vmatprep.subr.bf16.mxu1 %v9681_v51 }
 0x176   : >> { %8643 = vmatmul.mubr.bf16.gmra.mrb[20].mxu1 %v1147_v36  ;;  %v9327_v36 = vld [vmem:[%s12008_s5 + $0x10] sm:$0xff]  }
 0x177   : >> { %8722 = vmatprep.mubr.msk.bf16.mxu1 %vm9682_vm2, %v9681_v51 }
 0x241   : >> { %v8640_v53 = vpop.f32.mrb[16].mxu1 }
 0x242   : >> { %v1295_v54 = vadd.f32 %v8640_v53, %v7238_v52  ;;  %v1247_v55 = vpop.f32.mrb[17].mxu1 }
 0x243   : >> { %v1293_v56 = vadd.f32 %v7238_v52, %v1247_v55  ;;  %v8641_v57 = vpop.f32.mrb[18].mxu1  ;;  %v9336_v55 = vld [vmem:[%s12008_s5 + $0x98] sm:$0xff]  }
 0x244   : >> { %1303 = vst [vmem:[#allocation2 + $0x10] sm:$0xff] %v1295_v54  ;;  %v1296_v58 = vadd.f32 %v8641_v57, %v7238_v52  ;;  %v1250_v59 = vpop.f32.mrb[19].mxu1  ;;  %v9335_v54 = vld [vmem:[%s12008_s5 + $0x90] sm:$0xff]   ;;  %v9338_v57 = vld [vmem:[%s12008_s5 + $0xa8] sm:$0xff]  }
 0x245   : >> { %1301 = vst [vmem:[#allocation2] sm:$0xff] %v1293_v56  ;;  %v1294_v60 = vadd.f32 %v7238_v52, %v1250_v59  ;;  %v9337_v56 = vld [vmem:[%s12008_s5 + $0xa0] sm:$0xff]   ;;  %v9340_v59 = vld [vmem:[%s12008_s5 + $0xb8] sm:$0xff]  }
 0x246   : >> { %1304 = vst [vmem:[#allocation2 + $0x18] sm:$0xff] %v1296_v58  ;;  %v9339_v58 = vld [vmem:[%s12008_s5 + $0xb0] sm:$0xff]  }
 0x247   : >> { %1302 = vst [vmem:[#allocation2 + $0x8] sm:$0xff] %v1294_v60 }
 0x249   : >> { %v8644_v61 = vpop.f32.mrb[20].mxu1 }
 0x24a   : >> { %v1299_v62 = vadd.f32 %v8644_v61, %v7238_v52  ;;  %v1263_v0 = vpop.f32.mrb[21].mxu1 }
 0x24b   : >> { %v1297_v1 = vadd.f32 %v7238_v52, %v1263_v0  ;;  %v8645_v2 = vpop.f32.mrb[22].mxu1  ;;  %v9342_v0 = vld [vmem:[%s12010_s7] sm:$0xff]  }
 0x24c   : >> { %1307 = vst [vmem:[#allocation2 + $0x30] sm:$0xff] %v1299_v62  ;;  %v1300_v3 = vadd.f32 %v8645_v2, %v7238_v52  ;;  %v1266_v5 = vpop.f32.mrb[23].mxu1  ;;  %v9343_v2 = vld [vmem:[%s12010_s7 + $0x48] sm:$0xff]  }
 0x24d   : >> { %v1311_v6 = vld [vmem:[#allocation2 + $0x10] ss:$2 sm:$0xff]  ;;  %1305 = vst [vmem:[#allocation2 + $0x20] sm:$0xff] %v1297_v1  ;;  %v1298_v7 = vadd.f32 %v7238_v52, %v1266_v5  ;;  %v1317_v14 = vld [vmem:[#allocation2 + $0x11] ss:$2 sm:$0xff]  ;;  %v9334_v52 = vld [vmem:[%s12008_s5 + $0x88] sm:$0xff]   ;;  %8709 = vmatpush3.bf16.msra.mxu1 %v9343_v2 }
 0x24e   : >> { %v1329_v8 = vrot.slane %v1311_v6, 1  ;;  %v1309_v9 = vld [vmem:[#allocation2] ss:$2 sm:$0xff]  ;;  %v1316_v10 = vld [vmem:[#allocation2 + $0x1] ss:$2 sm:$0xff]  ;;  %v1321_v22 = vmax.f32 %v1311_v6, %v1317_v14  ;;  %8710 = vmatprep.subr.bf16.mxu1 %v9681_v51  ;;  %v9345_v5 = vld [vmem:[%s12010_s7 + $0x50] sm:$0xff]  }
 0x24f   : >> { %1308 = vst [vmem:[#allocation2 + $0x38] sm:$0xf] %v1300_v3  ;;  %v1320_v11 = vmax.f32 %v1309_v9, %v1316_v10  ;;  %v1328_v12 = vrot.slane %v1309_v9, 1  ;;  %1306 = vst [vmem:[#allocation2 + $0x28] sm:$0xff] %v1298_v7  ;;  %v9344_v1 = vld [vmem:[%s12010_s7 + $0x8] sm:$0xff]   ;;  %v9346_v3 = vld [vmem:[%s12010_s7 + $0x10] sm:$0xff]  }
 0x250   : >> { %v9348_v6 = vld [vmem:[%s12010_s7 + $0x18] sm:$0xff]   ;;  %v9349_v9 = vld [vmem:[%s12010_s7 + $0x60] sm:$0xff]   ;;  %v9352_v10 = vld [vmem:[%s12010_s7 + $0x28] sm:$0xff]  }
 0x251   : >> { %v1330_v13 = vsel %vm805_vm1, %v1328_v12, %v1329_v8  ;;  %8711 = vmatpush3.bf16.msra.mxu1 %v9345_v5  ;;  %v9347_v7 = vld [vmem:[%s12010_s7 + $0x58] sm:$0xff]   ;;  %v9354_v12 = vld [vmem:[%s12010_s7 + $0x30] sm:$0xff]  }
 0x252   : >> { %v1339_v35 = vmax.f32 %v1320_v11, %v1330_v13  ;;  %8712 = vmatprep.subr.bf16.mxu1 %v9681_v51  ;;  %v9351_v11 = vld [vmem:[%s12010_s7 + $0x68] sm:$0xff]   ;;  %v9353_v13 = vld [vmem:[%s12010_s7 + $0x70] sm:$0xff]   ;;  %v9355_v14 = vld [vmem:[%s12010_s7 + $0x78] sm:$0xff]  }
 0x253   : >> { %v9377_v2 = vld [vmem:[%s12012_s9 + $0x70] sm:$0xff]   ;;  %v9379_v5 = vld [vmem:[%s12012_s9 + $0x78] sm:$0xff]  }
 0x254   : >> { %v1343_v15 = vmax.f32 %v1339_v35, 0.0  ;;  %v9356_v35 = vld [vmem:[%s12010_s7 + $0x38] sm:$0xff]  }
 0x255   : >> { %8713 = vmatpush3.bf16.msra.mxu1 %v9347_v7 }
 0x256   : >> { %v1315_v63 = vld [vmem:[#allocation2 + $0x30] ss:$2 sm:$0x3f]  ;;  %v1319_v4 = vld [vmem:[#allocation2 + $0x31] ss:$2 sm:$0x1f]  ;;  %8714 = vmatprep.subr.bf16.mxu1 %v9681_v51 }
 0x257   : >> { %v1323_v16 = vmax.f32 %v1315_v63, %v1319_v4  ;;  %v1333_v18 = vrot.slane %v1315_v63, 1  ;;  %v1313_v19 = vld [vmem:[#allocation2 + $0x20] ss:$2 sm:$0xff]  ;;  %v1318_v20 = vld [vmem:[#allocation2 + $0x21] ss:$2 sm:$0xff]  ;;  %1347 = vst [vmem:[#allocation3] sm:$0xff] %v1343_v15 }
 0x258   : >> { %v1322_v21 = vmax.f32 %v1313_v19, %v1318_v20  ;;  %v1331_v17 = vrot.slane %v1313_v19, 1 }
 0x259   : >> { %v1342_v24 = vmax.f32 %v1323_v16, %v1333_v18  ;;  %8715 = vmatpush3.bf16.msra.mxu1 %v9349_v9 }
 0x25a   : >> { %v1332_v23 = vsel %vm805_vm1, %v1329_v8, %v1331_v17  ;;  %v1334_v25 = vsel %vm805_vm1, %v1331_v17, %v1333_v18  ;;  %v9350_v8 = vld [vmem:[%s12010_s7 + $0x20] sm:$0xff]   ;;  %8716 = vmatprep.subr.bf16.mxu1 %v9681_v51 }
 0x25b   : >> { %v1346_v26 = vmax.f32 %v1342_v24, 0.0  ;;  %v1340_v27 = vmax.f32 %v1321_v22, %v1332_v23  ;;  %v1341_v28 = vmax.f32 %v1322_v21, %v1334_v25 }
 0x25d   : >> { %1350 = vst [vmem:[#allocation3 + $0x18] sm:$0x1f] %v1346_v26  ;;  %v1344_v29 = vmax.f32 %v1340_v27, 0.0  ;;  %v1345_v30 = vmax.f32 %v1341_v28, 0.0  ;;  %8717 = vmatpush3.bf16.msra.mxu1 %v9351_v11 }
 0x25e   : >> { %8718 = vmatprep.subr.bf16.mxu1 %v9681_v51 }
 0x25f   : >> { %1348 = vst [vmem:[#allocation3 + $0x8] sm:$0xff] %v1344_v29  ;;  %1349 = vst [vmem:[#allocation3 + $0x10] sm:$0xff] %v1345_v30  ;;  %v1355_v40 = vpack.c.bf16 %v1344_v29, %v1343_v15  ;;  %v7295_v15 = vld [vmem:[%s12009_s6] ss:$0 sm:$0xff] }
 0x261   : >> { %8719 = vmatpush3.bf16.msra.mxu1 %v9353_v13 }
 0x262   : >> { %8720 = vmatprep.subr.bf16.mxu1 %v9681_v51 }
 0x264   : >> { %v1376_v31 = vld [vmem:[#allocation3 + $0x19] sm:$0x7] }
 0x265   : >> { %v1354_v47 = vld [vmem:[#allocation3 + $0x18] sm:$0x7]  ;;  %8721 = vmatpush3.bf16.msra.mxu1 %v9355_v14 }
 0x266   : >> { %v1373_v32 = vld [vmem:[#allocation3 + $0x1] sm:$0xff]  ;;  %v1374_v33 = vld [vmem:[#allocation3 + $0x9] sm:$0xff]  ;;  %v1375_v34 = vld [vmem:[#allocation3 + $0x11] sm:$0xff]  ;;  %v1356_v50 = vpack.c.bf16 %v1354_v47, %v1345_v30  ;;  %8746 = vmatprep.subr.bf16.mxu1 %v9681_v51 }
 0x267   : >> { %v1377_v37 = vpack.c.bf16 %v1374_v33, %v1373_v32  ;;  %v1378_v38 = vpack.c.bf16 %v1376_v31, %v1375_v34  ;;  %v1590_v48 = vld [vmem:[#allocation3 + $0x2] sm:$0xff]  ;;  %v1592_v60 = vld [vmem:[#allocation3 + $0x12] sm:$0xff]  ;;  %v1593_v61 = vld [vmem:[#allocation3 + $0x1a] sm:$0x7] }
 0x268   : >> { %v1595_v62 = vpack.c.bf16 %v1593_v61, %v1592_v60  ;;  %v9363_v47 = vld [vmem:[%s12010_s7 + $0xb0] sm:$0xff]   ;;  %v9372_v60 = vld [vmem:[%s12012_s9 + $0x18] sm:$0xff]   ;;  %v9373_v61 = vld [vmem:[%s12012_s9 + $0x60] sm:$0xff]  }
 0x269   : >> { %8662 = vmatprep.mubr.bf16.mxu0 %v1377_v37 }
 0x26a   : >> { %8663 = vmatmul.mubr.bf16.vlgmr.msra.gmra.mrb[0].mxu0 %v1378_v38 }
 0x26b   : >> { %8667 = vmatpush3.bf16.msra.mxu0 %v10003_v49  ;;  %8682 = vmatprep.mubr.bf16.mxu0 %v1355_v40  ;;  %v1591_v49 = vld [vmem:[#allocation3 + $0xa] sm:$0xff] }
 0x26c   : >> { %8668 = vmatprep.subr.bf16.mxu0 %v9326_v39  ;;  %v1594_v53 = vpack.c.bf16 %v1591_v49, %v1590_v48  ;;  %v9364_v48 = vld [vmem:[%s12010_s7 + $0xb8] sm:$0xff]  }
 0x26f   : >> { %8669 = vmatpush3.bf16.msra.mxu0 %v9326_v39 }
 0x270   : >> { %8670 = vmatprep.subr.bf16.mxu0 %v9327_v36 }
 0x273   : >> { %8671 = vmatpush3.bf16.msra.mxu0 %v9327_v36  ;;  %v9357_v36 = vld [vmem:[%s12010_s7 + $0x80] sm:$0xff]  }
 0x274   : >> { %8672 = vmatprep.subr.bf16.mxu0 %v9328_v41 }
 0x277   : >> { %8673 = vmatpush3.bf16.msra.mxu0 %v9328_v41 }
 0x278   : >> { %8674 = vmatprep.subr.bf16.mxu0 %v9329_v42 }
 0x27b   : >> { %8675 = vmatpush3.bf16.msra.mxu0 %v9329_v42  ;;  %v9358_v42 = vld [vmem:[%s12010_s7 + $0x88] sm:$0xff]  }
 0x27c   : >> { %8676 = vmatprep.subr.bf16.mxu0 %v9330_v43 }
 0x27f   : >> { %8677 = vmatpush3.bf16.msra.mxu0 %v9330_v43  ;;  %v9359_v43 = vld [vmem:[%s12010_s7 + $0x90] sm:$0xff]  }
 0x280   : >> { %8678 = vmatprep.subr.bf16.mxu0 %v9331_v44 }
 0x283   : >> { %8679 = vmatpush3.bf16.msra.mxu0 %v9331_v44  ;;  %v9360_v44 = vld [vmem:[%s12010_s7 + $0x98] sm:$0xff]  }
 0x284   : >> { %8680 = vmatprep.subr.bf16.mxu0 %v9332_v45 }
 0x287   : >> { %8681 = vmatpush3.bf16.msra.mxu0 %v9332_v45  ;;  %v9361_v45 = vld [vmem:[%s12010_s7 + $0xa0] sm:$0xff]  }
 0x288   : >> { %8686 = vmatprep.subr.bf16.mxu0 %v9333_v46 }
 0x28a   : >> { %8683 = vmatmul.mubr.bf16.vlgmr.msra.gmra.mrb[0].mxu0 %v1356_v50 }
 0x28b   : >> { %8687 = vmatpush3.bf16.msra.mxu0 %v9333_v46  ;;  %8702 = vmatprep.mubr.bf16.mxu0 %v1594_v53  ;;  %v9362_v46 = vld [vmem:[%s12010_s7 + $0xa8] sm:$0xff]   ;;  %v9365_v53 = vld [vmem:[%s12012_s9 + $0x40] sm:$0xff]  }
 0x28c   : >> { %8688 = vmatprep.subr.bf16.mxu0 %v9334_v52 }
 0x28f   : >> { %8689 = vmatpush3.bf16.msra.mxu0 %v9334_v52 }
 0x290   : >> { %8690 = vmatprep.subr.bf16.mxu0 %v9335_v54 }
 0x293   : >> { %8691 = vmatpush3.bf16.msra.mxu0 %v9335_v54  ;;  %v9366_v54 = vld [vmem:[%s12012_s9] sm:$0xff]  }
 0x294   : >> { %8692 = vmatprep.subr.bf16.mxu0 %v9336_v55 }
 0x297   : >> { %8693 = vmatpush3.bf16.msra.mxu0 %v9336_v55  ;;  %v9367_v55 = vld [vmem:[%s12012_s9 + $0x48] sm:$0xff]  }
 0x298   : >> { %8694 = vmatprep.subr.bf16.mxu0 %v9337_v56 }
 0x29b   : >> { %8695 = vmatpush3.bf16.msra.mxu0 %v9337_v56  ;;  %v9368_v56 = vld [vmem:[%s12012_s9 + $0x8] sm:$0xff]  }
 0x29c   : >> { %8696 = vmatprep.subr.bf16.mxu0 %v9338_v57 }
 0x29f   : >> { %8697 = vmatpush3.bf16.msra.mxu0 %v9338_v57  ;;  %v9369_v57 = vld [vmem:[%s12012_s9 + $0x50] sm:$0xff]  }
 0x2a0   : >> { %8698 = vmatprep.subr.bf16.mxu0 %v9339_v58 }
 0x2a3   : >> { %8699 = vmatpush3.bf16.msra.mxu0 %v9339_v58  ;;  %v9370_v58 = vld [vmem:[%s12012_s9 + $0x10] sm:$0xff]  }
 0x2a4   : >> { %8700 = vmatprep.subr.bf16.mxu0 %v9340_v59 }
 0x2a7   : >> { %8701 = vmatpush3.bf16.msra.mxu0 %v9340_v59  ;;  %v9371_v59 = vld [vmem:[%s12012_s9 + $0x58] sm:$0xff]  }
 0x2a8   : >> { %8726 = vmatprep.subr.bf16.mxu0 %v9681_v51 }
 0x2aa   : >> { %8703 = vmatmul.mubr.bf16.vlgmr.msra.gmra.mrb[0].mxu0 %v1595_v62  ;;  %v9374_v62 = vld [vmem:[%s12012_s9 + $0x20] sm:$0xff]  }
 0x2ab   : >> { %8727 = vmatpush3.bf16.msra.mxu0 %v9342_v0  ;;  %8742 = vmatprep.mubr.msk.bf16.mxu0 %vm9682_vm2, %v9681_v51  ;;  %v9375_v0 = vld [vmem:[%s12012_s9 + $0x68] sm:$0xff]  }
 0x2ac   : >> { %8728 = vmatprep.subr.bf16.mxu0 %v9681_v51 }
 0x2af   : >> { %8729 = vmatpush3.bf16.msra.mxu0 %v9344_v1  ;;  %v9376_v1 = vld [vmem:[%s12012_s9 + $0x28] sm:$0xff]  }
 0x2b0   : >> { %8730 = vmatprep.subr.bf16.mxu0 %v9681_v51 }
 0x2b3   : >> { %8731 = vmatpush3.bf16.msra.mxu0 %v9346_v3  ;;  %v9378_v3 = vld [vmem:[%s12012_s9 + $0x30] sm:$0xff]  }
 0x2b4   : >> { %8732 = vmatprep.subr.bf16.mxu0 %v9681_v51 }
 0x2b7   : >> { %8733 = vmatpush3.bf16.msra.mxu0 %v9348_v6  ;;  %v9380_v6 = vld [vmem:[%s12012_s9 + $0x38] sm:$0xff]  }
 0x2b8   : >> { %8734 = vmatprep.subr.bf16.mxu0 %v9681_v51 }
 0x2bb   : >> { %8735 = vmatpush3.bf16.msra.mxu0 %v9350_v8 }
 0x2bc   : >> { %8736 = vmatprep.subr.bf16.mxu0 %v9681_v51 }
 0x2bf   : >> { %8737 = vmatpush3.bf16.msra.mxu0 %v9352_v10 }
 0x2c0   : >> { %8738 = vmatprep.subr.bf16.mxu0 %v9681_v51 }
 0x2c3   : >> { %8739 = vmatpush3.bf16.msra.mxu0 %v9354_v12 }
 0x2c4   : >> { %8740 = vmatprep.subr.bf16.mxu0 %v9681_v51 }
 0x2c7   : >> { %8741 = vmatpush3.bf16.msra.mxu0 %v9356_v35 }
 0x2c8   : >> { %8766 = vmatprep.subr.bf16.mxu0 %v9681_v51 }
 0x37d   : >> { %v8704_v63 = vpop.f32.mrb[0].mxu0 }
 0x37e   : >> { %v1723_v4 = vadd.f32 %v8704_v63, %v7295_v15  ;;  %v1695_v16 = vpop.f32.mrb[1].mxu0 }
 0x37f   : >> { %v1721_v18 = vadd.f32 %v7295_v15, %v1695_v16  ;;  %v8705_v19 = vpop.f32.mrb[2].mxu0 }
 0x380   : >> { %1727 = vst [vmem:[#allocation2 + $0x10] sm:$0xff] %v1723_v4  ;;  %v1724_v20 = vadd.f32 %v8705_v19, %v7295_v15  ;;  %v1698_v21 = vpop.f32.mrb[3].mxu0  ;;  %v7352_v4 = vld [vmem:[%s12011_s8] ss:$0 sm:$0xff] }
 0x381   : >> { %1725 = vst [vmem:[#allocation2] sm:$0xff] %v1721_v18  ;;  %v1722_v17 = vadd.f32 %v7295_v15, %v1698_v21 }
 0x382   : >> { %1728 = vst [vmem:[#allocation2 + $0x18] sm:$0x7] %v1724_v20 }
 0x383   : >> { %1726 = vst [vmem:[#allocation2 + $0x8] sm:$0xff] %v1722_v17 }
 0x389   : >> { %v1730_v22 = vld [vmem:[#allocation2 + $0x10] ss:$2 sm:$0x3f]  ;;  %v1732_v24 = vld [vmem:[#allocation2 + $0x11] ss:$2 sm:$0x1f] }
 0x38a   : >> { %v1734_v23 = vmax.f32 %v1730_v22, %v1732_v24  ;;  %v1738_v25 = vrot.slane %v1730_v22, 1  ;;  %v1729_v26 = vld [vmem:[#allocation2] ss:$2 sm:$0xff]  ;;  %v1731_v27 = vld [vmem:[#allocation2 + $0x1] ss:$2 sm:$0xff] }
 0x38b   : >> { %v1733_v28 = vmax.f32 %v1729_v26, %v1731_v27  ;;  %v1737_v29 = vrot.slane %v1729_v26, 1 }
 0x38c   : >> { %v1743_v30 = vmax.f32 %v1734_v23, %v1738_v25 }
 0x38d   : >> { %v1739_v31 = vsel %vm805_vm1, %v1737_v29, %v1738_v25 }
 0x38e   : >> { %v1745_v32 = vmax.f32 %v1743_v30, 0.0  ;;  %v1742_v33 = vmax.f32 %v1733_v28, %v1739_v31  ;;  %v9381_v31 = vld [vmem:[%s12012_s9 + $0x80] sm:$0xff]  }
 0x390   : >> { %1747 = vst [vmem:[#allocation3 + $0x8] sm:$0x1f] %v1745_v32  ;;  %v1744_v34 = vmax.f32 %v1742_v33, 0.0 }
 0x392   : >> { %1746 = vst [vmem:[#allocation3] sm:$0xff] %v1744_v34 }
 0x397   : >> { %v1749_v37 = vld [vmem:[#allocation3 + $0x8] sm:$0x7] }
 0x398   : >> { %v1750_v38 = vpack.c.bf16 %v1749_v37, %v1744_v34  ;;  %v1768_v40 = vld [vmem:[#allocation3 + $0x9] sm:$0x7]  ;;  %v9383_v37 = vld [vmem:[%s12012_s9 + $0x90] sm:$0xff]  }
 0x399   : >> { %v1767_v39 = vld [vmem:[#allocation3 + $0x1] sm:$0xff]  ;;  %v1966_v50 = vld [vmem:[#allocation3 + $0xa] sm:$0x7] }
 0x39a   : >> { %v1769_v41 = vpack.c.bf16 %v1768_v40, %v1767_v39  ;;  %8743 = vmatmul.mubr.bf16.vlgmr.msra.gmra.mrb[4].mxu0 %v1750_v38  ;;  %v1965_v49 = vld [vmem:[#allocation3 + $0x2] sm:$0xff]  ;;  %v9384_v38 = vld [vmem:[%s12012_s9 + $0x98] sm:$0xff]  }
 0x39b   : >> { %8782 = vmatprep.mubr.msk.bf16.mxu0 %vm9682_vm2, %v9681_v51  ;;  %v1967_v52 = vpack.c.bf16 %v1966_v50, %v1965_v49  ;;  %8767 = vmatpush3.bf16.msra.mxu0 %v9365_v53  ;;  %v9382_v34 = vld [vmem:[%s12012_s9 + $0x88] sm:$0xff]   ;;  %v9385_v39 = vld [vmem:[%s12012_s9 + $0xa0] sm:$0xff]   ;;  %v9394_v49 = vld [vmem:[%s12014_s11 + $0x10] sm:$0xff]  }
 0x39c   : >> { %8723 = vmatmul.mubr.bf16.vlgmr.msra.gmra.mrb[24].mxu1 %v1769_v41  ;;  %8768 = vmatprep.subr.bf16.mxu0 %v9681_v51  ;;  %v9386_v40 = vld [vmem:[%s12012_s9 + $0xa8] sm:$0xff]   ;;  %v9388_v41 = vld [vmem:[%s12012_s9 + $0xb8] sm:$0xff]   ;;  %v9397_v53 = vld [vmem:[%s12014_s11 + $0x60] sm:$0xff]  }
 0x39d   : >> { %8747 = vmatpush3.bf16.msra.mxu1 %v9357_v36  ;;  %8762 = vmatprep.mubr.msk.bf16.mxu1 %vm9682_vm2, %v9681_v51  ;;  %v9387_v36 = vld [vmem:[%s12012_s9 + $0xb0] sm:$0xff]   ;;  %v9395_v50 = vld [vmem:[%s12014_s11 + $0x58] sm:$0xff]  }
 0x39e   : >> { %8748 = vmatprep.subr.bf16.mxu1 %v9681_v51 }
 0x39f   : >> { %8769 = vmatpush3.bf16.msra.mxu0 %v9367_v55  ;;  %v9399_v55 = vld [vmem:[%s12014_s11 + $0x68] sm:$0xff]  }
 0x3a0   : >> { %8770 = vmatprep.subr.bf16.mxu0 %v9681_v51 }
 0x3a1   : >> { %8749 = vmatpush3.bf16.msra.mxu1 %v9358_v42 }
 0x3a2   : >> { %8750 = vmatprep.subr.bf16.mxu1 %v9681_v51 }
 0x3a3   : >> { %8771 = vmatpush3.bf16.msra.mxu0 %v9369_v57  ;;  %v9401_v57 = vld [vmem:[%s12014_s11 + $0x70] sm:$0xff]  }
 0x3a4   : >> { %8772 = vmatprep.subr.bf16.mxu0 %v9681_v51 }
 0x3a5   : >> { %8751 = vmatpush3.bf16.msra.mxu1 %v9359_v43 }
 0x3a6   : >> { %8752 = vmatprep.subr.bf16.mxu1 %v9681_v51 }
 0x3a7   : >> { %8773 = vmatpush3.bf16.msra.mxu0 %v9371_v59  ;;  %v9403_v59 = vld [vmem:[%s12014_s11 + $0x78] sm:$0xff]  }
 0x3a8   : >> { %8774 = vmatprep.subr.bf16.mxu0 %v9681_v51 }
 0x3a9   : >> { %8753 = vmatpush3.bf16.msra.mxu1 %v9360_v44  ;;  %v9389_v44 = vld [vmem:[%s12014_s11 + $0x40] sm:$0xff]  }
 0x3aa   : >> { %8754 = vmatprep.subr.bf16.mxu1 %v9681_v51 }
 0x3ab   : >> { %8775 = vmatpush3.bf16.msra.mxu0 %v9373_v61  ;;  %v9405_v61 = vld [vmem:[%s12127_s26] sm:$0xff]  }
 0x3ac   : >> { %8776 = vmatprep.subr.bf16.mxu0 %v9681_v51 }
 0x3ad   : >> { %8755 = vmatpush3.bf16.msra.mxu1 %v9361_v45  ;;  %v9390_v45 = vld [vmem:[%s12014_s11] sm:$0xff]  }
 0x3ae   : >> { %8756 = vmatprep.subr.bf16.mxu1 %v9681_v51 }
 0x3af   : >> { %8777 = vmatpush3.bf16.msra.mxu0 %v9375_v0 }
 0x3b0   : >> { %8778 = vmatprep.subr.bf16.mxu0 %v9681_v51 }
 0x3b1   : >> { %8757 = vmatpush3.bf16.msra.mxu1 %v9362_v46  ;;  %v9391_v46 = vld [vmem:[%s12014_s11 + $0x48] sm:$0xff]  }
 0x3b2   : >> { %8758 = vmatprep.subr.bf16.mxu1 %v9681_v51 }
 0x3b3   : >> { %8779 = vmatpush3.bf16.msra.mxu0 %v9377_v2 }
 0x3b4   : >> { %8780 = vmatprep.subr.bf16.mxu0 %v9681_v51 }
 0x3b5   : >> { %8759 = vmatpush3.bf16.msra.mxu1 %v9363_v47  ;;  %v9392_v47 = vld [vmem:[%s12014_s11 + $0x8] sm:$0xff]  }
 0x3b6   : >> { %8760 = vmatprep.subr.bf16.mxu1 %v9681_v51 }
 0x3b7   : >> { %8781 = vmatpush3.bf16.msra.mxu0 %v9379_v5 }
 0x3b8   : >> { %8806 = vmatprep.subr.bf16.mxu0 %v9681_v51 }
 0x3b9   : >> { %8761 = vmatpush3.bf16.msra.mxu1 %v9364_v48  ;;  %v9393_v48 = vld [vmem:[%s12014_s11 + $0x50] sm:$0xff]  }
 0x3ba   : >> { %8786 = vmatprep.subr.bf16.mxu1 %v9681_v51 }
 0x3bc   : >> { %8763 = vmatmul.mubr.bf16.vlgmr.msra.gmra.mrb[28].mxu1 %v1967_v52  ;;  %v9396_v52 = vld [vmem:[%s12014_s11 + $0x18] sm:$0xff]  }
 0x3bd   : >> { %8802 = vmatprep.mubr.msk.bf16.mxu1 %vm9682_vm2, %v9681_v51  ;;  %8787 = vmatpush3.bf16.msra.mxu1 %v9366_v54  ;;  %v9398_v54 = vld [vmem:[%s12014_s11 + $0x20] sm:$0xff]  }
 0x3be   : >> { %8788 = vmatprep.subr.bf16.mxu1 %v9681_v51 }
 0x3c1   : >> { %8789 = vmatpush3.bf16.msra.mxu1 %v9368_v56  ;;  %v9400_v56 = vld [vmem:[%s12014_s11 + $0x28] sm:$0xff]  }
 0x3c2   : >> { %8790 = vmatprep.subr.bf16.mxu1 %v9681_v51 }
 0x3c5   : >> { %8791 = vmatpush3.bf16.msra.mxu1 %v9370_v58  ;;  %v9402_v58 = vld [vmem:[%s12014_s11 + $0x30] sm:$0xff]  }
 0x3c6   : >> { %8792 = vmatprep.subr.bf16.mxu1 %v9681_v51 }
 0x3c9   : >> { %8793 = vmatpush3.bf16.msra.mxu1 %v9372_v60  ;;  %v9404_v60 = vld [vmem:[%s12014_s11 + $0x38] sm:$0xff]  }
 0x3ca   : >> { %8794 = vmatprep.subr.bf16.mxu1 %v9681_v51 }
 0x3cd   : >> { %8795 = vmatpush3.bf16.msra.mxu1 %v9374_v62 }
 0x3ce   : >> { %8796 = vmatprep.subr.bf16.mxu1 %v9681_v51 }
 0x3d1   : >> { %8797 = vmatpush3.bf16.msra.mxu1 %v9376_v1 }
 0x3d2   : >> { %8798 = vmatprep.subr.bf16.mxu1 %v9681_v51 }
 0x3d5   : >> { %8799 = vmatpush3.bf16.msra.mxu1 %v9378_v3 }
 0x3d6   : >> { %8800 = vmatprep.subr.bf16.mxu1 %v9681_v51 }
 0x3d9   : >> { %8801 = vmatpush3.bf16.msra.mxu1 %v9380_v6 }
 0x3da   : >> { %8826 = vmatprep.subr.bf16.mxu1 %v9681_v51 }
 0x46d   : >> { %v1958_v7 = vpop.f32.mrb[4].mxu0 }
 0x46e   : >> { %v8744_v8 = vpop.f32.mrb[5].mxu0 }
 0x46f   : >> { %v1869_v9 = vpop.f32.mrb[24].mxu1  ;;  %v1961_v10 = vpop.f32.mrb[6].mxu0 }
 0x470   : >> { %v1959_v11 = vadd.f32 %v1958_v7, %v1869_v9  ;;  %v8724_v12 = vpop.f32.mrb[25].mxu1  ;;  %v8745_v13 = vpop.f32.mrb[7].mxu0 }
 0x471   : >> { %v1872_v35 = vpop.f32.mrb[26].mxu1 }
 0x472   : >> { %v1962_v14 = vadd.f32 %v1961_v10, %v1872_v35  ;;  %v8725_v15 = vpop.f32.mrb[27].mxu1  ;;  %v7409_v10 = vld [vmem:[%s12013_s10] ss:$0 sm:$0xff] }
 0x48f   : >> { %v2067_v63 = vpop.f32.mrb[28].mxu1 }
 0x490   : >> { %v2074_v16 = vadd.f32 %v2067_v63, %v1959_v11  ;;  %v8764_v18 = vpop.f32.mrb[29].mxu1  ;;  %v7468_v63 = vld [vmem:[%s9808_s0 + $0x80] sm:$0xff] }
 0x491   : >> { %v2070_v19 = vpop.f32.mrb[30].mxu1 }
 0x492   : >> { %v2083_v20 = vadd.f32 %v7352_v4, %v2074_v16  ;;  %v2075_v21 = vadd.f32 %v2070_v19, %v1962_v14  ;;  %v8765_v17 = vpop.f32.mrb[31].mxu1  ;;  %v9406_v19 = vld [vmem:[%s12014_s11 + $0x80] sm:$0xff]  }
 0x493   : >> { %v9407_v17 = vld [vmem:[%s12127_s26 + $0x8] sm:$0xff]  }
 0x494   : >> { %2085 = vst [vmem:[#allocation2] sm:$0xff] %v2083_v20  ;;  %v2084_v22 = vadd.f32 %v7352_v4, %v2075_v21  ;;  %v7469_v4 = vld [vmem:[%s9808_s0 + $0x88] sm:$0xff] }
 0x496   : >> { %2086 = vst [vmem:[#allocation2 + $0x8] sm:$0x7] %v2084_v22  ;;  %v2772_v22 = vpack.c.bf16 %v7469_v4, %v7468_v63 }
 0x49d   : >> { %v2087_v24 = vld [vmem:[#allocation2] ss:$2 sm:$0x3f]  ;;  %v2088_v23 = vld [vmem:[#allocation2 + $0x1] ss:$2 sm:$0x1f] }
 0x49e   : >> { %v2089_v25 = vmax.f32 %v2087_v24, %v2088_v23  ;;  %v2091_v26 = vrot.slane %v2087_v24, 1  ;;  %v9408_v24 = vld [vmem:[%s12014_s11 + $0x88] sm:$0xff]   ;;  %v9409_v23 = vld [vmem:[%s12127_s26 + $0x10] sm:$0xff]  }
 0x4a0   : >> { %v2093_v27 = vmax.f32 %v2089_v25, %v2091_v26  ;;  %v9410_v25 = vld [vmem:[%s12014_s11 + $0x90] sm:$0xff]  }
 0x4a1   : >> { %v7470_v26 = vld [vmem:[%s9808_s0 + $0x90] sm:$0xff] }
 0x4a2   : >> { %v2094_v28 = vmax.f32 %v2093_v27, 0.0  ;;  %v7471_v27 = vld [vmem:[%s9808_s0 + $0x98] sm:$0xff] }
 0x4a4   : >> { %2095 = vst [vmem:[#allocation3] sm:$0x1f] %v2094_v28  ;;  %v7472_v28 = vld [vmem:[%s9808_s0 + $0xa0] sm:$0xff] }
 0x4ab   : >> { %v2114_v29 = vld [vmem:[#allocation3 + $0x1] sm:$0x7] }
 0x4ac   : >> { %v2096_v30 = vld [vmem:[#allocation3] sm:$0x7]  ;;  %v2115_v32 = vpack.c.bf16 %v2114_v29, %v2114_v29  ;;  %v7473_v29 = vld [vmem:[%s9808_s0 + $0xa8] sm:$0xff] }
 0x4ad   : >> { %v2097_v33 = vpack.c.bf16 %v2096_v30, %v2096_v30  ;;  %v2309_v42 = vld [vmem:[#allocation3 + $0x2] sm:$0x7]  ;;  %v2773_v30 = vpack.c.bf16 %v7471_v27, %v7470_v26 }
 0x4ae   : >> { %8783 = vmatmul.mubr.bf16.vlgmr.msra.gmra.mrb[8].mxu0 %v2115_v32  ;;  %v2310_v43 = vpack.c.bf16 %v2309_v42, %v2309_v42  ;;  %v2774_v32 = vpack.c.bf16 %v7473_v29, %v7472_v28  ;;  %v9414_v42 = vld [vmem:[%s12014_s11 + $0xb0] sm:$0xff]  }
 0x4af   : >> { %8803 = vmatmul.mubr.bf16.vlgmr.msra.gmra.mrb[32].mxu1 %v2097_v33  ;;  %8807 = vmatpush3.bf16.msra.mxu0 %v9381_v31  ;;  %v9411_v31 = vld [vmem:[%s12014_s11 + $0x98] sm:$0xff]   ;;  %v9412_v33 = vld [vmem:[%s12014_s11 + $0xa0] sm:$0xff]  }
 0x4b0   : >> { %8822 = vmatprep.mubr.msk.bf16.mxu0 %vm9682_vm2, %v9681_v51  ;;  %8808 = vmatprep.subr.bf16.mxu0 %v9681_v51 }
 0x4b1   : >> { %8842 = vmatprep.mubr.msk.bf16.mxu1 %vm9682_vm2, %v9681_v51  ;;  %8827 = vmatpush3.bf16.msra.mxu1 %v9389_v44  ;;  %v7479_v44 = vld [vmem:[%s9808_s0 + $0xd8] sm:$0xff] }
 0x4b2   : >> { %8828 = vmatprep.subr.bf16.mxu1 %v9681_v51 }
 0x4b3   : >> { %8809 = vmatpush3.bf16.msra.mxu0 %v9382_v34  ;;  %v7474_v34 = vld [vmem:[%s9808_s0 + $0xb0] sm:$0xff] }
 0x4b4   : >> { %8810 = vmatprep.subr.bf16.mxu0 %v9681_v51 }
 0x4b5   : >> { %8829 = vmatpush3.bf16.msra.mxu1 %v9391_v46  ;;  %v7481_v46 = vld [vmem:[%s9808_s0 + $0xe8] sm:$0xff] }
 0x4b6   : >> { %8830 = vmatprep.subr.bf16.mxu1 %v9681_v51 }
 0x4b7   : >> { %8811 = vmatpush3.bf16.msra.mxu0 %v9383_v37  ;;  %v7475_v37 = vld [vmem:[%s9808_s0 + $0xb8] sm:$0xff] }
 0x4b8   : >> { %8812 = vmatprep.subr.bf16.mxu0 %v9681_v51 }
 0x4b9   : >> { %8831 = vmatpush3.bf16.msra.mxu1 %v9393_v48  ;;  %v9415_v48 = vld [vmem:[%s12014_s11 + $0xb8] sm:$0xff]  }
 0x4ba   : >> { %8832 = vmatprep.subr.bf16.mxu1 %v9681_v51 }
 0x4bb   : >> { %8813 = vmatpush3.bf16.msra.mxu0 %v9384_v38  ;;  %v7476_v38 = vld [vmem:[%s9808_s0 + $0xc0] sm:$0xff] }
 0x4bc   : >> { %8814 = vmatprep.subr.bf16.mxu0 %v9681_v51 }
 0x4bd   : >> { %8833 = vmatpush3.bf16.msra.mxu1 %v9395_v50 }
 0x4be   : >> { %8834 = vmatprep.subr.bf16.mxu1 %v9681_v51 }
 0x4bf   : >> { %8815 = vmatpush3.bf16.msra.mxu0 %v9385_v39  ;;  %v7477_v39 = vld [vmem:[%s9808_s0 + $0xc8] sm:$0xff] }
 0x4c0   : >> { %8816 = vmatprep.subr.bf16.mxu0 %v9681_v51 }
 0x4c1   : >> { %8835 = vmatpush3.bf16.msra.mxu1 %v9397_v53  ;;  %v7483_v53 = vld [vmem:[%s9808_s0 + $0xf8] sm:$0x3f] }
 0x4c2   : >> { %8836 = vmatprep.subr.bf16.mxu1 %v9681_v51 }
 0x4c3   : >> { %8817 = vmatpush3.bf16.msra.mxu0 %v9386_v40  ;;  %v2775_v40 = vpack.c.bf16 %v7475_v37, %v7474_v34 }
 0x4c4   : >> { %8818 = vmatprep.subr.bf16.mxu0 %v9681_v51 }
 0x4c5   : >> { %8837 = vmatpush3.bf16.msra.mxu1 %v9399_v55 }
 0x4c6   : >> { %8838 = vmatprep.subr.bf16.mxu1 %v9681_v51 }
 0x4c7   : >> { %8819 = vmatpush3.bf16.msra.mxu0 %v9387_v36  ;;  %v9413_v36 = vld [vmem:[%s12014_s11 + $0xa8] sm:$0xff]  }
 0x4c8   : >> { %8820 = vmatprep.subr.bf16.mxu0 %v9681_v51 }
 0x4c9   : >> { %8839 = vmatpush3.bf16.msra.mxu1 %v9401_v57  ;;  %v9417_v57 = vld [vmem:[%s12006_s3 + $0x48] sm:$0xff]  }
 0x4ca   : >> { %8840 = vmatprep.subr.bf16.mxu1 %v9681_v51 }
 0x4cb   : >> { %8821 = vmatpush3.bf16.msra.mxu0 %v9388_v41  ;;  %v2776_v41 = vpack.c.bf16 %v7477_v39, %v7476_v38 }
 0x4cc   : >> { %8846 = vmatprep.subr.bf16.mxu0 %v9681_v51 }
 0x4cd   : >> { %8841 = vmatpush3.bf16.msra.mxu1 %v9403_v59  ;;  %v9419_v59 = vld [vmem:[%s12006_s3 + $0x58] sm:$0xff]  }
 0x4ce   : >> { %8823 = vmatmul.mubr.bf16.vlgmr.msra.gmra.mrb[12].mxu0 %v2310_v43  ;;  %8866 = vmatprep.subr.bf16.mxu1 %v9681_v51  ;;  %v7478_v43 = vld [vmem:[%s9808_s0 + $0xd0] sm:$0xff] }
 0x4cf   : >> { %8862 = vmatprep.mubr.msk.bf16.mxu0 %vm9682_vm2, %v9681_v51  ;;  %8847 = vmatpush3.bf16.msra.mxu0 %v9390_v45  ;;  %v7480_v45 = vld [vmem:[%s9808_s0 + $0xe0] sm:$0xff] }
 0x4d0   : >> { %8848 = vmatprep.subr.bf16.mxu0 %v9681_v51 }
 0x4d3   : >> { %8849 = vmatpush3.bf16.msra.mxu0 %v9392_v47  ;;  %v2777_v47 = vpack.c.bf16 %v7479_v44, %v7478_v43 }
 0x4d4   : >> { %8850 = vmatprep.subr.bf16.mxu0 %v9681_v51 }
 0x4d7   : >> { %8851 = vmatpush3.bf16.msra.mxu0 %v9394_v49  ;;  %v2778_v49 = vpack.c.bf16 %v7481_v46, %v7480_v45 }
 0x4d8   : >> { %8852 = vmatprep.subr.bf16.mxu0 %v9681_v51 }
 0x4db   : >> { %8853 = vmatpush3.bf16.msra.mxu0 %v9396_v52  ;;  %v7482_v52 = vld [vmem:[%s9808_s0 + $0xf0] sm:$0xff] }
 0x4dc   : >> { %8854 = vmatprep.subr.bf16.mxu0 %v9681_v51  ;;  %v2779_v55 = vpack.c.bf16 %v7483_v53, %v7482_v52 }
 0x4df   : >> { %8855 = vmatpush3.bf16.msra.mxu0 %v9398_v54 }
 0x4e0   : >> { %8856 = vmatprep.subr.bf16.mxu0 %v9681_v51 }
 0x4e3   : >> { %8857 = vmatpush3.bf16.msra.mxu0 %v9400_v56  ;;  %v9416_v56 = vld [vmem:[%s12006_s3 + $0x40] sm:$0xff]  }
 0x4e4   : >> { %8858 = vmatprep.subr.bf16.mxu0 %v9681_v51 }
 0x4e7   : >> { %8859 = vmatpush3.bf16.msra.mxu0 %v9402_v58  ;;  %v9418_v58 = vld [vmem:[%s12006_s3 + $0x50] sm:$0xff]  }
 0x4e8   : >> { %8860 = vmatprep.subr.bf16.mxu0 %v9681_v51 }
 0x4eb   : >> { %8861 = vmatpush3.bf16.msra.mxu0 %v9404_v60  ;;  %v9420_v60 = vld [vmem:[%s12006_s3 + $0x60] sm:$0xff]  }
 0x4ec   : >> { %8886 = vmatprep.subr.bf16.mxu0 %v9405_v61 }
 0x581   : >> { %v2215_v62 = vpop.f32.mrb[8].mxu0 }
 0x582   : >> { %v2303_v0 = vpop.f32.mrb[32].mxu1  ;;  %v8784_v2 = vpop.f32.mrb[9].mxu0 }
 0x583   : >> { %v2304_v1 = vadd.f32 %v2303_v0, %v2215_v62  ;;  %v8804_v3 = vpop.f32.mrb[33].mxu1  ;;  %v2218_v5 = vpop.f32.mrb[10].mxu0  ;;  %v9422_v62 = vld [vmem:[%s12006_s3 + $0x70] sm:$0xff]   ;;  %v9423_v0 = vld [vmem:[%s12006_s3 + $0x78] sm:$0xff]  }
 0x584   : >> { %v2306_v6 = vpop.f32.mrb[34].mxu1  ;;  %v8785_v7 = vpop.f32.mrb[11].mxu0 }
 0x585   : >> { %v8805_v8 = vpop.f32.mrb[35].mxu1 }
 0x5a1   : >> { %v2410_v9 = vpop.f32.mrb[12].mxu0 }
 0x5a2   : >> { %v2416_v11 = vadd.f32 %v2410_v9, %v2304_v1  ;;  %v8824_v12 = vpop.f32.mrb[13].mxu0  ;;  %v10434_v1 = vld [vmem:[%s12006_s3] sm:$0xff]  }
 0x5a3   : >> { %v2413_v13 = vpop.f32.mrb[14].mxu0  ;;  %v10440_v12 = vld [vmem:[%s12005_s2] ss:$0 sm:$0xff] }
 0x5a4   : >> { %v2424_v35 = vadd.f32 %v7409_v10, %v2416_v11  ;;  %v8825_v14 = vpop.f32.mrb[15].mxu0 }
 0x5a6   : >> { %v2425_v15 = vmax.f32 %v2424_v35, 0.0 }
 0x5a8   : >> { %2426 = vst [vmem:[#allocation2] sm:$0x7] %v2425_v15 }
 0x5af   : >> { %v2445_v16 = vld [vmem:[#allocation2 + $0x1] sm:$0x1]  ;;  %v2427_v18 = vld [vmem:[#allocation2] sm:$0x1]  ;;  %v2640_v50 = vld [vmem:[#allocation2 + $0x2] sm:$0x1] }
 0x5b0   : >> { %v2446_v20 = vpack.c.bf16 %v2445_v16, %v2445_v16  ;;  %v2428_v21 = vpack.c.bf16 %v2427_v18, %v2427_v18  ;;  %v2641_v54 = vpack.c.bf16 %v2640_v50, %v2640_v50 }
 0x5b2   : >> { %8843 = vmatmul.mubr.bf16.vlgmr.msra.gmra.mrb[36].mxu1 %v2446_v20  ;;  %8863 = vmatmul.mubr.bf16.vlgmr.msra.gmra.mrb[16].mxu0 %v2428_v21 }
 0x5b3   : >> { %8867 = vmatpush3.bf16.msra.mxu1 %v9406_v19  ;;  %8887 = vmatpush3.bf16.msra.mxu0 %v9405_v61  ;;  %v9421_v61 = vld [vmem:[%s12006_s3 + $0x68] sm:$0xff]  }
 0x5b4   : >> { %8868 = vmatprep.subr.bf16.mxu1 %v9681_v51  ;;  %8888 = vmatprep.subr.bf16.mxu0 %v9407_v17 }
 0x5b5   : >> { %8892 = vmatprep.mubr.msk.bf16.mxu0 %vm620_vm0, %v2772_v22  ;;  %8882 = vmatprep.mubr.msk.bf16.mxu1 %vm9682_vm2, %v9681_v51 }
 0x5b7   : >> { %8869 = vmatpush3.bf16.msra.mxu1 %v9408_v24  ;;  %8889 = vmatpush3.bf16.msra.mxu0 %v9407_v17 }
 0x5b8   : >> { %8870 = vmatprep.subr.bf16.mxu1 %v9681_v51  ;;  %8890 = vmatprep.subr.bf16.mxu0 %v9409_v23 }
 0x5bb   : >> { %8871 = vmatpush3.bf16.msra.mxu1 %v9410_v25  ;;  %8891 = vmatpush3.bf16.msra.mxu0 %v9409_v23 }
 0x5bc   : >> { %8872 = vmatprep.subr.bf16.mxu1 %v9681_v51  ;;  %8908 = vmatprep.subr.bf16.mxu0 %v9416_v56 }
 0x5be   : >> { %8893 = vmatmul.mubr.msk.bf16.vlgmr.msra.gmra.mrb[20].mxu0 %vm620_vm0, %v2773_v30 }
 0x5bf   : >> { %8873 = vmatpush3.bf16.msra.mxu1 %v9411_v31  ;;  %8896 = vmatprep.mubr.msk.bf16.mxu0 %vm620_vm0, %v2774_v32 }
 0x5c0   : >> { %8874 = vmatprep.subr.bf16.mxu1 %v9681_v51  ;;  %8909 = vmatpush3.bf16.msra.mxu0 %v9416_v56 }
 0x5c1   : >> { %8910 = vmatprep.subr.bf16.mxu0 %v9417_v57 }
 0x5c3   : >> { %8875 = vmatpush3.bf16.msra.mxu1 %v9412_v33 }
 0x5c4   : >> { %8876 = vmatprep.subr.bf16.mxu1 %v9681_v51  ;;  %8911 = vmatpush3.bf16.msra.mxu0 %v9417_v57 }
 0x5c5   : >> { %8912 = vmatprep.subr.bf16.mxu0 %v9418_v58 }
 0x5c6   : >> { %8897 = vmatmul.mubr.msk.bf16.gmra.mrb[24].mxu0 %vm620_vm0, %v2775_v40 }
 0x5c7   : >> { %8877 = vmatpush3.bf16.msra.mxu1 %v9413_v36  ;;  %8900 = vmatprep.mubr.msk.bf16.mxu0 %vm620_vm0, %v2776_v41 }
 0x5c8   : >> { %8878 = vmatprep.subr.bf16.mxu1 %v9681_v51  ;;  %8913 = vmatpush3.bf16.msra.mxu0 %v9418_v58 }
 0x5c9   : >> { %8914 = vmatprep.subr.bf16.mxu0 %v9419_v59 }
 0x5cb   : >> { %8879 = vmatpush3.bf16.msra.mxu1 %v9414_v42  ;;  %v2748_v42 = vld [vmem:[%s12015_s12] sm:$0x1] }
 0x5cc   : >> { %8880 = vmatprep.subr.bf16.mxu1 %v9681_v51  ;;  %8915 = vmatpush3.bf16.msra.mxu0 %v9419_v59 }
 0x5cd   : >> { %8916 = vmatprep.subr.bf16.mxu0 %v9420_v60 }
 0x5ce   : >> { %8901 = vmatmul.mubr.msk.bf16.gmra.mrb[28].mxu0 %vm620_vm0, %v2777_v47 }
 0x5cf   : >> { %8881 = vmatpush3.bf16.msra.mxu1 %v9415_v48  ;;  %8904 = vmatprep.mubr.msk.bf16.mxu0 %vm620_vm0, %v2778_v49 }
 0x5d0   : >> { %8917 = vmatpush3.bf16.msra.mxu0 %v9420_v60 }
 0x5d1   : >> { %8918 = vmatprep.subr.bf16.mxu0 %v9421_v61 }
 0x5d2   : >> { %8883 = vmatmul.mubr.bf16.vlgmr.msra.gmra.mrb[40].mxu1 %v2641_v54 }
 0x5d4   : >> { %8919 = vmatpush3.bf16.msra.mxu0 %v9421_v61 }
 0x5d5   : >> { %8920 = vmatprep.subr.bf16.mxu0 %v9422_v62 }
 0x5d6   : >> { %8905 = vmatmul.mubr.msk.bf16.gmra.mrb[32].mxu0 %vm620_vm0, %v2779_v55 }
 0x5d8   : >> { %8921 = vmatpush3.bf16.msra.mxu0 %v9422_v62 }
 0x5d9   : >> { %8922 = vmatprep.subr.bf16.mxu0 %v9423_v0 }
 0x5dc   : >> { %8923 = vmatpush3.bf16.msra.mxu0 %v9423_v0 }
 0x5dd   : >> { %8932 = vmatprep.subr.bf16.mxu0 %v10434_v1 }
 0x685   : >> { %v2546_v2 = vpop.f32.mrb[36].mxu1  ;;  %v2634_v3 = vpop.f32.mrb[16].mxu0 }
 0x686   : >> { %v2635_v5 = vadd.f32 %v2634_v3, %v2546_v2  ;;  %v8844_v6 = vpop.f32.mrb[37].mxu1  ;;  %v8864_v7 = vpop.f32.mrb[17].mxu0 }
 0x687   : >> { %v2549_v8 = vpop.f32.mrb[38].mxu1  ;;  %v2637_v9 = vpop.f32.mrb[18].mxu0 }
 0x688   : >> { %v8845_v10 = vpop.f32.mrb[39].mxu1  ;;  %v8865_v11 = vpop.f32.mrb[19].mxu0 }
 0x691   : >> { %v8894_v13 = vpop.f32.mrb[20].mxu0 }
 0x692   : >> { %v2878_v35 = vadd.f32 %v8894_v13, %v10440_v12  ;;  %v2869_v14 = vpop.f32.mrb[21].mxu0 }
 0x693   : >> { %v2870_v15 = vadd.f32 %v10440_v12, %v2869_v14  ;;  %v8895_v63 = vpop.f32.mrb[22].mxu0 }
 0x694   : >> { %2934 = vst [vmem:[#allocation4 + $0x10] sm:$0xff] %v2878_v35  ;;  %v2881_v4 = vadd.f32 %v8895_v63, %v10440_v12  ;;  %v2872_v16 = vpop.f32.mrb[23].mxu0 }
 0x695   : >> { %2932 = vst [vmem:[#allocation4] sm:$0xff] %v2870_v15  ;;  %v2873_v18 = vadd.f32 %v10440_v12, %v2872_v16 }
 0x696   : >> { %2935 = vst [vmem:[#allocation4 + $0x18] sm:$0xff] %v2881_v4 }
 0x697   : >> { %2933 = vst [vmem:[#allocation4 + $0x8] sm:$0xff] %v2873_v18 }
 0x699   : >> { %v8898_v19 = vpop.f32.mrb[24].mxu0 }
 0x69a   : >> { %v2894_v20 = vadd.f32 %v8898_v19, %v10440_v12  ;;  %v2885_v21 = vpop.f32.mrb[25].mxu0 }
 0x69b   : >> { %v2886_v17 = vadd.f32 %v10440_v12, %v2885_v21  ;;  %v8899_v22 = vpop.f32.mrb[26].mxu0 }
 0x69c   : >> { %2938 = vst [vmem:[#allocation4 + $0x30] sm:$0xff] %v2894_v20  ;;  %v2897_v24 = vadd.f32 %v8899_v22, %v10440_v12  ;;  %v2888_v23 = vpop.f32.mrb[27].mxu0 }
 0x69d   : >> { %v2950_v25 = vld [vmem:[#allocation4 + $0x10] ss:$2 sm:$0xff]  ;;  %2936 = vst [vmem:[#allocation4 + $0x20] sm:$0xff] %v2886_v17  ;;  %v2889_v26 = vadd.f32 %v10440_v12, %v2888_v23  ;;  %v2966_v44 = vld [vmem:[#allocation4 + $0x11] ss:$2 sm:$0xff] }
 0x69e   : >> { %v2996_v27 = vrot.slane %v2950_v25, 1  ;;  %v2948_v28 = vld [vmem:[#allocation4] ss:$2 sm:$0xff]  ;;  %v2964_v29 = vld [vmem:[#allocation4 + $0x1] ss:$2 sm:$0xff]  ;;  %2939 = vst [vmem:[#allocation4 + $0x38] sm:$0xff] %v2897_v24  ;;  %v2980_v57 = vmax.f32 %v2950_v25, %v2966_v44 }
 0x69f   : >> { %2937 = vst [vmem:[#allocation4 + $0x28] sm:$0xff] %v2889_v26  ;;  %v2979_v30 = vmax.f32 %v2948_v28, %v2964_v29  ;;  %v2995_v31 = vrot.slane %v2948_v28, 1 }
 0x6a1   : >> { %v8902_v32 = vpop.f32.mrb[28].mxu0  ;;  %v2997_v33 = vsel %vm805_vm1, %v2995_v31, %v2996_v27 }
 0x6a2   : >> { %v2910_v34 = vadd.f32 %v8902_v32, %v10440_v12  ;;  %v2901_v37 = vpop.f32.mrb[29].mxu0  ;;  %v10452_v38 = vmax.f32 %v2979_v30, %v2997_v33 }
 0x6a3   : >> { %v2902_v39 = vadd.f32 %v10440_v12, %v2901_v37  ;;  %v8903_v40 = vpop.f32.mrb[30].mxu0 }
 0x6a4   : >> { %2942 = vst [vmem:[#allocation4 + $0x50] sm:$0xff] %v2910_v34  ;;  %v2913_v36 = vadd.f32 %v8903_v40, %v10440_v12  ;;  %v2904_v41 = vpop.f32.mrb[31].mxu0  ;;  %v3026_v43 = vmax.f32 %v10452_v38, 0.0  ;;  %v9430_v38 = vld [vmem:[%s12006_s3 + $0x30] sm:$0xff]  }
 0x6a5   : >> { %v2954_v45 = vld [vmem:[#allocation4 + $0x30] ss:$2 sm:$0xff]  ;;  %2940 = vst [vmem:[#allocation4 + $0x40] sm:$0xff] %v2902_v39  ;;  %v2905_v46 = vadd.f32 %v10440_v12, %v2904_v41  ;;  %v2741_v47 = vpop.f32.mrb[40].mxu1  ;;  %v2970_v35 = vld [vmem:[#allocation4 + $0x31] ss:$2 sm:$0xff] }
 0x6a6   : >> { %v3000_v48 = vrot.slane %v2954_v45, 1  ;;  %v2952_v49 = vld [vmem:[#allocation4 + $0x20] ss:$2 sm:$0xff]  ;;  %v2968_v50 = vld [vmem:[#allocation4 + $0x21] ss:$2 sm:$0xff]  ;;  %2943 = vst [vmem:[#allocation4 + $0x58] sm:$0xff] %v2913_v36  ;;  %v2747_v52 = vadd.f32 %v2741_v47, %v2635_v5  ;;  %v2982_v20 = vmax.f32 %v2954_v45, %v2970_v35 }
 0x6a7   : >> { %v8884_v53 = vpop.f32.mrb[41].mxu1  ;;  %3034 = vst [vmem:[#allocation5] sm:$0xff] %v3026_v43  ;;  %v2981_v54 = vmax.f32 %v2952_v49, %v2968_v50  ;;  %v2998_v55 = vrot.slane %v2952_v49, 1  ;;  %2941 = vst [vmem:[#allocation4 + $0x48] sm:$0xff] %v2905_v46 }
 0x6a8   : >> { %v2744_v56 = vpop.f32.mrb[42].mxu1  ;;  %v2749_v58 = vadd.f32 %v2748_v42, %v2747_v52  ;;  %v9425_v53 = vld [vmem:[%s12006_s3 + $0x8] sm:$0xff]  }
 0x6a9   : >> { %v8885_v59 = vpop.f32.mrb[43].mxu1  ;;  %v2999_v60 = vsel %vm805_vm1, %v2996_v27, %v2998_v55  ;;  %v3001_v61 = vsel %vm805_vm1, %v2998_v55, %v3000_v48  ;;  %v8906_v62 = vpop.f32.mrb[32].mxu0 }
 0x6aa   : >> { %v10466_v0 = vmax.f32 %v2981_v54, %v3001_v61  ;;  %v2750_v2 = vmax.f32 %v2749_v58, 0.0  ;;  %v2926_v3 = vadd.f32 %v8906_v62, %v10440_v12  ;;  %v2917_v5 = vpop.f32.mrb[33].mxu0  ;;  %v10469_v6 = vmax.f32 %v2980_v57, %v2999_v60  ;;  %v9426_v54 = vld [vmem:[%s12006_s3 + $0x10] sm:$0xff]   ;;  %v9427_v61 = vld [vmem:[%s12006_s3 + $0x18] sm:$0xff]   ;;  %v9428_v62 = vld [vmem:[%s12006_s3 + $0x20] sm:$0xff]  }
 0x6ab   : >> { %v2918_v7 = vadd.f32 %v10440_v12, %v2917_v5  ;;  %v8907_v8 = vpop.f32.mrb[34].mxu0 }
 0x6ac   : >> { %v3028_v9 = vmax.f32 %v10466_v0, 0.0  ;;  %2752 = vst [vmem:[%s10473_s30] sm:$0x1] %v2750_v2  ;;  %2946 = vst [vmem:[#allocation4 + $0x70] sm:$0xff] %v2926_v3  ;;  %v2929_v10 = vadd.f32 %v8907_v8, %v10440_v12  ;;  %v2920_v11 = vpop.f32.mrb[35].mxu0  ;;  %v3027_v13 = vmax.f32 %v10469_v6, 0.0  ;;  %v9429_v2 = vld [vmem:[%s12006_s3 + $0x28] sm:$0xff]  }
 0x6ad   : >> { %v2958_v14 = vld [vmem:[#allocation4 + $0x50] ss:$2 sm:$0xff]  ;;  %2944 = vst [vmem:[#allocation4 + $0x60] sm:$0xff] %v2918_v7  ;;  %v2921_v15 = vadd.f32 %v10440_v12, %v2920_v11  ;;  %v2974_v24 = vld [vmem:[#allocation4 + $0x51] ss:$2 sm:$0xff]  ;;  %v9432_v3 = vld [vmem:[%s12006_s3 + $0x80] sm:$0xff]  }
 0x6ae   : >> { %3036 = vst [vmem:[#allocation5 + $0x10] sm:$0xff] %v3028_v9  ;;  %v3004_v63 = vrot.slane %v2958_v14, 1  ;;  %v2956_v4 = vld [vmem:[#allocation4 + $0x40] ss:$2 sm:$0xff]  ;;  %v2972_v16 = vld [vmem:[#allocation4 + $0x41] ss:$2 sm:$0xff]  ;;  %v2984_v39 = vmax.f32 %v2958_v14, %v2974_v24 }
 0x6af   : >> { %2947 = vst [vmem:[#allocation4 + $0x78] sm:$0x3f] %v2929_v10  ;;  %3035 = vst [vmem:[#allocation5 + $0x8] sm:$0xff] %v3027_v13  ;;  %v2983_v18 = vmax.f32 %v2956_v4, %v2972_v16  ;;  %v3002_v19 = vrot.slane %v2956_v4, 1  ;;  %v9433_v6 = vld [vmem:[%s12006_s3 + $0x88] sm:$0xff]   ;;  %v9434_v8 = vld [vmem:[%s12006_s3 + $0x90] sm:$0xff]  }
 0x6b0   : >> { %2945 = vst [vmem:[#allocation4 + $0x68] sm:$0xff] %v2921_v15  ;;  %v9436_v14 = vld [vmem:[%s12006_s3 + $0xa0] sm:$0xff]   ;;  %v9437_v15 = vld [vmem:[%s12006_s3 + $0xa8] sm:$0xff]   ;;  %v9439_v4 = vld [vmem:[%s12006_s3 + $0xb8] sm:$0xff]  }
 0x6b1   : >> { %v3003_v21 = vsel %vm805_vm1, %v3000_v48, %v3002_v19  ;;  %v3005_v17 = vsel %vm805_vm1, %v3002_v19, %v3004_v63 }
 0x6b2   : >> { %v10485_v22 = vmax.f32 %v2982_v20, %v3003_v21  ;;  %v10487_v12 = vmax.f32 %v2983_v18, %v3005_v17 }
 0x6b4   : >> { %v3029_v23 = vmax.f32 %v10485_v22, 0.0  ;;  %v3030_v25 = vmax.f32 %v10487_v12, 0.0 }
 0x6b6   : >> { %v2962_v26 = vld [vmem:[#allocation4 + $0x70] ss:$2 sm:$0x7f]  ;;  %v2978_v27 = vld [vmem:[#allocation4 + $0x71] ss:$2 sm:$0x3f]  ;;  %v3051_v5 = vpack.c.bf16 %v3029_v23, %v3028_v9 }
 0x6b7   : >> { %3037 = vst [vmem:[#allocation5 + $0x18] sm:$0xff] %v3029_v23  ;;  %3038 = vst [vmem:[#allocation5 + $0x20] sm:$0xff] %v3030_v25  ;;  %v2986_v28 = vmax.f32 %v2962_v26, %v2978_v27  ;;  %v3008_v29 = vrot.slane %v2962_v26, 1  ;;  %v2960_v30 = vld [vmem:[#allocation4 + $0x60] ss:$2 sm:$0xff]  ;;  %v9442_v26 = vld [vmem:[%s12008_s5 + $0x50] sm:$0xff]  }
 0x6b8   : >> { %v2976_v31 = vld [vmem:[#allocation4 + $0x61] ss:$2 sm:$0xff]  ;;  %v3006_v34 = vrot.slane %v2960_v30, 1  ;;  %v9443_v27 = vld [vmem:[%s12008_s5 + $0x58] sm:$0xff]  }
 0x6b9   : >> { %v3070_v32 = vld [vmem:[#allocation5 + $0x1] sm:$0xff]  ;;  %v2985_v33 = vmax.f32 %v2960_v30, %v2976_v31  ;;  %v3071_v37 = vld [vmem:[#allocation5 + $0x9] sm:$0xff]  ;;  %v3025_v40 = vmax.f32 %v2986_v28, %v3008_v29  ;;  %v9447_v31 = vld [vmem:[%s12008_s5 + $0x78] sm:$0xff]  }
 0x6ba   : >> { %v3078_v36 = vpack.c.bf16 %v3071_v37, %v3070_v32  ;;  %v3007_v41 = vsel %vm805_vm1, %v3004_v63, %v3006_v34  ;;  %v3009_v42 = vsel %vm805_vm1, %v3006_v34, %v3008_v29  ;;  %v3324_v10 = vld [vmem:[#allocation5 + $0x2] sm:$0xff]  ;;  %v3325_v11 = vld [vmem:[#allocation5 + $0xa] sm:$0xff]  ;;  %v7552_v34 = vld [vmem:[%s12007_s4] ss:$0 sm:$0xff] }
 0x6bb   : >> { %v3033_v44 = vmax.f32 %v3025_v40, 0.0  ;;  %v3024_v45 = vmax.f32 %v2985_v33, %v3009_v42  ;;  %v3023_v46 = vmax.f32 %v2984_v39, %v3007_v41  ;;  %v3332_v35 = vpack.c.bf16 %v3325_v11, %v3324_v10  ;;  %v9438_v63 = vld [vmem:[%s12006_s3 + $0xb0] sm:$0xff]   ;;  %v9440_v23 = vld [vmem:[%s12008_s5 + $0x40] sm:$0xff]   ;;  %v9445_v29 = vld [vmem:[%s12008_s5 + $0x68] sm:$0xff]  }
 0x6bc   : >> { %8924 = vmatprep.mubr.bf16.mxu0 %v3078_v36  ;;  %8980 = vmatprep.subr.bf16.mxu1 %v9440_v23  ;;  %v9444_v28 = vld [vmem:[%s12008_s5 + $0x60] sm:$0xff]   ;;  %v9446_v30 = vld [vmem:[%s12008_s5 + $0x70] sm:$0xff]  }
 0x6bd   : >> { %3041 = vst [vmem:[#allocation5 + $0x38] sm:$0x3f] %v3033_v44  ;;  %v3032_v47 = vmax.f32 %v3024_v45, 0.0  ;;  %v3031_v48 = vmax.f32 %v3023_v46, 0.0  ;;  %8981 = vmatpush3.bf16.msra.mxu1 %v9440_v23  ;;  %v10583_v32 = vld [vmem:[%s12008_s5] sm:$0xff]   ;;  %v9451_v23 = vld [vmem:[%s12008_s5 + $0x18] sm:$0xff]  }
 0x6be   : >> { %v3072_v49 = vld [vmem:[#allocation5 + $0x11] sm:$0xff]  ;;  %v3073_v50 = vld [vmem:[#allocation5 + $0x19] sm:$0xff] }
 0x6bf   : >> { %3040 = vst [vmem:[#allocation5 + $0x30] sm:$0xff] %v3032_v47  ;;  %v3079_v52 = vpack.c.bf16 %v3073_v50, %v3072_v49  ;;  %3039 = vst [vmem:[#allocation5 + $0x28] sm:$0xff] %v3031_v48  ;;  %v3052_v7 = vpack.c.bf16 %v3031_v48, %v3030_v25  ;;  %v3326_v16 = vld [vmem:[#allocation5 + $0x12] sm:$0xff]  ;;  %v3327_v18 = vld [vmem:[#allocation5 + $0x1a] sm:$0xff] }
 0x6c0   : >> { %v3333_v21 = vpack.c.bf16 %v3327_v18, %v3326_v16  ;;  %v9441_v25 = vld [vmem:[%s12008_s5 + $0x48] sm:$0xff]   ;;  %v9464_v33 = vld [vmem:[%s12010_s7 + $0x40] sm:$0xff]  }
 0x6c1   : >> { %8925 = vmatmul.mubr.bf16.vlgmr.msra.gmra.mrb[36].mxu0 %v3079_v52  ;;  %8982 = vmatprep.subr.bf16.mxu1 %v9441_v25 }
 0x6c2   : >> { %8933 = vmatpush3.bf16.msra.mxu0 %v10434_v1  ;;  %v3050_v1 = vpack.c.bf16 %v3027_v13, %v3026_v43  ;;  %v9431_v43 = vld [vmem:[%s12006_s3 + $0x38] sm:$0xff]   ;;  %8983 = vmatpush3.bf16.msra.mxu1 %v9441_v25  ;;  %v9452_v25 = vld [vmem:[%s12008_s5 + $0x20] sm:$0xff]  }
 0x6c3   : >> { %8934 = vmatprep.subr.bf16.mxu0 %v9425_v53  ;;  %v9435_v13 = vld [vmem:[%s12006_s3 + $0x98] sm:$0xff]   ;;  %8984 = vmatprep.subr.bf16.mxu1 %v9442_v26 }
 0x6c4   : >> { %v3077_v55 = vld [vmem:[#allocation5 + $0x39] sm:$0xf] }
 0x6c5   : >> { %v3049_v0 = vld [vmem:[#allocation5 + $0x38] sm:$0xf] }
 0x6c6   : >> { %8935 = vmatpush3.bf16.msra.mxu0 %v9425_v53  ;;  %v3074_v56 = vld [vmem:[#allocation5 + $0x21] sm:$0xff]  ;;  %v3075_v57 = vld [vmem:[#allocation5 + $0x29] sm:$0xff]  ;;  %v3076_v58 = vld [vmem:[#allocation5 + $0x31] sm:$0xff]  ;;  %v3053_v9 = vpack.c.bf16 %v3049_v0, %v3032_v47  ;;  %8985 = vmatpush3.bf16.msra.mxu1 %v9442_v26 }
 0x6c7   : >> { %8936 = vmatprep.subr.bf16.mxu0 %v9426_v54  ;;  %v3080_v59 = vpack.c.bf16 %v3075_v57, %v3074_v56  ;;  %v3081_v60 = vpack.c.bf16 %v3077_v55, %v3076_v58  ;;  %v3328_v19 = vld [vmem:[#allocation5 + $0x22] sm:$0xff]  ;;  %v3329_v20 = vld [vmem:[#allocation5 + $0x2a] sm:$0xff]  ;;  %v3330_v22 = vld [vmem:[#allocation5 + $0x32] sm:$0xff]  ;;  %8986 = vmatprep.subr.bf16.mxu1 %v9443_v27 }
 0x6c8   : >> { %v3334_v17 = vpack.c.bf16 %v3329_v20, %v3328_v19  ;;  %v3331_v12 = vld [vmem:[#allocation5 + $0x3a] sm:$0xf]  ;;  %v9453_v26 = vld [vmem:[%s12008_s5 + $0x28] sm:$0xff]  }
 0x6c9   : >> { %8928 = vmatprep.mubr.bf16.mxu0 %v3080_v59  ;;  %v3335_v24 = vpack.c.bf16 %v3331_v12, %v3330_v22  ;;  %v9449_v22 = vld [vmem:[%s12008_s5 + $0x8] sm:$0xff]  }
 0x6ca   : >> { %8937 = vmatpush3.bf16.msra.mxu0 %v9426_v54  ;;  %8987 = vmatpush3.bf16.msra.mxu1 %v9443_v27  ;;  %v9454_v27 = vld [vmem:[%s12008_s5 + $0x30] sm:$0xff]  }
 0x6cb   : >> { %8929 = vmatmul.mubr.bf16.gmra.mrb[40].mxu0 %v3081_v60  ;;  %8938 = vmatprep.subr.bf16.mxu0 %v9427_v61 }
 0x6cc   : >> { %8948 = vmatprep.mubr.bf16.mxu0 %v3050_v1  ;;  %8988 = vmatprep.subr.bf16.mxu1 %v9444_v28 }
 0x6ce   : >> { %8939 = vmatpush3.bf16.msra.mxu0 %v9427_v61  ;;  %8989 = vmatpush3.bf16.msra.mxu1 %v9444_v28  ;;  %v9455_v28 = vld [vmem:[%s12008_s5 + $0x38] sm:$0xff]  }
 0x6cf   : >> { %8940 = vmatprep.subr.bf16.mxu0 %v9428_v62  ;;  %8990 = vmatprep.subr.bf16.mxu1 %v9445_v29 }
 0x6d2   : >> { %8941 = vmatpush3.bf16.msra.mxu0 %v9428_v62  ;;  %8991 = vmatpush3.bf16.msra.mxu1 %v9445_v29  ;;  %v9456_v29 = vld [vmem:[%s12008_s5 + $0x80] sm:$0xff]  }
 0x6d3   : >> { %8942 = vmatprep.subr.bf16.mxu0 %v9429_v2  ;;  %8992 = vmatprep.subr.bf16.mxu1 %v9446_v30 }
 0x6d6   : >> { %8943 = vmatpush3.bf16.msra.mxu0 %v9429_v2  ;;  %8993 = vmatpush3.bf16.msra.mxu1 %v9446_v30 }
 0x6d7   : >> { %8944 = vmatprep.subr.bf16.mxu0 %v9430_v38  ;;  %8994 = vmatprep.subr.bf16.mxu1 %v9447_v31 }
 0x6da   : >> { %8945 = vmatpush3.bf16.msra.mxu0 %v9430_v38  ;;  %8995 = vmatpush3.bf16.msra.mxu1 %v9447_v31 }
 0x6db   : >> { %8946 = vmatprep.subr.bf16.mxu0 %v9431_v43  ;;  %9000 = vmatprep.subr.bf16.mxu1 %v10583_v32 }
 0x6de   : >> { %8947 = vmatpush3.bf16.msra.mxu0 %v9431_v43 }
 0x6df   : >> { %8956 = vmatprep.subr.bf16.mxu0 %v9432_v3 }
 0x6e1   : >> { %8949 = vmatmul.mubr.bf16.vlgmr.msra.gmra.mrb[36].mxu0 %v3051_v5 }
 0x6e2   : >> { %8952 = vmatprep.mubr.bf16.mxu0 %v3052_v7  ;;  %8957 = vmatpush3.bf16.msra.mxu0 %v9432_v3 }
 0x6e3   : >> { %8958 = vmatprep.subr.bf16.mxu0 %v9433_v6 }
 0x6e6   : >> { %8959 = vmatpush3.bf16.msra.mxu0 %v9433_v6 }
 0x6e7   : >> { %8960 = vmatprep.subr.bf16.mxu0 %v9434_v8 }
 0x6e9   : >> { %8953 = vmatmul.mubr.bf16.gmra.mrb[40].mxu0 %v3053_v9 }
 0x6ea   : >> { %8961 = vmatpush3.bf16.msra.mxu0 %v9434_v8  ;;  %8972 = vmatprep.mubr.bf16.mxu0 %v3332_v35 }
 0x6eb   : >> { %8962 = vmatprep.subr.bf16.mxu0 %v9435_v13 }
 0x6ee   : >> { %8963 = vmatpush3.bf16.msra.mxu0 %v9435_v13 }
 0x6ef   : >> { %8964 = vmatprep.subr.bf16.mxu0 %v9436_v14 }
 0x6f2   : >> { %8965 = vmatpush3.bf16.msra.mxu0 %v9436_v14 }
 0x6f3   : >> { %8966 = vmatprep.subr.bf16.mxu0 %v9437_v15 }
 0x6f6   : >> { %8967 = vmatpush3.bf16.msra.mxu0 %v9437_v15 }
 0x6f7   : >> { %8968 = vmatprep.subr.bf16.mxu0 %v9438_v63 }
 0x6fa   : >> { %8969 = vmatpush3.bf16.msra.mxu0 %v9438_v63 }
 0x6fb   : >> { %8970 = vmatprep.subr.bf16.mxu0 %v9439_v4 }
 0x6fe   : >> { %8971 = vmatpush3.bf16.msra.mxu0 %v9439_v4 }
 0x6ff   : >> { %9040 = vmatprep.subr.bf16.mxu0 %v9681_v51 }
 0x701   : >> { %8973 = vmatmul.mubr.bf16.vlgmr.msra.gmra.mrb[36].mxu0 %v3333_v21 }
 0x702   : >> { %8976 = vmatprep.mubr.bf16.mxu0 %v3334_v17  ;;  %9041 = vmatpush3.bf16.msra.mxu0 %v9464_v33 }
 0x703   : >> { %9042 = vmatprep.subr.bf16.mxu0 %v9681_v51 }
 0x709   : >> { %8977 = vmatmul.mubr.bf16.gmra.mrb[40].mxu0 %v3335_v24  ;;  %v9450_v24 = vld [vmem:[%s12008_s5 + $0x10] sm:$0xff]  }
 0x70a   : >> { %9056 = vmatprep.mubr.msk.bf16.mxu0 %vm9682_vm2, %v9681_v51 }
 0x7d4   : >> { %v8974_v37 = vpop.f32.mrb[36].mxu0 }
 0x7d5   : >> { %v3482_v39 = vadd.f32 %v8974_v37, %v7552_v34  ;;  %v3434_v40 = vpop.f32.mrb[37].mxu0 }
 0x7d6   : >> { %v3480_v36 = vadd.f32 %v7552_v34, %v3434_v40  ;;  %v8975_v41 = vpop.f32.mrb[38].mxu0  ;;  %v9459_v40 = vld [vmem:[%s12008_s5 + $0x98] sm:$0xff]  }
 0x7d7   : >> { %3490 = vst [vmem:[#allocation4 + $0x10] sm:$0xff] %v3482_v39  ;;  %v3483_v42 = vadd.f32 %v8975_v41, %v7552_v34  ;;  %v3437_v44 = vpop.f32.mrb[39].mxu0  ;;  %v9458_v39 = vld [vmem:[%s12008_s5 + $0x90] sm:$0xff]   ;;  %v9461_v41 = vld [vmem:[%s12008_s5 + $0xa8] sm:$0xff]  }
 0x7d8   : >> { %3488 = vst [vmem:[#allocation4] sm:$0xff] %v3480_v36  ;;  %v3481_v45 = vadd.f32 %v7552_v34, %v3437_v44  ;;  %v9460_v36 = vld [vmem:[%s12008_s5 + $0xa0] sm:$0xff]   ;;  %v9463_v44 = vld [vmem:[%s12008_s5 + $0xb8] sm:$0xff]  }
 0x7d9   : >> { %3491 = vst [vmem:[#allocation4 + $0x18] sm:$0xff] %v3483_v42  ;;  %v9462_v42 = vld [vmem:[%s12008_s5 + $0xb0] sm:$0xff]  }
 0x7da   : >> { %3489 = vst [vmem:[#allocation4 + $0x8] sm:$0xff] %v3481_v45 }
 0x7dc   : >> { %v8978_v46 = vpop.f32.mrb[40].mxu0 }
 0x7dd   : >> { %v3486_v47 = vadd.f32 %v8978_v46, %v7552_v34  ;;  %v3450_v48 = vpop.f32.mrb[41].mxu0 }
 0x7de   : >> { %v3484_v49 = vadd.f32 %v7552_v34, %v3450_v48  ;;  %v8979_v50 = vpop.f32.mrb[42].mxu0  ;;  %v9465_v48 = vld [vmem:[%s12010_s7] sm:$0xff]  }
 0x7df   : >> { %3494 = vst [vmem:[#allocation4 + $0x30] sm:$0xff] %v3486_v47  ;;  %v3487_v52 = vadd.f32 %v8979_v50, %v7552_v34  ;;  %v3453_v53 = vpop.f32.mrb[43].mxu0  ;;  %v9466_v50 = vld [vmem:[%s12010_s7 + $0x48] sm:$0xff]  }
 0x7e0   : >> { %v3498_v54 = vld [vmem:[#allocation4 + $0x10] ss:$2 sm:$0xff]  ;;  %3492 = vst [vmem:[#allocation4 + $0x20] sm:$0xff] %v3484_v49  ;;  %v3485_v55 = vadd.f32 %v7552_v34, %v3453_v53  ;;  %v3504_v62 = vld [vmem:[#allocation4 + $0x11] ss:$2 sm:$0xff]  ;;  %v9457_v34 = vld [vmem:[%s12008_s5 + $0x88] sm:$0xff]   ;;  %9043 = vmatpush3.bf16.msra.mxu0 %v9466_v50 }
 0x7e1   : >> { %v3516_v56 = vrot.slane %v3498_v54, 1  ;;  %v3496_v57 = vld [vmem:[#allocation4] ss:$2 sm:$0xff]  ;;  %v3503_v58 = vld [vmem:[#allocation4 + $0x1] ss:$2 sm:$0xff]  ;;  %v3508_v10 = vmax.f32 %v3498_v54, %v3504_v62  ;;  %9044 = vmatprep.subr.bf16.mxu0 %v9681_v51  ;;  %v9468_v53 = vld [vmem:[%s12010_s7 + $0x50] sm:$0xff]  }
 0x7e2   : >> { %3495 = vst [vmem:[#allocation4 + $0x38] sm:$0xf] %v3487_v52  ;;  %v3507_v59 = vmax.f32 %v3496_v57, %v3503_v58  ;;  %v3515_v60 = vrot.slane %v3496_v57, 1  ;;  %3493 = vst [vmem:[#allocation4 + $0x28] sm:$0xff] %v3485_v55  ;;  %v9467_v49 = vld [vmem:[%s12010_s7 + $0x8] sm:$0xff]   ;;  %v9469_v52 = vld [vmem:[%s12010_s7 + $0x10] sm:$0xff]  }
 0x7e3   : >> { %v9471_v54 = vld [vmem:[%s12010_s7 + $0x18] sm:$0xff]   ;;  %v9472_v57 = vld [vmem:[%s12010_s7 + $0x60] sm:$0xff]   ;;  %v9475_v58 = vld [vmem:[%s12010_s7 + $0x28] sm:$0xff]  }
 0x7e4   : >> { %v3517_v61 = vsel %vm805_vm1, %v3515_v60, %v3516_v56  ;;  %9045 = vmatpush3.bf16.msra.mxu0 %v9468_v53  ;;  %v9470_v55 = vld [vmem:[%s12010_s7 + $0x58] sm:$0xff]   ;;  %v9477_v60 = vld [vmem:[%s12010_s7 + $0x30] sm:$0xff]  }
 0x7e5   : >> { %v3526_v1 = vmax.f32 %v3507_v59, %v3517_v61  ;;  %9046 = vmatprep.subr.bf16.mxu0 %v9681_v51  ;;  %v9474_v59 = vld [vmem:[%s12010_s7 + $0x68] sm:$0xff]   ;;  %v9476_v61 = vld [vmem:[%s12010_s7 + $0x70] sm:$0xff]   ;;  %v9478_v62 = vld [vmem:[%s12010_s7 + $0x78] sm:$0xff]  }
 0x7e6   : >> { %v9500_v50 = vld [vmem:[%s12012_s9 + $0x70] sm:$0xff]   ;;  %v9502_v53 = vld [vmem:[%s12012_s9 + $0x78] sm:$0xff]  }
 0x7e7   : >> { %v3530_v2 = vmax.f32 %v3526_v1, 0.0  ;;  %v9479_v1 = vld [vmem:[%s12010_s7 + $0x38] sm:$0xff]  }
 0x7e8   : >> { %9047 = vmatpush3.bf16.msra.mxu0 %v9470_v55 }
 0x7e9   : >> { %v3502_v38 = vld [vmem:[#allocation4 + $0x30] ss:$2 sm:$0x3f]  ;;  %v3506_v43 = vld [vmem:[#allocation4 + $0x31] ss:$2 sm:$0x1f]  ;;  %9048 = vmatprep.subr.bf16.mxu0 %v9681_v51 }
 0x7ea   : >> { %3534 = vst [vmem:[#allocation5] sm:$0xff] %v3530_v2  ;;  %v3510_v3 = vmax.f32 %v3502_v38, %v3506_v43  ;;  %v3520_v5 = vrot.slane %v3502_v38, 1  ;;  %v3500_v6 = vld [vmem:[#allocation4 + $0x20] ss:$2 sm:$0xff]  ;;  %v3505_v7 = vld [vmem:[#allocation4 + $0x21] ss:$2 sm:$0xff] }
 0x7eb   : >> { %v3509_v8 = vmax.f32 %v3500_v6, %v3505_v7  ;;  %v3518_v0 = vrot.slane %v3500_v6, 1 }
 0x7ec   : >> { %v3529_v11 = vmax.f32 %v3510_v3, %v3520_v5  ;;  %9049 = vmatpush3.bf16.msra.mxu0 %v9472_v57 }
 0x7ed   : >> { %v3519_v9 = vsel %vm805_vm1, %v3516_v56, %v3518_v0  ;;  %v3521_v13 = vsel %vm805_vm1, %v3518_v0, %v3520_v5  ;;  %v9473_v56 = vld [vmem:[%s12010_s7 + $0x20] sm:$0xff]   ;;  %9050 = vmatprep.subr.bf16.mxu0 %v9681_v51 }
 0x7ee   : >> { %v3533_v35 = vmax.f32 %v3529_v11, 0.0  ;;  %v3527_v14 = vmax.f32 %v3508_v10, %v3519_v9  ;;  %v3528_v15 = vmax.f32 %v3509_v8, %v3521_v13 }
 0x7f0   : >> { %3537 = vst [vmem:[#allocation5 + $0x18] sm:$0x1f] %v3533_v35  ;;  %v3531_v63 = vmax.f32 %v3527_v14, 0.0  ;;  %v3532_v4 = vmax.f32 %v3528_v15, 0.0  ;;  %9051 = vmatpush3.bf16.msra.mxu0 %v9474_v59 }
 0x7f1   : >> { %9052 = vmatprep.subr.bf16.mxu0 %v9681_v51 }
 0x7f2   : >> { %3535 = vst [vmem:[#allocation5 + $0x8] sm:$0xff] %v3531_v63  ;;  %3536 = vst [vmem:[#allocation5 + $0x10] sm:$0xff] %v3532_v4  ;;  %v3542_v12 = vpack.c.bf16 %v3531_v63, %v3530_v2  ;;  %v7609_v2 = vld [vmem:[%s12009_s6] ss:$0 sm:$0xff] }
 0x7f4   : >> { %9053 = vmatpush3.bf16.msra.mxu0 %v9476_v61 }
 0x7f5   : >> { %9054 = vmatprep.subr.bf16.mxu0 %v9681_v51 }
 0x7f7   : >> { %v3563_v16 = vld [vmem:[#allocation5 + $0x19] sm:$0x7] }
 0x7f8   : >> { %v3541_v30 = vld [vmem:[#allocation5 + $0x18] sm:$0x7]  ;;  %9055 = vmatpush3.bf16.msra.mxu0 %v9478_v62 }
 0x7f9   : >> { %v3560_v18 = vld [vmem:[#allocation5 + $0x1] sm:$0xff]  ;;  %v3561_v19 = vld [vmem:[#allocation5 + $0x9] sm:$0xff]  ;;  %v3562_v20 = vld [vmem:[#allocation5 + $0x11] sm:$0xff]  ;;  %v3543_v33 = vpack.c.bf16 %v3541_v30, %v3532_v4  ;;  %9080 = vmatprep.subr.bf16.mxu0 %v9681_v51 }
 0x7fa   : >> { %v3564_v21 = vpack.c.bf16 %v3561_v19, %v3560_v18  ;;  %v3565_v17 = vpack.c.bf16 %v3563_v16, %v3562_v20  ;;  %v3776_v31 = vld [vmem:[#allocation5 + $0x2] sm:$0xff]  ;;  %v3778_v45 = vld [vmem:[#allocation5 + $0x12] sm:$0xff]  ;;  %v3779_v46 = vld [vmem:[#allocation5 + $0x1a] sm:$0x7] }
 0x7fb   : >> { %v3781_v47 = vpack.c.bf16 %v3779_v46, %v3778_v45  ;;  %v9486_v30 = vld [vmem:[%s12010_s7 + $0xb0] sm:$0xff]   ;;  %v9495_v45 = vld [vmem:[%s12012_s9 + $0x18] sm:$0xff]   ;;  %v9496_v46 = vld [vmem:[%s12012_s9 + $0x60] sm:$0xff]  }
 0x7fc   : >> { %8996 = vmatprep.mubr.bf16.mxu1 %v3564_v21 }
 0x7fd   : >> { %8997 = vmatmul.mubr.bf16.vlgmr.msra.gmra.mrb[44].mxu1 %v3565_v17 }
 0x7fe   : >> { %9001 = vmatpush3.bf16.msra.mxu1 %v10583_v32  ;;  %9016 = vmatprep.mubr.bf16.mxu1 %v3542_v12  ;;  %v3777_v32 = vld [vmem:[#allocation5 + $0xa] sm:$0xff] }
 0x7ff   : >> { %9002 = vmatprep.subr.bf16.mxu1 %v9449_v22  ;;  %v3780_v37 = vpack.c.bf16 %v3777_v32, %v3776_v31  ;;  %v9487_v31 = vld [vmem:[%s12010_s7 + $0xb8] sm:$0xff]  }
 0x802   : >> { %9003 = vmatpush3.bf16.msra.mxu1 %v9449_v22 }
 0x803   : >> { %9004 = vmatprep.subr.bf16.mxu1 %v9450_v24 }
 0x806   : >> { %9005 = vmatpush3.bf16.msra.mxu1 %v9450_v24  ;;  %v9480_v24 = vld [vmem:[%s12010_s7 + $0x80] sm:$0xff]  }
 0x807   : >> { %9006 = vmatprep.subr.bf16.mxu1 %v9451_v23 }
 0x80a   : >> { %9007 = vmatpush3.bf16.msra.mxu1 %v9451_v23 }
 0x80b   : >> { %9008 = vmatprep.subr.bf16.mxu1 %v9452_v25 }
 0x80e   : >> { %9009 = vmatpush3.bf16.msra.mxu1 %v9452_v25  ;;  %v9481_v25 = vld [vmem:[%s12010_s7 + $0x88] sm:$0xff]  }
 0x80f   : >> { %9010 = vmatprep.subr.bf16.mxu1 %v9453_v26 }
 0x812   : >> { %9011 = vmatpush3.bf16.msra.mxu1 %v9453_v26  ;;  %v9482_v26 = vld [vmem:[%s12010_s7 + $0x90] sm:$0xff]  }
 0x813   : >> { %9012 = vmatprep.subr.bf16.mxu1 %v9454_v27 }
 0x816   : >> { %9013 = vmatpush3.bf16.msra.mxu1 %v9454_v27  ;;  %v9483_v27 = vld [vmem:[%s12010_s7 + $0x98] sm:$0xff]  }
 0x817   : >> { %9014 = vmatprep.subr.bf16.mxu1 %v9455_v28 }
 0x81a   : >> { %9015 = vmatpush3.bf16.msra.mxu1 %v9455_v28  ;;  %v9484_v28 = vld [vmem:[%s12010_s7 + $0xa0] sm:$0xff]  }
 0x81b   : >> { %9020 = vmatprep.subr.bf16.mxu1 %v9456_v29 }
 0x81d   : >> { %9017 = vmatmul.mubr.bf16.vlgmr.msra.gmra.mrb[44].mxu1 %v3543_v33 }
 0x81e   : >> { %9021 = vmatpush3.bf16.msra.mxu1 %v9456_v29  ;;  %9036 = vmatprep.mubr.bf16.mxu1 %v3780_v37  ;;  %v9485_v29 = vld [vmem:[%s12010_s7 + $0xa8] sm:$0xff]   ;;  %v9488_v37 = vld [vmem:[%s12012_s9 + $0x40] sm:$0xff]  }
 0x81f   : >> { %9022 = vmatprep.subr.bf16.mxu1 %v9457_v34 }
 0x822   : >> { %9023 = vmatpush3.bf16.msra.mxu1 %v9457_v34 }
 0x823   : >> { %9024 = vmatprep.subr.bf16.mxu1 %v9458_v39 }
 0x826   : >> { %9025 = vmatpush3.bf16.msra.mxu1 %v9458_v39  ;;  %v9489_v39 = vld [vmem:[%s12012_s9] sm:$0xff]  }
 0x827   : >> { %9026 = vmatprep.subr.bf16.mxu1 %v9459_v40 }
 0x82a   : >> { %9027 = vmatpush3.bf16.msra.mxu1 %v9459_v40  ;;  %v9490_v40 = vld [vmem:[%s12012_s9 + $0x48] sm:$0xff]  }
 0x82b   : >> { %9028 = vmatprep.subr.bf16.mxu1 %v9460_v36 }
 0x82e   : >> { %9029 = vmatpush3.bf16.msra.mxu1 %v9460_v36  ;;  %v9491_v36 = vld [vmem:[%s12012_s9 + $0x8] sm:$0xff]  }
 0x82f   : >> { %9030 = vmatprep.subr.bf16.mxu1 %v9461_v41 }
 0x832   : >> { %9031 = vmatpush3.bf16.msra.mxu1 %v9461_v41  ;;  %v9492_v41 = vld [vmem:[%s12012_s9 + $0x50] sm:$0xff]  }
 0x833   : >> { %9032 = vmatprep.subr.bf16.mxu1 %v9462_v42 }
 0x836   : >> { %9033 = vmatpush3.bf16.msra.mxu1 %v9462_v42  ;;  %v9493_v42 = vld [vmem:[%s12012_s9 + $0x10] sm:$0xff]  }
 0x837   : >> { %9034 = vmatprep.subr.bf16.mxu1 %v9463_v44 }
 0x83a   : >> { %9035 = vmatpush3.bf16.msra.mxu1 %v9463_v44  ;;  %v9494_v44 = vld [vmem:[%s12012_s9 + $0x58] sm:$0xff]  }
 0x83b   : >> { %9060 = vmatprep.subr.bf16.mxu1 %v9681_v51 }
 0x83d   : >> { %9037 = vmatmul.mubr.bf16.vlgmr.msra.gmra.mrb[44].mxu1 %v3781_v47  ;;  %v9497_v47 = vld [vmem:[%s12012_s9 + $0x20] sm:$0xff]  }
 0x83e   : >> { %9076 = vmatprep.mubr.msk.bf16.mxu1 %vm9682_vm2, %v9681_v51  ;;  %9061 = vmatpush3.bf16.msra.mxu1 %v9465_v48  ;;  %v9498_v48 = vld [vmem:[%s12012_s9 + $0x68] sm:$0xff]  }
 0x83f   : >> { %9062 = vmatprep.subr.bf16.mxu1 %v9681_v51 }
 0x842   : >> { %9063 = vmatpush3.bf16.msra.mxu1 %v9467_v49  ;;  %v9499_v49 = vld [vmem:[%s12012_s9 + $0x28] sm:$0xff]  }
 0x843   : >> { %9064 = vmatprep.subr.bf16.mxu1 %v9681_v51 }
 0x846   : >> { %9065 = vmatpush3.bf16.msra.mxu1 %v9469_v52  ;;  %v9501_v52 = vld [vmem:[%s12012_s9 + $0x30] sm:$0xff]  }
 0x847   : >> { %9066 = vmatprep.subr.bf16.mxu1 %v9681_v51 }
 0x84a   : >> { %9067 = vmatpush3.bf16.msra.mxu1 %v9471_v54  ;;  %v9503_v54 = vld [vmem:[%s12012_s9 + $0x38] sm:$0xff]  }
 0x84b   : >> { %9068 = vmatprep.subr.bf16.mxu1 %v9681_v51 }
 0x84e   : >> { %9069 = vmatpush3.bf16.msra.mxu1 %v9473_v56 }
 0x84f   : >> { %9070 = vmatprep.subr.bf16.mxu1 %v9681_v51 }
 0x852   : >> { %9071 = vmatpush3.bf16.msra.mxu1 %v9475_v58 }
 0x853   : >> { %9072 = vmatprep.subr.bf16.mxu1 %v9681_v51 }
 0x856   : >> { %9073 = vmatpush3.bf16.msra.mxu1 %v9477_v60 }
 0x857   : >> { %9074 = vmatprep.subr.bf16.mxu1 %v9681_v51 }
 0x85a   : >> { %9075 = vmatpush3.bf16.msra.mxu1 %v9479_v1 }
 0x85b   : >> { %9100 = vmatprep.subr.bf16.mxu1 %v9681_v51 }
 0x910   : >> { %v9038_v38 = vpop.f32.mrb[44].mxu1 }
 0x911   : >> { %v3908_v43 = vadd.f32 %v9038_v38, %v7609_v2  ;;  %v3880_v3 = vpop.f32.mrb[45].mxu1 }
 0x912   : >> { %v3906_v5 = vadd.f32 %v7609_v2, %v3880_v3  ;;  %v9039_v6 = vpop.f32.mrb[46].mxu1 }
 0x913   : >> { %3912 = vst [vmem:[#allocation4 + $0x10] sm:$0xff] %v3908_v43  ;;  %v3909_v7 = vadd.f32 %v9039_v6, %v7609_v2  ;;  %v3883_v8 = vpop.f32.mrb[47].mxu1  ;;  %v7666_v43 = vld [vmem:[%s12011_s8] ss:$0 sm:$0xff] }
 0x914   : >> { %3910 = vst [vmem:[#allocation4] sm:$0xff] %v3906_v5  ;;  %v3907_v0 = vadd.f32 %v7609_v2, %v3883_v8 }
 0x915   : >> { %3913 = vst [vmem:[#allocation4 + $0x18] sm:$0x7] %v3909_v7 }
 0x916   : >> { %3911 = vst [vmem:[#allocation4 + $0x8] sm:$0xff] %v3907_v0 }
 0x91c   : >> { %v3915_v10 = vld [vmem:[#allocation4 + $0x10] ss:$2 sm:$0x3f]  ;;  %v3917_v11 = vld [vmem:[#allocation4 + $0x11] ss:$2 sm:$0x1f] }
 0x91d   : >> { %v3919_v9 = vmax.f32 %v3915_v10, %v3917_v11  ;;  %v3923_v13 = vrot.slane %v3915_v10, 1  ;;  %v3914_v35 = vld [vmem:[#allocation4] ss:$2 sm:$0xff]  ;;  %v3916_v14 = vld [vmem:[#allocation4 + $0x1] ss:$2 sm:$0xff] }
 0x91e   : >> { %v3918_v15 = vmax.f32 %v3914_v35, %v3916_v14  ;;  %v3922_v63 = vrot.slane %v3914_v35, 1 }
 0x91f   : >> { %v3928_v4 = vmax.f32 %v3919_v9, %v3923_v13 }
 0x920   : >> { %v3924_v16 = vsel %vm805_vm1, %v3922_v63, %v3923_v13 }
 0x921   : >> { %v3930_v18 = vmax.f32 %v3928_v4, 0.0  ;;  %v3927_v19 = vmax.f32 %v3918_v15, %v3924_v16  ;;  %v9504_v16 = vld [vmem:[%s12012_s9 + $0x80] sm:$0xff]  }
 0x923   : >> { %3932 = vst [vmem:[#allocation5 + $0x8] sm:$0x1f] %v3930_v18  ;;  %v3929_v20 = vmax.f32 %v3927_v19, 0.0 }
 0x925   : >> { %3931 = vst [vmem:[#allocation5] sm:$0xff] %v3929_v20 }
 0x92a   : >> { %v3934_v21 = vld [vmem:[#allocation5 + $0x8] sm:$0x7] }
 0x92b   : >> { %v3935_v17 = vpack.c.bf16 %v3934_v21, %v3929_v20  ;;  %v3953_v12 = vld [vmem:[#allocation5 + $0x9] sm:$0x7]  ;;  %v9506_v21 = vld [vmem:[%s12012_s9 + $0x90] sm:$0xff]  }
 0x92c   : >> { %v3952_v22 = vld [vmem:[#allocation5 + $0x1] sm:$0xff]  ;;  %v4150_v33 = vld [vmem:[#allocation5 + $0xa] sm:$0x7] }
 0x92d   : >> { %v3954_v23 = vpack.c.bf16 %v3953_v12, %v3952_v22  ;;  %9077 = vmatmul.mubr.bf16.vlgmr.msra.gmra.mrb[48].mxu1 %v3935_v17  ;;  %v4149_v32 = vld [vmem:[#allocation5 + $0x2] sm:$0xff]  ;;  %v9507_v17 = vld [vmem:[%s12012_s9 + $0x98] sm:$0xff]  }
 0x92e   : >> { %9116 = vmatprep.mubr.msk.bf16.mxu1 %vm9682_vm2, %v9681_v51  ;;  %v4151_v34 = vpack.c.bf16 %v4150_v33, %v4149_v32  ;;  %9101 = vmatpush3.bf16.msra.mxu1 %v9488_v37  ;;  %v9505_v20 = vld [vmem:[%s12012_s9 + $0x88] sm:$0xff]   ;;  %v9508_v22 = vld [vmem:[%s12012_s9 + $0xa0] sm:$0xff]   ;;  %v9517_v32 = vld [vmem:[%s12014_s11 + $0x10] sm:$0xff]  }
 0x92f   : >> { %9057 = vmatmul.mubr.bf16.vlgmr.msra.gmra.mrb[44].mxu0 %v3954_v23  ;;  %9102 = vmatprep.subr.bf16.mxu1 %v9681_v51  ;;  %v9509_v12 = vld [vmem:[%s12012_s9 + $0xa8] sm:$0xff]   ;;  %v9511_v23 = vld [vmem:[%s12012_s9 + $0xb8] sm:$0xff]   ;;  %v9520_v37 = vld [vmem:[%s12014_s11 + $0x60] sm:$0xff]  }
 0x930   : >> { %9081 = vmatpush3.bf16.msra.mxu0 %v9480_v24  ;;  %9096 = vmatprep.mubr.msk.bf16.mxu0 %vm9682_vm2, %v9681_v51  ;;  %v9510_v24 = vld [vmem:[%s12012_s9 + $0xb0] sm:$0xff]   ;;  %v9518_v33 = vld [vmem:[%s12014_s11 + $0x58] sm:$0xff]  }
 0x931   : >> { %9082 = vmatprep.subr.bf16.mxu0 %v9681_v51 }
 0x932   : >> { %9103 = vmatpush3.bf16.msra.mxu1 %v9490_v40  ;;  %v9522_v40 = vld [vmem:[%s12014_s11 + $0x68] sm:$0xff]  }
 0x933   : >> { %9104 = vmatprep.subr.bf16.mxu1 %v9681_v51 }
 0x934   : >> { %9083 = vmatpush3.bf16.msra.mxu0 %v9481_v25 }
 0x935   : >> { %9084 = vmatprep.subr.bf16.mxu0 %v9681_v51 }
 0x936   : >> { %9105 = vmatpush3.bf16.msra.mxu1 %v9492_v41  ;;  %v9524_v41 = vld [vmem:[%s12014_s11 + $0x70] sm:$0xff]  }
 0x937   : >> { %9106 = vmatprep.subr.bf16.mxu1 %v9681_v51 }
 0x938   : >> { %9085 = vmatpush3.bf16.msra.mxu0 %v9482_v26 }
 0x939   : >> { %9086 = vmatprep.subr.bf16.mxu0 %v9681_v51 }
 0x93a   : >> { %9107 = vmatpush3.bf16.msra.mxu1 %v9494_v44  ;;  %v9526_v44 = vld [vmem:[%s12014_s11 + $0x78] sm:$0xff]  }
 0x93b   : >> { %9108 = vmatprep.subr.bf16.mxu1 %v9681_v51 }
 0x93c   : >> { %9087 = vmatpush3.bf16.msra.mxu0 %v9483_v27  ;;  %v9512_v27 = vld [vmem:[%s12014_s11 + $0x40] sm:$0xff]  }
 0x93d   : >> { %9088 = vmatprep.subr.bf16.mxu0 %v9681_v51 }
 0x93e   : >> { %9109 = vmatpush3.bf16.msra.mxu1 %v9496_v46 }
 0x93f   : >> { %9110 = vmatprep.subr.bf16.mxu1 %v9681_v51 }
 0x940   : >> { %9089 = vmatpush3.bf16.msra.mxu0 %v9484_v28  ;;  %v9513_v28 = vld [vmem:[%s12014_s11] sm:$0xff]  }
 0x941   : >> { %9090 = vmatprep.subr.bf16.mxu0 %v9681_v51 }
 0x942   : >> { %9111 = vmatpush3.bf16.msra.mxu1 %v9498_v48 }
 0x943   : >> { %9112 = vmatprep.subr.bf16.mxu1 %v9681_v51 }
 0x944   : >> { %9091 = vmatpush3.bf16.msra.mxu0 %v9485_v29  ;;  %v9514_v29 = vld [vmem:[%s12014_s11 + $0x48] sm:$0xff]  }
 0x945   : >> { %9092 = vmatprep.subr.bf16.mxu0 %v9681_v51 }
 0x946   : >> { %9113 = vmatpush3.bf16.msra.mxu1 %v9500_v50 }
 0x947   : >> { %9114 = vmatprep.subr.bf16.mxu1 %v9681_v51 }
 0x948   : >> { %9093 = vmatpush3.bf16.msra.mxu0 %v9486_v30  ;;  %v9515_v30 = vld [vmem:[%s12014_s11 + $0x8] sm:$0xff]  }
 0x949   : >> { %9094 = vmatprep.subr.bf16.mxu0 %v9681_v51 }
 0x94a   : >> { %9115 = vmatpush3.bf16.msra.mxu1 %v9502_v53 }
 0x94b   : >> { %9140 = vmatprep.subr.bf16.mxu1 %v9681_v51 }
 0x94c   : >> { %9095 = vmatpush3.bf16.msra.mxu0 %v9487_v31  ;;  %v9516_v31 = vld [vmem:[%s12014_s11 + $0x50] sm:$0xff]  }
 0x94d   : >> { %9120 = vmatprep.subr.bf16.mxu0 %v9681_v51 }
 0x94f   : >> { %9097 = vmatmul.mubr.bf16.vlgmr.msra.gmra.mrb[48].mxu0 %v4151_v34  ;;  %v9519_v34 = vld [vmem:[%s12014_s11 + $0x18] sm:$0xff]  }
 0x950   : >> { %9136 = vmatprep.mubr.msk.bf16.mxu0 %vm9682_vm2, %v9681_v51  ;;  %9121 = vmatpush3.bf16.msra.mxu0 %v9489_v39  ;;  %v9521_v39 = vld [vmem:[%s12014_s11 + $0x20] sm:$0xff]  }
 0x951   : >> { %9122 = vmatprep.subr.bf16.mxu0 %v9681_v51 }
 0x954   : >> { %9123 = vmatpush3.bf16.msra.mxu0 %v9491_v36  ;;  %v9523_v36 = vld [vmem:[%s12014_s11 + $0x28] sm:$0xff]  }
 0x955   : >> { %9124 = vmatprep.subr.bf16.mxu0 %v9681_v51 }
 0x958   : >> { %9125 = vmatpush3.bf16.msra.mxu0 %v9493_v42  ;;  %v9525_v42 = vld [vmem:[%s12014_s11 + $0x30] sm:$0xff]  }
 0x959   : >> { %9126 = vmatprep.subr.bf16.mxu0 %v9681_v51 }
 0x95c   : >> { %9127 = vmatpush3.bf16.msra.mxu0 %v9495_v45  ;;  %v9527_v45 = vld [vmem:[%s12014_s11 + $0x38] sm:$0xff]  }
 0x95d   : >> { %9128 = vmatprep.subr.bf16.mxu0 %v9681_v51 }
 0x960   : >> { %9129 = vmatpush3.bf16.msra.mxu0 %v9497_v47 }
 0x961   : >> { %9130 = vmatprep.subr.bf16.mxu0 %v9681_v51 }
 0x964   : >> { %9131 = vmatpush3.bf16.msra.mxu0 %v9499_v49 }
 0x965   : >> { %9132 = vmatprep.subr.bf16.mxu0 %v9681_v51 }
 0x968   : >> { %9133 = vmatpush3.bf16.msra.mxu0 %v9501_v52 }
 0x969   : >> { %9134 = vmatprep.subr.bf16.mxu0 %v9681_v51 }
 0x96c   : >> { %9135 = vmatpush3.bf16.msra.mxu0 %v9503_v54 }
 0x96d   : >> { %9160 = vmatprep.subr.bf16.mxu0 %v9681_v51 }
 0xa00   : >> { %v4142_v55 = vpop.f32.mrb[48].mxu1 }
 0xa01   : >> { %v9078_v56 = vpop.f32.mrb[49].mxu1 }
 0xa02   : >> { %v4053_v57 = vpop.f32.mrb[44].mxu0  ;;  %v4145_v58 = vpop.f32.mrb[50].mxu1 }
 0xa03   : >> { %v4143_v59 = vadd.f32 %v4142_v55, %v4053_v57  ;;  %v9058_v60 = vpop.f32.mrb[45].mxu0  ;;  %v9079_v61 = vpop.f32.mrb[51].mxu1  ;;  %v7723_v57 = vld [vmem:[%s12013_s10] ss:$0 sm:$0xff] }
 0xa04   : >> { %v4056_v1 = vpop.f32.mrb[46].mxu0 }
 0xa05   : >> { %v4146_v62 = vadd.f32 %v4145_v58, %v4056_v1  ;;  %v9059_v2 = vpop.f32.mrb[47].mxu0 }
 0xa22   : >> { %v4250_v38 = vpop.f32.mrb[48].mxu0 }
 0xa23   : >> { %v4257_v3 = vadd.f32 %v4250_v38, %v4143_v59  ;;  %v9098_v5 = vpop.f32.mrb[49].mxu0 }
 0xa24   : >> { %v4253_v6 = vpop.f32.mrb[50].mxu0 }
 0xa25   : >> { %v4266_v7 = vadd.f32 %v7666_v43, %v4257_v3  ;;  %v4258_v8 = vadd.f32 %v4253_v6, %v4146_v62  ;;  %v9099_v0 = vpop.f32.mrb[51].mxu0  ;;  %v9529_v6 = vld [vmem:[%s12014_s11 + $0x88] sm:$0xff]  }
 0xa26   : >> { %v9532_v0 = vld [vmem:[%s12014_s11 + $0xa0] sm:$0xff]  }
 0xa27   : >> { %4268 = vst [vmem:[#allocation4] sm:$0xff] %v4266_v7  ;;  %v4267_v10 = vadd.f32 %v7666_v43, %v4258_v8  ;;  %v9528_v43 = vld [vmem:[%s12014_s11 + $0x80] sm:$0xff]   ;;  %v9530_v7 = vld [vmem:[%s12014_s11 + $0x90] sm:$0xff]   ;;  %v9531_v8 = vld [vmem:[%s12014_s11 + $0x98] sm:$0xff]  }
 0xa29   : >> { %4269 = vst [vmem:[#allocation4 + $0x8] sm:$0x7] %v4267_v10  ;;  %v9533_v10 = vld [vmem:[%s12014_s11 + $0xa8] sm:$0xff]  }
 0xa30   : >> { %v4270_v11 = vld [vmem:[#allocation4] ss:$2 sm:$0x3f]  ;;  %v4271_v9 = vld [vmem:[#allocation4 + $0x1] ss:$2 sm:$0x1f] }
 0xa31   : >> { %v4272_v13 = vmax.f32 %v4270_v11, %v4271_v9  ;;  %v4274_v35 = vrot.slane %v4270_v11, 1  ;;  %v9534_v11 = vld [vmem:[%s12014_s11 + $0xb0] sm:$0xff]   ;;  %v9535_v9 = vld [vmem:[%s12014_s11 + $0xb8] sm:$0xff]  }
 0xa33   : >> { %v4276_v14 = vmax.f32 %v4272_v13, %v4274_v35 }
 0xa35   : >> { %v4277_v15 = vmax.f32 %v4276_v14, 0.0 }
 0xa37   : >> { %4278 = vst [vmem:[#allocation5] sm:$0x1f] %v4277_v15 }
 0xa3e   : >> { %v4297_v63 = vld [vmem:[#allocation5 + $0x1] sm:$0x7] }
 0xa3f   : >> { %v4279_v4 = vld [vmem:[#allocation5] sm:$0x7]  ;;  %v4298_v18 = vpack.c.bf16 %v4297_v63, %v4297_v63 }
 0xa40   : >> { %v4280_v19 = vpack.c.bf16 %v4279_v4, %v4279_v4  ;;  %v4491_v25 = vld [vmem:[#allocation5 + $0x2] sm:$0x7] }
 0xa41   : >> { %9117 = vmatmul.mubr.bf16.vlgmr.msra.gmra.mrb[52].mxu1 %v4298_v18  ;;  %v4492_v26 = vpack.c.bf16 %v4491_v25, %v4491_v25 }
 0xa42   : >> { %9137 = vmatmul.mubr.bf16.vlgmr.msra.gmra.mrb[52].mxu0 %v4280_v19  ;;  %9141 = vmatpush3.bf16.msra.mxu1 %v9504_v16 }
 0xa43   : >> { %9156 = vmatprep.mubr.msk.bf16.mxu1 %vm9682_vm2, %v9681_v51  ;;  %9142 = vmatprep.subr.bf16.mxu1 %v9681_v51 }
 0xa44   : >> { %9176 = vmatprep.mubr.msk.bf16.mxu0 %vm9682_vm2, %v9681_v51  ;;  %9161 = vmatpush3.bf16.msra.mxu0 %v9512_v27  ;;  %v4935_v27 = vld [vmem:[%s12016_s13] sm:$0xff] (%p558_p5) }
 0xa45   : >> { %9162 = vmatprep.subr.bf16.mxu0 %v9681_v51 }
 0xa46   : >> { %9143 = vmatpush3.bf16.msra.mxu1 %v9505_v20 }
 0xa47   : >> { %9144 = vmatprep.subr.bf16.mxu1 %v9681_v51 }
 0xa48   : >> { %9163 = vmatpush3.bf16.msra.mxu0 %v9514_v29  ;;  %v4936_v29 = vld [vmem:[%s12016_s13 + $0x8] sm:$0xff] (%p558_p5) }
 0xa49   : >> { %9164 = vmatprep.subr.bf16.mxu0 %v9681_v51 }
 0xa4a   : >> { %9145 = vmatpush3.bf16.msra.mxu1 %v9506_v21 }
 0xa4b   : >> { %9146 = vmatprep.subr.bf16.mxu1 %v9681_v51 }
 0xa4c   : >> { %9165 = vmatpush3.bf16.msra.mxu0 %v9516_v31  ;;  %v4940_v31 = vld [vmem:[%s12016_s13 + $0x28] sm:$0xff] (%p558_p5) }
 0xa4d   : >> { %9166 = vmatprep.subr.bf16.mxu0 %v9681_v51 }
 0xa4e   : >> { %9147 = vmatpush3.bf16.msra.mxu1 %v9507_v17 }
 0xa4f   : >> { %9148 = vmatprep.subr.bf16.mxu1 %v9681_v51 }
 0xa50   : >> { %9167 = vmatpush3.bf16.msra.mxu0 %v9518_v33  ;;  %v4943_v33 = vld [vmem:[%s12016_s13 + $0x40] sm:$0xff] (%p558_p5) }
 0xa51   : >> { %9168 = vmatprep.subr.bf16.mxu0 %v9681_v51 }
 0xa52   : >> { %9149 = vmatpush3.bf16.msra.mxu1 %v9508_v22  ;;  %v4927_v22 = vld [vmem:[%s12015_s12] sm:$0x1] }
 0xa53   : >> { %9150 = vmatprep.subr.bf16.mxu1 %v9681_v51 }
 0xa54   : >> { %9169 = vmatpush3.bf16.msra.mxu0 %v9520_v37  ;;  %v12022_v37 = vmov (%p558_p5), 0  }
 0xa55   : >> { %9170 = vmatprep.subr.bf16.mxu0 %v9681_v51 }
 0xa56   : >> { %9151 = vmatpush3.bf16.msra.mxu1 %v9509_v12 }
 0xa57   : >> { %9152 = vmatprep.subr.bf16.mxu1 %v9681_v51 }
 0xa58   : >> { %9171 = vmatpush3.bf16.msra.mxu0 %v9522_v40  ;;  %v10984_v40 = vcombine.low (%p558_p5), %v4936_v29, %v4940_v31 }
 0xa59   : >> { %9172 = vmatprep.subr.bf16.mxu0 %v9681_v51 }
 0xa5a   : >> { %9153 = vmatpush3.bf16.msra.mxu1 %v9510_v24  ;;  %12128 = vst [vmem:[#allocation7_spill] sm:$0xff] (%p558_p5), %v10984_v40 }
 0xa5b   : >> { %9154 = vmatprep.subr.bf16.mxu1 %v9681_v51 }
 0xa5c   : >> { %9173 = vmatpush3.bf16.msra.mxu0 %v9524_v41  ;;  %v4944_v41 = vld [vmem:[%s12016_s13 + $0x48] sm:$0xff] (%p558_p5) }
 0xa5d   : >> { %9174 = vmatprep.subr.bf16.mxu0 %v9681_v51 }
 0xa5e   : >> { %9155 = vmatpush3.bf16.msra.mxu1 %v9511_v23 }
 0xa5f   : >> { %9180 = vmatprep.subr.bf16.mxu1 %v9681_v51 }
 0xa60   : >> { %9175 = vmatpush3.bf16.msra.mxu0 %v9526_v44 }
 0xa61   : >> { %9157 = vmatmul.mubr.bf16.vlgmr.msra.gmra.mrb[56].mxu1 %v4492_v26  ;;  %9200 = vmatprep.subr.bf16.mxu0 %v9681_v51 }
 0xa62   : >> { %9196 = vmatprep.mubr.msk.bf16.mxu1 %vm9682_vm2, %v9681_v51  ;;  %9181 = vmatpush3.bf16.msra.mxu1 %v9513_v28  ;;  %v4939_v28 = vld [vmem:[%s12016_s13 + $0x20] sm:$0xff] (%p558_p5) }
 0xa63   : >> { %9182 = vmatprep.subr.bf16.mxu1 %v9681_v51 }
 0xa66   : >> { %9183 = vmatpush3.bf16.msra.mxu1 %v9515_v30  ;;  %v10967_v30 = vcombine.high (%p558_p5), %v4935_v27, %v4939_v28 }
 0xa67   : >> { %9184 = vmatprep.subr.bf16.mxu1 %v9681_v51 }
 0xa6a   : >> { %9185 = vmatpush3.bf16.msra.mxu1 %v9517_v32  ;;  %v10972_v32 = vcombine.low (%p558_p5), %v4935_v27, %v4939_v28  ;;  %v11241_v27 = vld [vmem:[%s12018_s15 + $0x78] sm:$0xff] (%p558_p5)  }
 0xa6b   : >> { %9186 = vmatprep.subr.bf16.mxu1 %v9681_v51  ;;  %12158 = vst [vmem:[#allocation37_spill] sm:$0xff] (%p558_p5), %v11241_v27  ;;  %v11246_v28 = vld [vmem:[%s12018_s15 + $0xf8] sm:$0xff] (%p558_p5)  }
 0xa6c   : > { %12159 = vst [vmem:[#allocation38_spill] sm:$0xff] (%p558_p5), %v11246_v28 }
 0xa6e   : >> { %9187 = vmatpush3.bf16.msra.mxu1 %v9519_v34  ;;  %v4947_v34 = vld [vmem:[%s12016_s13 + $0x60] sm:$0xff] (%p558_p5) }
 0xa6f   : >> { %9188 = vmatprep.subr.bf16.mxu1 %v9681_v51 }
 0xa72   : >> { %9189 = vmatpush3.bf16.msra.mxu1 %v9521_v39  ;;  %v10982_v39 = vcombine.high (%p558_p5), %v4936_v29, %v4940_v31  ;;  %v11251_v29 = vld [vmem:[%s12018_s15 + $0x38] sm:$0xff] (%p558_p5)  }
 0xa73   : >> { %9190 = vmatprep.subr.bf16.mxu1 %v9681_v51  ;;  %12160 = vst [vmem:[#allocation39_spill] sm:$0xff] (%p558_p5), %v11251_v29  ;;  %v11256_v31 = vld [vmem:[%s12018_s15 + $0xb8] sm:$0xff] (%p558_p5)  }
 0xa74   : > { %12161 = vst [vmem:[#allocation40_spill] sm:$0xff] (%p558_p5), %v11256_v31 }
 0xa76   : >> { %9191 = vmatpush3.bf16.msra.mxu1 %v9523_v36  ;;  %v10986_v36 = vcombine.high (%p558_p5), %v4943_v33, %v4947_v34 }
 0xa77   : >> { %9192 = vmatprep.subr.bf16.mxu1 %v9681_v51 }
 0xa78   : > { %12129 = vst [vmem:[#allocation8_spill] sm:$0xff] (%p558_p5), %v10986_v36 }
 0xa7a   : >> { %9193 = vmatpush3.bf16.msra.mxu1 %v9525_v42  ;;  %v4948_v42 = vld [vmem:[%s12016_s13 + $0x68] sm:$0xff] (%p558_p5) }
 0xa7b   : >> { %9194 = vmatprep.subr.bf16.mxu1 %v9681_v51 }
 0xa7e   : >> { %9195 = vmatpush3.bf16.msra.mxu1 %v9527_v45  ;;  %v10995_v45 = vcombine.high (%p558_p5), %v4944_v41, %v4948_v42 }
 0xa7f   : > { %5120 = vmatprep.subr.bf16.mxu1 (%p558_p5), %v10982_v39 }
 0xa80   : > { %12130 = vst [vmem:[#allocation9_spill] sm:$0xff] (%p558_p5), %v10995_v45 }
 0xb14   : >> { %v4397_v46 = vpop.f32.mrb[52].mxu1 }
 0xb15   : >> { %v4485_v47 = vpop.f32.mrb[52].mxu0  ;;  %v9118_v49 = vpop.f32.mrb[53].mxu1 }
 0xb16   : >> { %v4486_v48 = vadd.f32 %v4485_v47, %v4397_v46  ;;  %v9138_v50 = vpop.f32.mrb[53].mxu0  ;;  %v4400_v52 = vpop.f32.mrb[54].mxu1  ;;  %v4937_v47 = vld [vmem:[%s12016_s13 + $0x10] sm:$0xff] (%p558_p5)  ;;  %v11005_v49 = vcombine.low (%p558_p5), %v4943_v33, %v4947_v34  ;;  %v11265_v33 = vld [vmem:[%s12018_s15 + $0x140] sm:$0xff] (%p558_p5)  }
 0xb17   : >> { %v4488_v53 = vpop.f32.mrb[54].mxu0  ;;  %v9119_v54 = vpop.f32.mrb[55].mxu1  ;;  %v4938_v50 = vld [vmem:[%s12016_s13 + $0x18] sm:$0xff] (%p558_p5)  ;;  %12162 = vst [vmem:[#allocation41_spill] sm:$0xff] (%p558_p5), %v11265_v33  ;;  %v11270_v34 = vld [vmem:[%s12018_s15 + $0x1c0] sm:$0xff] (%p558_p5)  }
 0xb18   : >> { %v9139_v55 = vpop.f32.mrb[55].mxu0  ;;  %12131 = vst [vmem:[#allocation10_spill] sm:$0xff] (%p558_p5), %v11005_v49  ;;  %v4942_v52 = vld [vmem:[%s12016_s13 + $0x38] sm:$0xff] (%p558_p5)  ;;  %v11015_v53 = vcombine.low (%p558_p5), %v4944_v41, %v4948_v42  ;;  %12163 = vst [vmem:[#allocation42_spill] sm:$0xff] (%p558_p5), %v11270_v34  ;;  %v4953_v41 = vlaneseq (%p558_p5) }
 0xb1a   : > { %12132 = vst [vmem:[#allocation11_spill] sm:$0xff] (%p558_p5), %v11015_v53  ;;  %v4954_v42 = vshrl.u32 (%p558_p5), %v4953_v41, 7 }
 0xb34   : >> { %v4591_v56 = vpop.f32.mrb[56].mxu1 }
 0xb35   : >> { %v4597_v58 = vadd.f32 %v4591_v56, %v4486_v48  ;;  %v9158_v59 = vpop.f32.mrb[57].mxu1  ;;  %v4941_v48 = vld [vmem:[%s12016_s13 + $0x30] sm:$0xff] (%p558_p5) }
 0xb36   : >> { %v4594_v60 = vpop.f32.mrb[58].mxu1  ;;  %v11019_v55 = vcombine.high (%p558_p5), %v4937_v47, %v4941_v48  ;;  %v4945_v56 = vld [vmem:[%s12016_s13 + $0x50] sm:$0xff] (%p558_p5)  ;;  %v4946_v59 = vld [vmem:[%s12016_s13 + $0x58] sm:$0xff] (%p558_p5) }
 0xb37   : >> { %v4605_v61 = vadd.f32 %v7723_v57, %v4597_v58  ;;  %v9159_v1 = vpop.f32.mrb[59].mxu1  ;;  %v4949_v57 = vld [vmem:[%s12016_s13 + $0x70] sm:$0xff] (%p558_p5)  ;;  %v11028_v58 = vcombine.high (%p558_p5), %v4938_v50, %v4942_v52  ;;  %v4950_v60 = vld [vmem:[%s12016_s13 + $0x78] sm:$0xff] (%p558_p5) }
 0xb38   : > { %12134 = vst [vmem:[#allocation13_spill] sm:$0xff] (%p558_p5), %v11019_v55  ;;  %v11043_v1 = vcombine.low (%p558_p5), %v4938_v50, %v4942_v52  ;;  %v4967_v50 = vsub.s32 (%p558_p5), 3, %v4954_v42 }
 0xb39   : >> { %v4606_v62 = vmax.f32 %v4605_v61, 0.0  ;;  %12135 = vst [vmem:[#allocation14_spill] sm:$0xff] (%p558_p5), %v11028_v58  ;;  %v11039_v61 = vcombine.low (%p558_p5), %v4937_v47, %v4941_v48  ;;  %v4963_v47 = vsub.s32 (%p558_p5), 2, %v4954_v42  ;;  %v4959_v48 = vsub.s32 (%p558_p5), 1, %v4954_v42 }
 0xb3a   : > { %12137 = vst [vmem:[#allocation16_spill] sm:$0xff] (%p558_p5), %v11043_v1 }
 0xb3b   : >> { %4607 = vst [vmem:[#allocation4] sm:$0x7] %v4606_v62  ;;  %12136 = vst [vmem:[#allocation15_spill] sm:$0xff] (%p558_p5), %v11039_v61  ;;  %v11045_v62 = vcombine.high (%p558_p5), %v4945_v56, %v4949_v57 }
 0xb3d   : > { %12138 = vst [vmem:[#allocation17_spill] sm:$0xff] (%p558_p5), %v11045_v62 }
 0xb42   : >> { %v4626_v2 = vld [vmem:[#allocation4 + $0x1] sm:$0x1]  ;;  %v4608_v38 = vld [vmem:[#allocation4] sm:$0x1]  ;;  %v4820_v13 = vld [vmem:[#allocation4 + $0x2] sm:$0x1] }
 0xb43   : >> { %v4627_v3 = vpack.c.bf16 %v4626_v2, %v4626_v2  ;;  %v4609_v5 = vpack.c.bf16 %v4608_v38, %v4608_v38  ;;  %v4821_v35 = vpack.c.bf16 %v4820_v13, %v4820_v13  ;;  %v11048_v2 = vcombine.high (%p558_p5), %v4946_v59, %v4950_v60  ;;  %v11123_v13 = vld [vmem:[%s12018_s15 + $0xd0] sm:$0xff] (%p558_p5)  }
 0xb44   : > { %v11055_v38 = vcombine.low (%p558_p5), %v4945_v56, %v4949_v57 }
 0xb45   : >> { %9177 = vmatmul.mubr.bf16.vlgmr.msra.gmra.mrb[56].mxu0 %v4627_v3  ;;  %9197 = vmatmul.mubr.bf16.vlgmr.msra.gmra.mrb[60].mxu1 %v4609_v5  ;;  %12139 = vst [vmem:[#allocation18_spill] sm:$0xff] (%p558_p5), %v11048_v2  ;;  %v11064_v3 = vcombine.low (%p558_p5), %v4946_v59, %v4950_v60  ;;  %v11069_v5 = vld [vmem:[%s12018_s15 + $0xc0] sm:$0xff] (%p558_p5)   ;;  %v4971_v60 = vsub.s32 (%p558_p5), 4, %v4954_v42 }
 0xb46   : >> { %9201 = vmatpush3.bf16.msra.mxu0 %v9528_v43  ;;  %9216 = vmatprep.mubr.msk.bf16.mxu0 %vm9682_vm2, %v9681_v51  ;;  %12140 = vst [vmem:[#allocation19_spill] sm:$0xff] (%p558_p5), %v11055_v38  ;;  %v11060_v43 = vld [vmem:[%s12018_s15 + $0x40] sm:$0xff] (%p558_p5)  }
 0xb47   : >> { %9202 = vmatprep.subr.bf16.mxu0 %v9681_v51  ;;  %5152 = vmatprep.mubr.bf16.mxu1 (%p558_p5), %v12022_v37  ;;  %12141 = vst [vmem:[#allocation20_spill] sm:$0xff] (%p558_p5), %v11064_v3 }
 0xb48   : > { %5121 = vmatpush1.bf16.msra.mxu1 (%p558_p5), %v10984_v40 }
 0xb49   : > { %5122 = vmatprep.subr.bf16.mxu1 (%p558_p5), %v10995_v45 }
 0xb4a   : >> { %9203 = vmatpush3.bf16.msra.mxu0 %v9529_v6  ;;  %v11076_v6 = vld [vmem:[%s12018_s15] sm:$0xff] (%p558_p5)  }
 0xb4b   : >> { %9204 = vmatprep.subr.bf16.mxu0 %v9681_v51 }
 0xb4c   : > { %5123 = vmatpush1.bf16.msra.mxu1 (%p558_p5), %v11015_v53 }
 0xb4d   : > { %5206 = vmatprep.subr.bf16.mxu1 (%p558_p5), %v11028_v58 }
 0xb4e   : >> { %9205 = vmatpush3.bf16.msra.mxu0 %v9530_v7  ;;  %v11082_v7 = vld [vmem:[%s12018_s15 + $0x80] sm:$0xff] (%p558_p5)  }
 0xb4f   : >> { %9206 = vmatprep.subr.bf16.mxu0 %v9681_v51 }
 0xb52   : >> { %9207 = vmatpush3.bf16.msra.mxu0 %v9531_v8  ;;  %v11088_v8 = vld [vmem:[%s12018_s15 + $0x48] sm:$0xff] (%p558_p5)  }
 0xb53   : >> { %9208 = vmatprep.subr.bf16.mxu0 %v9681_v51 }
 0xb56   : >> { %9209 = vmatpush3.bf16.msra.mxu0 %v9532_v0  ;;  %v11095_v0 = vld [vmem:[%s12018_s15 + $0xc8] sm:$0xff] (%p558_p5)  }
 0xb57   : >> { %9210 = vmatprep.subr.bf16.mxu0 %v9681_v51 }
 0xb5a   : >> { %9211 = vmatpush3.bf16.msra.mxu0 %v9533_v10  ;;  %v11101_v10 = vld [vmem:[%s12018_s15 + $0x8] sm:$0xff] (%p558_p5)  }
 0xb5b   : >> { %9212 = vmatprep.subr.bf16.mxu0 %v9681_v51 }
 0xb5e   : >> { %9213 = vmatpush3.bf16.msra.mxu0 %v9534_v11  ;;  %v11108_v11 = vld [vmem:[%s12018_s15 + $0x88] sm:$0xff] (%p558_p5)  }
 0xb5f   : >> { %9214 = vmatprep.subr.bf16.mxu0 %v9681_v51 }
 0xb62   : >> { %9215 = vmatpush3.bf16.msra.mxu0 %v9535_v9  ;;  %v11116_v9 = vld [vmem:[%s12018_s15 + $0x50] sm:$0xff] (%p558_p5)  }
 0xb63   : > { %5077 = vmatprep.subr.bf16.mxu0 (%p558_p5), %v10967_v30 }
 0xb65   : >> { %9217 = vmatmul.mubr.bf16.vlgmr.msra.gmra.mrb[60].mxu0 %v4821_v35  ;;  %v11129_v35 = vld [vmem:[%s12018_s15 + $0x10] sm:$0xff] (%p558_p5)  }
 0xb66   : > { %5109 = vmatprep.mubr.bf16.mxu0 (%p558_p5), %v12022_v37  ;;  %5078 = vmatpush1.bf16.msra.mxu0 (%p558_p5), %v10972_v32 }
 0xb67   : > { %5079 = vmatprep.subr.bf16.mxu0 (%p558_p5), %v10986_v36 }
 0xb6a   : > { %5080 = vmatpush1.bf16.msra.mxu0 (%p558_p5), %v11005_v49 }
 0xb6b   : > { %5163 = vmatprep.subr.bf16.mxu0 (%p558_p5), %v11019_v55 }
 0xc18   : >> { %v4726_v14 = vpop.f32.mrb[56].mxu0  ;;  %v4814_v15 = vpop.f32.mrb[60].mxu1 }
 0xc19   : >> { %v4815_v63 = vadd.f32 %v4814_v15, %v4726_v14  ;;  %v9178_v4 = vpop.f32.mrb[57].mxu0  ;;  %v9198_v16 = vpop.f32.mrb[61].mxu1  ;;  %v11134_v14 = vld [vmem:[%s12018_s15 + $0x90] sm:$0xff] (%p558_p5)   ;;  %v11140_v15 = vld [vmem:[%s12018_s15 + $0x58] sm:$0xff] (%p558_p5)  }
 0xc1a   : >> { %v4729_v18 = vpop.f32.mrb[58].mxu0  ;;  %v4817_v19 = vpop.f32.mrb[62].mxu1  ;;  %12142 = vst [vmem:[#allocation21_spill] sm:$0xff] (%p558_p5), %v11140_v15  ;;  %v11153_v4 = vld [vmem:[%s12018_s15 + $0x18] sm:$0xff] (%p558_p5)  }
 0xc1b   : >> { %v9179_v20 = vpop.f32.mrb[59].mxu0  ;;  %v9199_v21 = vpop.f32.mrb[63].mxu1  ;;  %12144 = vst [vmem:[#allocation23_spill] sm:$0xff] (%p558_p5), %v11153_v4  ;;  %v11158_v16 = vld [vmem:[%s12018_s15 + $0x98] sm:$0xff] (%p558_p5)   ;;  %v11164_v18 = vld [vmem:[%s12018_s15 + $0x60] sm:$0xff] (%p558_p5)  }
 0xc1c   : > { %12145 = vst [vmem:[#allocation24_spill] sm:$0xff] (%p558_p5), %v11158_v16  ;;  %12146 = vst [vmem:[#allocation25_spill] sm:$0xff] (%p558_p5), %v11164_v18  ;;  %v11171_v19 = vld [vmem:[%s12018_s15 + $0xe0] sm:$0xff] (%p558_p5)  }
 0xc1d   : > { %12147 = vst [vmem:[#allocation26_spill] sm:$0xff] (%p558_p5), %v11171_v19  ;;  %v11177_v20 = vld [vmem:[%s12018_s15 + $0x20] sm:$0xff] (%p558_p5)  }
 0xc1e   : > { %12148 = vst [vmem:[#allocation27_spill] sm:$0xff] (%p558_p5), %v11177_v20  ;;  %v11182_v21 = vld [vmem:[%s12018_s15 + $0xa0] sm:$0xff] (%p558_p5)  }
 0xc1f   : > { %12149 = vst [vmem:[#allocation28_spill] sm:$0xff] (%p558_p5), %v11182_v21 }
 0xc38   : >> { %v4920_v17 = vpop.f32.mrb[60].mxu0 }
 0xc39   : >> { %v4926_v51 = vadd.f32 %v4920_v17, %v4815_v63  ;;  %v9218_v12 = vpop.f32.mrb[61].mxu0  ;;  %560 = sbr.rel (!%p558_p5) target bundleno = 24 (0x18), region = 175  ;;  %v11147_v63 = vld [vmem:[%s12018_s15 + $0xd8] sm:$0xff] (%p558_p5)   ;;  %v11187_v17 = vld [vmem:[%s12018_s15 + $0x68] sm:$0xff] (%p558_p5)  }
 0xc3a   : >> { %v4923_v24 = vpop.f32.mrb[62].mxu0  ;;  %12143 = vst [vmem:[#allocation22_spill] sm:$0xff] (%p558_p5), %v11147_v63  ;;  %12150 = vst [vmem:[#allocation29_spill] sm:$0xff] (%p558_p5), %v11187_v17  ;;  %v11206_v12 = vld [vmem:[%s12018_s15 + $0xa8] sm:$0xff] (%p558_p5)  }
 0xc3b   : >> { %v4928_v23 = vadd.f32 %v4927_v22, %v4926_v51  ;;  %v9219_v25 = vpop.f32.mrb[63].mxu0  ;;  %v11193_v22 = vld [vmem:[%s12018_s15 + $0xe8] sm:$0xff] (%p558_p5)   ;;  %12153 = vst [vmem:[#allocation32_spill] sm:$0xff] (%p558_p5), %v11206_v12  ;;  %v11217_v24 = vld [vmem:[%s12018_s15 + $0x70] sm:$0xff] (%p558_p5)  }
 0xc3c   : > { %12151 = vst [vmem:[#allocation30_spill] sm:$0xff] (%p558_p5), %v11193_v22  ;;  %v11201_v51 = vld [vmem:[%s12018_s15 + $0x28] sm:$0xff] (%p558_p5)   ;;  %12154 = vst [vmem:[#allocation33_spill] sm:$0xff] (%p558_p5), %v11217_v24  ;;  %v11227_v25 = vld [vmem:[%s12018_s15 + $0x30] sm:$0xff] (%p558_p5)  }
 0xc3d   : >> { %v4929_v26 = vmax.f32 %v4928_v23, 0.0  ;;  %12152 = vst [vmem:[#allocation31_spill] sm:$0xff] (%p558_p5), %v11201_v51  ;;  %v11222_v23 = vld [vmem:[%s12018_s15 + $0xf0] sm:$0xff] (%p558_p5)   ;;  %12156 = vst [vmem:[#allocation35_spill] sm:$0xff] (%p558_p5), %v11227_v25 }
 0xc3e   : > { %12155 = vst [vmem:[#allocation34_spill] sm:$0xff] (%p558_p5), %v11222_v23 }
 0xc3f   : >> { %7781 = vst [vmem:[%s10473_s30 + $0x1] sm:$0x1] %v4929_v26  ;;  %v11232_v26 = vld [vmem:[%s12018_s15 + $0xb0] sm:$0xff] (%p558_p5)  }
 0xc40   : > { %12157 = vst [vmem:[#allocation36_spill] sm:$0xff] %v11232_v26 }
 0xc46   : > { %v4932_v44 = vld [vmem:[#allocation6] sm:$0xff]  ;;  %v4933_v46 = vld [vmem:[#allocation6 + $0x8] sm:$0xff] }
 0xc47   : > { %v11017_v54 = vpack.c.bf16 %v4933_v46, %v4932_v44  ;;  %v4955_v44 = vsub.s32 0, %v4954_v42  ;;  %v4951_v46 = vld [vmem:[%s12017_s14] sm:$0xff] }
 0xc48   : > { %v11281_v56 = vrot.slane %v4951_v46, %v4963_v47  ;;  %v11283_v57 = vrot.slane %v4951_v46, %v4959_v48  ;;  %v11285_v59 = vrot.slane %v4951_v46, %v4967_v50 }
 0xc49   : > { %12133 = vst [vmem:[#allocation12_spill] sm:$0xff] %v11017_v54  ;;  %5957 = vrot.lane.b32.xlu0 %v11017_v54, %s9684_s18  ;;  %7798 = vmatmul.mubr.msk.bf16.vlgmr.msra.gmra.mrb[0].mxu0 %vm5073_vm3, %v11017_v54  ;;  %v11279_v52 = vrot.slane %v4951_v46, %v4955_v44 }
 0xc4a   : > { %7799 = vmatmul.mubr.msk.bf16.vlgmr.msra.gmra.mrb[0].mxu1 %vm5073_vm3, %v11017_v54  ;;  %5164 = vmatpush1.bf16.msra.mxu0 %v11039_v61  ;;  %12165 = vst [vmem:[#allocation44_spill] sm:$0xff] %v11281_v56 }
 0xc4b   : > { %5207 = vmatpush1.bf16.msra.mxu1 %v11043_v1  ;;  %5165 = vmatprep.subr.bf16.mxu0 %v11045_v62  ;;  %12164 = vst [vmem:[#allocation43_spill] sm:$0xff] %v11279_v52 }
 0xc4c   : > { %5208 = vmatprep.subr.bf16.mxu1 %v11048_v2  ;;  %5195 = vmatprep.mubr.bf16.mxu0 %v12022_v37 }
 0xc4d   : > { %5238 = vmatprep.mubr.bf16.mxu1 %v12022_v37  ;;  %6322 = vrot.lane.b32.xlu0 %v11017_v54, %s9685_s28 }
 0xc4e   : > { %5166 = vmatpush1.bf16.msra.mxu0 %v11055_v38 }
 0xc4f   : > { %5209 = vmatpush1.bf16.msra.mxu1 %v11064_v3  ;;  %8200 = vmatprep.subr.bf16.mxu0 %v11060_v43 }
 0xc50   : > { %8222 = vmatprep.subr.bf16.mxu1 %v11069_v5 }
 0xc51   : > { %7800 = vmatmul.mubr.msk.bf16.vlgmr.msra.gmra.mrb[4].mxu0 %vm5073_vm3, %v11017_v54 }
 0xc52   : > { %7801 = vmatmul.mubr.msk.bf16.vlgmr.msra.gmra.mrb[4].mxu1 %vm5073_vm3, %v11017_v54  ;;  %8201 = vmatpush3.bf16.msra.mxu0 %v11076_v6  ;;  %v4975_v54 = vsub.s32 5, %v4954_v42 }
 0xc53   : > { %8223 = vmatpush3.bf16.msra.mxu1 %v11082_v7  ;;  %8202 = vmatprep.subr.bf16.mxu0 %v11088_v8 }
 0xc54   : > { %8224 = vmatprep.subr.bf16.mxu1 %v11095_v0 }
 0xc56   : > { %8203 = vmatpush3.bf16.msra.mxu0 %v11101_v10 }
 0xc57   : > { %8225 = vmatpush3.bf16.msra.mxu1 %v11108_v11  ;;  %8204 = vmatprep.subr.bf16.mxu0 %v11116_v9 }
 0xc58   : > { %8226 = vmatprep.subr.bf16.mxu1 %v11123_v13 }
 0xc5a   : > { %8205 = vmatpush3.bf16.msra.mxu0 %v11129_v35 }
 0xc5b   : > { %8227 = vmatpush3.bf16.msra.mxu1 %v11134_v14  ;;  %8206 = vmatprep.subr.bf16.mxu0 %v11140_v15 }
 0xc5c   : > { %8228 = vmatprep.subr.bf16.mxu1 %v11147_v63 }
 0xc5e   : > { %8207 = vmatpush3.bf16.msra.mxu0 %v11153_v4 }
 0xc5f   : > { %8229 = vmatpush3.bf16.msra.mxu1 %v11158_v16  ;;  %8208 = vmatprep.subr.bf16.mxu0 %v11164_v18 }
 0xc60   : > { %8230 = vmatprep.subr.bf16.mxu1 %v11171_v19 }
 0xc62   : > { %8209 = vmatpush3.bf16.msra.mxu0 %v11177_v20 }
 0xc63   : > { %8231 = vmatpush3.bf16.msra.mxu1 %v11182_v21  ;;  %8210 = vmatprep.subr.bf16.mxu0 %v11187_v17 }
 0xc64   : > { %8232 = vmatprep.subr.bf16.mxu1 %v11193_v22 }
 0xc66   : > { %8211 = vmatpush3.bf16.msra.mxu0 %v11201_v51  ;;  %v11296_v51 = vrot.slane %v4951_v46, %v4975_v54  ;;  %v11306_v54 = vld [vmem:[%s12018_s15 + $0x100] sm:$0xff]  }
 0xc67   : > { %8233 = vmatpush3.bf16.msra.mxu1 %v11206_v12  ;;  %8212 = vmatprep.subr.bf16.mxu0 %v11217_v24 }
 0xc68   : > { %8234 = vmatprep.subr.bf16.mxu1 %v11222_v23  ;;  %v4983_v23 = vsub.s32 7, %v4954_v42 }
 0xc6a   : > { %8213 = vmatpush3.bf16.msra.mxu0 %v11227_v25  ;;  %v11292_v25 = vrot.slane %v4951_v46, %v4971_v60 }
 0xc6b   : > { %8235 = vmatpush3.bf16.msra.mxu1 %v11232_v26  ;;  %8214 = vmatprep.subr.bf16.mxu0 %v11241_v27  ;;  %v4979_v27 = vsub.s32 6, %v4954_v42 }
 0xc6c   : > { %8236 = vmatprep.subr.bf16.mxu1 %v11246_v28 }
 0xc6d   : > { %v11299_v20 = vrot.slane %v4951_v46, %v4979_v27 }
 0xc6e   : > { %8215 = vmatpush3.bf16.msra.mxu0 %v11251_v29 }
 0xc6f   : > { %8237 = vmatpush3.bf16.msra.mxu1 %v11256_v31  ;;  %8244 = vmatprep.subr.bf16.mxu0 %v11265_v33 }
 0xc70   : > { %8266 = vmatprep.subr.bf16.mxu1 %v11270_v34 }
 0xd1c   : > { %v5111_v37 = vpop.f32.mrb[0].mxu0 }
 0xd1d   : > { %v5112_v41 = vadd.f32 %v5111_v37, %v11279_v52  ;;  %v5154_v34 = vpop.f32.mrb[0].mxu1  ;;  %v5113_v33 = vpop.f32.mrb[1].mxu0 }
 0xd1e   : > { %v5155_v31 = vadd.f32 %v5154_v34, %v11281_v56  ;;  %v5114_v29 = vadd.f32 %v5113_v33, %v11283_v57  ;;  %v5156_v28 = vpop.f32.mrb[1].mxu1  ;;  %v5115_v44 = vpop.f32.mrb[2].mxu0 }
 0xd1f   : > { %v5157_v47 = vadd.f32 %v5156_v28, %v11285_v59  ;;  %v5116_v48 = vadd.f32 %v5115_v44, %v11279_v52  ;;  %v5158_v50 = vpop.f32.mrb[2].mxu1  ;;  %v5117_v26 = vpop.f32.mrb[3].mxu0  ;;  %v5249_v33 = vmax.f32 %v5112_v41, 0.0 }
 0xd20   : > { %v5251_v24 = vmax.f32 %v5155_v31, 0.0  ;;  %v5159_v37 = vadd.f32 %v5158_v50, %v11281_v56  ;;  %v5118_v12 = vadd.f32 %v5117_v26, %v11283_v57  ;;  %v5160_v34 = vpop.f32.mrb[3].mxu1  ;;  %v5250_v21 = vmax.f32 %v5114_v29, 0.0  ;;  %v11311_v29 = vld [vmem:[%s12018_s15 + $0x180] sm:$0xff]  }
 0xd21   : > { %v5252_v22 = vmax.f32 %v5157_v47, 0.0  ;;  %v5257_v17 = vmax.f32 %v5116_v48, 0.0  ;;  %v5161_v28 = vadd.f32 %v5160_v34, %v11285_v59  ;;  %v11301_v31 = vrot.slane %v4951_v46, %v4983_v23  ;;  %v11322_v23 = vld [vmem:[%s12018_s15 + $0x1c8] sm:$0xff]  }
 0xd22   : > { %v5259_v44 = vmax.f32 %v5159_v37, 0.0  ;;  %v5258_v52 = vmax.f32 %v5118_v12, 0.0 }
 0xd23   : > { %v5265_v60 = vpack.c.bf16 %v5257_v17, %v5249_v33  ;;  %v5260_v42 = vmax.f32 %v5161_v28, 0.0  ;;  %v11316_v17 = vld [vmem:[%s12018_s15 + $0x148] sm:$0xff]  }
 0xd24   : > { %v5267_v50 = vpack.c.bf16 %v5259_v44, %v5251_v24  ;;  %v5266_v56 = vpack.c.bf16 %v5258_v52, %v5250_v21  ;;  %v5197_v26 = vpop.f32.mrb[4].mxu0  ;;  %v11332_v33 = vld [vmem:[%s12018_s15 + $0x108] sm:$0xff]  }
 0xd25   : > { %v5268_v41 = vpack.c.bf16 %v5260_v42, %v5252_v22  ;;  %v5198_v12 = vadd.f32 %v5197_v26, %v11292_v25  ;;  %v5199_v21 = vpop.f32.mrb[5].mxu0  ;;  %v5240_v24 = vpop.f32.mrb[4].mxu1 }
 0xd26   : > { %5824 = vmatprep.mubr.bf16.mxu0 %v5266_v56  ;;  %v5200_v22 = vadd.f32 %v5199_v21, %v11296_v51  ;;  %v5201_v27 = vpop.f32.mrb[6].mxu0  ;;  %v5241_v46 = vadd.f32 %v5240_v24, %v11299_v20  ;;  %v5242_v52 = vpop.f32.mrb[5].mxu1 }
 0xd27   : > { %5865 = vmatprep.mubr.bf16.mxu1 %v5268_v41  ;;  %5825 = vmatmul.mubr.bf16.vlgmr.msra.gmra.mrb[8].mxu0 %v5265_v60  ;;  %v5253_v47 = vmax.f32 %v5198_v12, 0.0  ;;  %v5202_v48 = vadd.f32 %v5201_v27, %v11292_v25  ;;  %v5203_v37 = vpop.f32.mrb[7].mxu0  ;;  %v5243_v34 = vadd.f32 %v5242_v52, %v11301_v31  ;;  %v5244_v56 = vpop.f32.mrb[6].mxu1  ;;  %v11346_v41 = vld [vmem:[%s12018_s15 + $0x150] sm:$0xff]  }
 0xd28   : > { %5866 = vmatmul.mubr.bf16.vlgmr.msra.gmra.mrb[8].mxu1 %v5267_v50  ;;  %8245 = vmatpush3.bf16.msra.mxu0 %v11306_v54  ;;  %v5254_v28 = vmax.f32 %v5200_v22, 0.0  ;;  %v5255_v44 = vmax.f32 %v5241_v46, 0.0  ;;  %v5204_v42 = vadd.f32 %v5203_v37, %v11296_v51  ;;  %v5245_v60 = vadd.f32 %v5244_v56, %v11299_v20  ;;  %v5246_v26 = vpop.f32.mrb[7].mxu1  ;;  %v11341_v50 = vld [vmem:[%s12018_s15 + $0x188] sm:$0xff]   ;;  %v11353_v22 = vld [vmem:[%s12018_s15 + $0x1d0] sm:$0xff]  }
 0xd29   : > { %8267 = vmatpush3.bf16.msra.mxu1 %v11311_v29  ;;  %8246 = vmatprep.subr.bf16.mxu0 %v11316_v17  ;;  %v5261_v12 = vmax.f32 %v5202_v48, 0.0  ;;  %v5256_v21 = vmax.f32 %v5243_v34, 0.0  ;;  %v5247_v24 = vadd.f32 %v5246_v26, %v11301_v31  ;;  %v11359_v48 = vld [vmem:[%s12018_s15 + $0x110] sm:$0xff]   ;;  %v11390_v26 = vld [vmem:[%s12018_s15 + $0x198] sm:$0xff]  }
 0xd2a   : > { %8268 = vmatprep.subr.bf16.mxu1 %v11322_v23  ;;  %v5262_v27 = vmax.f32 %v5204_v42, 0.0  ;;  %v5263_v46 = vmax.f32 %v5245_v60, 0.0  ;;  %v11366_v42 = vld [vmem:[%s12018_s15 + $0x190] sm:$0xff]  }
 0xd2b   : > { %v5269_v52 = vpack.c.bf16 %v5261_v12, %v5253_v47  ;;  %v5264_v37 = vmax.f32 %v5247_v24, 0.0  ;;  %v11371_v47 = vld [vmem:[%s12018_s15 + $0x158] sm:$0xff]   ;;  %v11395_v12 = vld [vmem:[%s12018_s15 + $0x160] sm:$0xff]  }
 0xd2c   : > { %8247 = vmatpush3.bf16.msra.mxu0 %v11332_v33  ;;  %v5270_v34 = vpack.c.bf16 %v5262_v27, %v5254_v28  ;;  %v5271_v56 = vpack.c.bf16 %v5263_v46, %v5255_v44  ;;  %v11377_v28 = vld [vmem:[%s12018_s15 + $0x1d8] sm:$0xff]   ;;  %v11407_v24 = vld [vmem:[%s12018_s15 + $0x120] sm:$0xff]   ;;  %v11419_v46 = vld [vmem:[%s12018_s15 + $0x168] sm:$0xff]  }
 0xd2d   : > { %8269 = vmatpush3.bf16.msra.mxu1 %v11341_v50  ;;  %8248 = vmatprep.subr.bf16.mxu0 %v11346_v41  ;;  %v5272_v60 = vpack.c.bf16 %v5264_v37, %v5256_v21  ;;  %v11383_v44 = vld [vmem:[%s12018_s15 + $0x118] sm:$0xff]   ;;  %v11401_v21 = vld [vmem:[%s12018_s15 + $0x1e0] sm:$0xff]   ;;  %12167 = vst [vmem:[#allocation46_spill] sm:$0xff] %v11407_v24  ;;  %12169 = vst [vmem:[#allocation48_spill] sm:$0xff] %v11419_v46 }
 0xd2e   : > { %8270 = vmatprep.subr.bf16.mxu1 %v11353_v22  ;;  %5906 = vmatprep.mubr.bf16.mxu0 %v5270_v34  ;;  %12166 = vst [vmem:[#allocation45_spill] sm:$0xff] %v11401_v21  ;;  %v11414_v27 = vld [vmem:[%s12018_s15 + $0x1a0] sm:$0xff]   ;;  %v11425_v37 = vld [vmem:[%s12018_s15 + $0x1e8] sm:$0xff]  }
 0xd2f   : > { %5947 = vmatprep.mubr.bf16.mxu1 %v5272_v60  ;;  %12168 = vst [vmem:[#allocation47_spill] sm:$0xff] %v11414_v27  ;;  %12170 = vst [vmem:[#allocation49_spill] sm:$0xff] %v11425_v37  ;;  %v11431_v34 = vld [vmem:[%s12018_s15 + $0x128] sm:$0xff]  }
 0xd30   : > { %8249 = vmatpush3.bf16.msra.mxu0 %v11359_v48  ;;  %12171 = vst [vmem:[#allocation50_spill] sm:$0xff] %v11431_v34  ;;  %v11438_v60 = vld [vmem:[%s12018_s15 + $0x1a8] sm:$0xff]  }
 0xd31   : > { %8271 = vmatpush3.bf16.msra.mxu1 %v11366_v42  ;;  %8250 = vmatprep.subr.bf16.mxu0 %v11371_v47 }
 0xd32   : > { %8272 = vmatprep.subr.bf16.mxu1 %v11377_v28 }
 0xd34   : > { %8251 = vmatpush3.bf16.msra.mxu0 %v11383_v44 }
 0xd35   : > { %8273 = vmatpush3.bf16.msra.mxu1 %v11390_v26  ;;  %8252 = vmatprep.subr.bf16.mxu0 %v11395_v12 }
 0xd36   : > { %8274 = vmatprep.subr.bf16.mxu1 %v11401_v21  ;;  %v11443_v21 = vld [vmem:[%s12018_s15 + $0x170] sm:$0xff]  }
 0xd37   : > { %12172 = vst [vmem:[#allocation51_spill] sm:$0xff] %v11443_v21 }
 0xd38   : > { %8253 = vmatpush3.bf16.msra.mxu0 %v11407_v24  ;;  %v11449_v24 = vld [vmem:[%s12018_s15 + $0x1f0] sm:$0xff]  }
 0xd39   : > { %8275 = vmatpush3.bf16.msra.mxu1 %v11414_v27  ;;  %8254 = vmatprep.subr.bf16.mxu0 %v11419_v46  ;;  %12173 = vst [vmem:[#allocation52_spill] sm:$0xff] %v11449_v24  ;;  %v11455_v46 = vld [vmem:[%s12018_s15 + $0x130] sm:$0xff]   ;;  %v11467_v27 = vld [vmem:[%s12018_s15 + $0x178] sm:$0xff]  }
 0xd3a   : > { %8276 = vmatprep.subr.bf16.mxu1 %v11425_v37  ;;  %v11462_v37 = vld [vmem:[%s12018_s15 + $0x1b0] sm:$0xff]   ;;  %12174 = vst [vmem:[#allocation53_spill] sm:$0xff] %v11467_v27 }
 0xd3c   : > { %8255 = vmatpush3.bf16.msra.mxu0 %v11431_v34  ;;  %v11473_v34 = vld [vmem:[%s12018_s15 + $0x1f8] sm:$0xff]  }
 0xd3d   : > { %8277 = vmatpush3.bf16.msra.mxu1 %v11438_v60  ;;  %8256 = vmatprep.subr.bf16.mxu0 %v11443_v21  ;;  %v11479_v21 = vld [vmem:[%s12018_s15 + $0x138] sm:$0xff]  }
 0xd3e   : > { %8278 = vmatprep.subr.bf16.mxu1 %v11449_v24  ;;  %v11486_v24 = vld [vmem:[%s12018_s15 + $0x1b8] sm:$0xff]  }
 0xd3f   : > { %12175 = vst [vmem:[#allocation54_spill] sm:$0xff] %v11486_v24 }
 0xd40   : > { %8257 = vmatpush3.bf16.msra.mxu0 %v11455_v46 }
 0xd41   : > { %8279 = vmatpush3.bf16.msra.mxu1 %v11462_v37  ;;  %8258 = vmatprep.subr.bf16.mxu0 %v11467_v27  ;;  %v12176_v27 = vmov 0  }
 0xd42   : > { %8280 = vmatprep.subr.bf16.mxu1 %v11473_v34 }
 0xd44   : > { %8259 = vmatpush3.bf16.msra.mxu0 %v11479_v21 }
 0xd45   : > { %8281 = vmatpush3.bf16.msra.mxu1 %v11486_v24  ;;  %5962 = vmatprep.subr.bf16.mxu0 %v10967_v30  ;;  %v5958_v24 = vpop.permute.xlu0 %5957 }
 0xd46   : > { %6005 = vmatprep.subr.bf16.mxu1 %v10982_v39 }
 0xd47   : > { %5907 = vmatmul.mubr.bf16.vlgmr.msra.gmra.mrb[12].mxu0 %v5269_v52  ;;  %v12189_v52 = vld [vmem:[#allocation39_spill] sm:$0xff] }
 0xd48   : > { %5948 = vmatmul.mubr.bf16.vlgmr.msra.gmra.mrb[12].mxu1 %v5271_v56  ;;  %5963 = vmatpush1.bf16.msra.mxu0 %v10972_v32  ;;  %v12190_v56 = vld [vmem:[#allocation40_spill] sm:$0xff] }
 0xd49   : > { %6006 = vmatpush1.bf16.msra.mxu1 %v10984_v40  ;;  %5964 = vmatprep.subr.bf16.mxu0 %v10986_v36 }
 0xd4a   : > { %6007 = vmatprep.subr.bf16.mxu1 %v10995_v45  ;;  %5994 = vmatprep.mubr.bf16.mxu0 %v12176_v27 }
 0xd4b   : > { %6037 = vmatprep.mubr.bf16.mxu1 %v12176_v27 }
 0xd4c   : > { %5965 = vmatpush1.bf16.msra.mxu0 %v11005_v49 }
 0xd4d   : > { %6008 = vmatpush1.bf16.msra.mxu1 %v11015_v53  ;;  %6048 = vmatprep.subr.bf16.mxu0 %v11019_v55 }
 0xd4e   : > { %6091 = vmatprep.subr.bf16.mxu1 %v11028_v58 }
 0xd4f   : > { %7867 = vmatmul.mubr.msk.bf16.vlgmr.msra.gmra.mrb[16].mxu0 %vm5073_vm3, %v5958_v24 }
 0xd50   : > { %7868 = vmatmul.mubr.msk.bf16.vlgmr.msra.gmra.mrb[16].mxu1 %vm5073_vm3, %v5958_v24  ;;  %6049 = vmatpush1.bf16.msra.mxu0 %v11039_v61 }
 0xd51   : > { %6092 = vmatpush1.bf16.msra.mxu1 %v11043_v1  ;;  %6050 = vmatprep.subr.bf16.mxu0 %v11045_v62 }
 0xd52   : > { %6093 = vmatprep.subr.bf16.mxu1 %v11048_v2  ;;  %6080 = vmatprep.mubr.bf16.mxu0 %v12176_v27 }
 0xd53   : > { %6123 = vmatprep.mubr.bf16.mxu1 %v12176_v27 }
 0xd54   : > { %6051 = vmatpush1.bf16.msra.mxu0 %v11055_v38 }
 0xd55   : > { %6094 = vmatpush1.bf16.msra.mxu1 %v11064_v3  ;;  %8288 = vmatprep.subr.bf16.mxu0 %v11060_v43  ;;  %v12177_v43 = vld [vmem:[#allocation27_spill] sm:$0xff] }
 0xd56   : > { %8310 = vmatprep.subr.bf16.mxu1 %v11069_v5  ;;  %v12178_v5 = vld [vmem:[#allocation28_spill] sm:$0xff] }
 0xd57   : > { %7869 = vmatmul.mubr.msk.bf16.vlgmr.msra.gmra.mrb[20].mxu0 %vm5073_vm3, %v5958_v24 }
 0xd58   : > { %7870 = vmatmul.mubr.msk.bf16.vlgmr.msra.gmra.mrb[20].mxu1 %vm5073_vm3, %v5958_v24  ;;  %8289 = vmatpush3.bf16.msra.mxu0 %v11076_v6  ;;  %v12179_v6 = vld [vmem:[#allocation29_spill] sm:$0xff] }
 0xd59   : > { %8311 = vmatpush3.bf16.msra.mxu1 %v11082_v7  ;;  %8290 = vmatprep.subr.bf16.mxu0 %v11088_v8  ;;  %v12180_v7 = vld [vmem:[#allocation30_spill] sm:$0xff]  ;;  %v12181_v8 = vld [vmem:[#allocation31_spill] sm:$0xff]  ;;  %v12191_v24 = vld [vmem:[#allocation41_spill] sm:$0xff] }
 0xd5a   : > { %8312 = vmatprep.subr.bf16.mxu1 %v11095_v0  ;;  %v12182_v0 = vld [vmem:[#allocation32_spill] sm:$0xff] }
 0xd5c   : > { %8291 = vmatpush3.bf16.msra.mxu0 %v11101_v10  ;;  %v12183_v10 = vld [vmem:[#allocation33_spill] sm:$0xff] }
 0xd5d   : > { %8313 = vmatpush3.bf16.msra.mxu1 %v11108_v11  ;;  %8292 = vmatprep.subr.bf16.mxu0 %v11116_v9  ;;  %v12184_v11 = vld [vmem:[#allocation34_spill] sm:$0xff]  ;;  %v12185_v9 = vld [vmem:[#allocation35_spill] sm:$0xff] }
 0xd5e   : > { %8314 = vmatprep.subr.bf16.mxu1 %v11123_v13  ;;  %v12186_v13 = vld [vmem:[#allocation36_spill] sm:$0xff] }
 0xd60   : > { %8293 = vmatpush3.bf16.msra.mxu0 %v11129_v35  ;;  %v12187_v35 = vld [vmem:[#allocation37_spill] sm:$0xff] }
 0xd61   : > { %8315 = vmatpush3.bf16.msra.mxu1 %v11134_v14  ;;  %8294 = vmatprep.subr.bf16.mxu0 %v11140_v15  ;;  %v12188_v14 = vld [vmem:[#allocation38_spill] sm:$0xff] }
 0xd62   : > { %8316 = vmatprep.subr.bf16.mxu1 %v11147_v63 }
 0xd64   : > { %8295 = vmatpush3.bf16.msra.mxu0 %v11153_v4 }
 0xd65   : > { %8317 = vmatpush3.bf16.msra.mxu1 %v11158_v16  ;;  %8296 = vmatprep.subr.bf16.mxu0 %v11164_v18 }
 0xd66   : > { %8318 = vmatprep.subr.bf16.mxu1 %v11171_v19 }
 0xd68   : > { %8297 = vmatpush3.bf16.msra.mxu0 %v12177_v43 }
 0xd69   : > { %8319 = vmatpush3.bf16.msra.mxu1 %v12178_v5  ;;  %8298 = vmatprep.subr.bf16.mxu0 %v12179_v6 }
 0xd6a   : > { %8320 = vmatprep.subr.bf16.mxu1 %v12180_v7 }
 0xd6c   : > { %8299 = vmatpush3.bf16.msra.mxu0 %v12181_v8  ;;  %v12192_v8 = vld [vmem:[#allocation42_spill] sm:$0xff] }
 0xd6d   : > { %8321 = vmatpush3.bf16.msra.mxu1 %v12182_v0  ;;  %8300 = vmatprep.subr.bf16.mxu0 %v12183_v10  ;;  %v12193_v10 = vld [vmem:[#allocation12_spill] sm:$0xff] }
 0xd6e   : > { %8322 = vmatprep.subr.bf16.mxu1 %v12184_v11  ;;  %6687 = vrot.lane.b32.xlu1 %v12193_v10, %s9686_s19 }
 0xd70   : > { %8301 = vmatpush3.bf16.msra.mxu0 %v12185_v9 }
 0xd71   : > { %8323 = vmatpush3.bf16.msra.mxu1 %v12186_v13  ;;  %8302 = vmatprep.subr.bf16.mxu0 %v12187_v35  ;;  %v11554_v35 = vld [vmem:[%s12019_s16] ss:$0 sm:$0xff] }
 0xd72   : > { %8324 = vmatprep.subr.bf16.mxu1 %v12188_v14  ;;  %12194 = vst [vmem:[#allocation12_spill] sm:$0xff] %v11554_v35 }
 0xd74   : > { %8303 = vmatpush3.bf16.msra.mxu0 %v12189_v52 }
 0xd75   : > { %8325 = vmatpush3.bf16.msra.mxu1 %v12190_v56  ;;  %8332 = vmatprep.subr.bf16.mxu0 %v12191_v24 }
 0xd76   : > { %8354 = vmatprep.subr.bf16.mxu1 %v12192_v8 }
 0xdfa   : > { %v8216_v11 = vpop.f32.mrb[8].mxu0 }
 0xdfb   : > { %v8238_v9 = vpop.f32.mrb[8].mxu1  ;;  %v8217_v14 = vpop.f32.mrb[9].mxu0 }
 0xdfc   : > { %v8218_v13 = vadd.f32 %v8217_v14, %v8216_v11  ;;  %v8239_v52 = vpop.f32.mrb[9].mxu1  ;;  %v8219_v0 = vpop.f32.mrb[10].mxu0 }
 0xdfd   : > { %v8240_v56 = vadd.f32 %v8239_v52, %v8238_v9  ;;  %v8241_v7 = vpop.f32.mrb[10].mxu1  ;;  %v8220_v24 = vpop.f32.mrb[11].mxu0 }
 0xdfe   : > { %v5827_v8 = vadd.f32 %v8218_v13, %v11554_v35  ;;  %v8221_v6 = vadd.f32 %v8220_v24, %v8219_v0  ;;  %v8242_v5 = vpop.f32.mrb[11].mxu1 }
 0xdff   : > { %v8243_v43 = vadd.f32 %v8242_v5, %v8241_v7 }
 0xe00   : > { %v5868_v10 = vadd.f32 %v8240_v56, %v5827_v8  ;;  %v5830_v19 = vadd.f32 %v8221_v6, %v11554_v35 }
 0xe02   : > { %v5871_v18 = vadd.f32 %v8243_v43, %v5830_v19  ;;  %v12197_v19 = vld [vmem:[#allocation43_spill] sm:$0xff] }
 0xe1a   : > { %v8260_v16 = vpop.f32.mrb[12].mxu0 }
 0xe1b   : > { %v8282_v4 = vpop.f32.mrb[12].mxu1  ;;  %v8261_v63 = vpop.f32.mrb[13].mxu0 }
 0xe1c   : > { %v8262_v15 = vadd.f32 %v8261_v63, %v8260_v16  ;;  %v8283_v3 = vpop.f32.mrb[13].mxu1  ;;  %v8263_v11 = vpop.f32.mrb[14].mxu0  ;;  %v12198_v63 = vld [vmem:[#allocation44_spill] sm:$0xff] }
 0xe1d   : > { %v8284_v14 = vadd.f32 %v8283_v3, %v8282_v4  ;;  %v8285_v38 = vpop.f32.mrb[14].mxu1  ;;  %v8264_v9 = vpop.f32.mrb[15].mxu0 }
 0xe1e   : > { %v5909_v52 = vadd.f32 %v8262_v15, %v5868_v10  ;;  %v8265_v2 = vadd.f32 %v8264_v9, %v8263_v11  ;;  %v8286_v62 = vpop.f32.mrb[15].mxu1 }
 0xe1f   : > { %v8287_v13 = vadd.f32 %v8286_v62, %v8285_v38 }
 0xe20   : > { %v11558_v0 = vadd.f32 %v8284_v14, %v5909_v52  ;;  %v5912_v5 = vadd.f32 %v8265_v2, %v5871_v18 }
 0xe22   : > { %12195 = vst [vmem:[#allocation55_spill] sm:$0xff] %v11558_v0  ;;  %v11560_v7 = vadd.f32 %v8287_v13, %v5912_v5  ;;  %v5996_v6 = vpop.f32.mrb[16].mxu0 }
 0xe23   : > { %v5997_v43 = vadd.f32 %v5996_v6, %v12197_v19  ;;  %v6039_v8 = vpop.f32.mrb[16].mxu1  ;;  %v5998_v56 = vpop.f32.mrb[17].mxu0 }
 0xe24   : > { %12196 = vst [vmem:[#allocation56_spill] sm:$0xff] %v11560_v7  ;;  %v6040_v16 = vadd.f32 %v6039_v8, %v12198_v63  ;;  %v5999_v3 = vadd.f32 %v5998_v56, %v11283_v57  ;;  %v6041_v4 = vpop.f32.mrb[17].mxu1  ;;  %v6000_v24 = vpop.f32.mrb[18].mxu0 }
 0xe25   : > { %v6042_v15 = vadd.f32 %v6041_v4, %v11285_v59  ;;  %v6001_v62 = vadd.f32 %v6000_v24, %v12197_v19  ;;  %v6043_v38 = vpop.f32.mrb[18].mxu1  ;;  %v6002_v10 = vpop.f32.mrb[19].mxu0  ;;  %v6134_v14 = vmax.f32 %v5997_v43, 0.0 }
 0xe26   : > { %v6044_v2 = vadd.f32 %v6043_v38, %v12198_v63  ;;  %v6003_v18 = vadd.f32 %v6002_v10, %v11283_v57  ;;  %v6045_v11 = vpop.f32.mrb[19].mxu1  ;;  %v6136_v13 = vmax.f32 %v6040_v16, 0.0  ;;  %v6135_v5 = vmax.f32 %v5999_v3, 0.0 }
 0xe27   : > { %v6142_v9 = vmax.f32 %v6001_v62, 0.0  ;;  %v6046_v52 = vadd.f32 %v6045_v11, %v11285_v59  ;;  %v6137_v56 = vmax.f32 %v6042_v15, 0.0 }
 0xe28   : > { %v6144_v6 = vmax.f32 %v6044_v2, 0.0  ;;  %v6143_v8 = vmax.f32 %v6003_v18, 0.0 }
 0xe29   : > { %v6150_v7 = vpack.c.bf16 %v6142_v9, %v6134_v14  ;;  %v6145_v4 = vmax.f32 %v6046_v52, 0.0 }
 0xe2a   : > { %v6152_v0 = vpack.c.bf16 %v6144_v6, %v6136_v13  ;;  %v6151_v24 = vpack.c.bf16 %v6143_v8, %v6135_v5  ;;  %v6082_v19 = vpop.f32.mrb[20].mxu0 }
 0xe2b   : > { %v6153_v35 = vpack.c.bf16 %v6145_v4, %v6137_v56  ;;  %v6083_v38 = vadd.f32 %v6082_v19, %v11292_v25  ;;  %v6125_v63 = vpop.f32.mrb[20].mxu1  ;;  %v6084_v10 = vpop.f32.mrb[21].mxu0 }
 0xe2c   : > { %v6126_v43 = vadd.f32 %v6125_v63, %v11299_v20  ;;  %v6085_v62 = vadd.f32 %v6084_v10, %v11296_v51  ;;  %v6127_v11 = vpop.f32.mrb[21].mxu1  ;;  %v6086_v16 = vpop.f32.mrb[22].mxu0  ;;  %6190 = vmatprep.mubr.bf16.mxu0 %v6151_v24  ;;  %v12199_v10 = vld [vmem:[#allocation45_spill] sm:$0xff] }
 0xe2d   : > { %v6128_v3 = vadd.f32 %v6127_v11, %v11301_v31  ;;  %v6087_v15 = vadd.f32 %v6086_v16, %v11292_v25  ;;  %v6129_v2 = vpop.f32.mrb[22].mxu1  ;;  %6231 = vmatprep.mubr.bf16.mxu1 %v6153_v35  ;;  %v6088_v18 = vpop.f32.mrb[23].mxu0  ;;  %6191 = vmatmul.mubr.bf16.vlgmr.msra.gmra.mrb[24].mxu0 %v6150_v7  ;;  %v6138_v63 = vmax.f32 %v6083_v38, 0.0  ;;  %v12202_v11 = vld [vmem:[#allocation48_spill] sm:$0xff]  ;;  %v12203_v16 = vld [vmem:[#allocation49_spill] sm:$0xff] }
 0xe2e   : > { %v6130_v14 = vadd.f32 %v6129_v2, %v11299_v20  ;;  %v6089_v19 = vadd.f32 %v6088_v18, %v11296_v51  ;;  %v6131_v9 = vpop.f32.mrb[23].mxu1  ;;  %6232 = vmatmul.mubr.bf16.vlgmr.msra.gmra.mrb[24].mxu1 %v6152_v0  ;;  %8333 = vmatpush3.bf16.msra.mxu0 %v11306_v54  ;;  %v6140_v5 = vmax.f32 %v6126_v43, 0.0  ;;  %v6139_v35 = vmax.f32 %v6085_v62, 0.0  ;;  %v12200_v43 = vld [vmem:[#allocation46_spill] sm:$0xff]  ;;  %v12201_v62 = vld [vmem:[#allocation47_spill] sm:$0xff]  ;;  %v12206_v2 = vld [vmem:[#allocation52_spill] sm:$0xff] }
 0xe2f   : > { %v6146_v52 = vmax.f32 %v6087_v15, 0.0  ;;  %v6132_v13 = vadd.f32 %v6131_v9, %v11301_v31  ;;  %8355 = vmatpush3.bf16.msra.mxu1 %v11311_v29  ;;  %8334 = vmatprep.subr.bf16.mxu0 %v11316_v17  ;;  %v6141_v8 = vmax.f32 %v6128_v3, 0.0  ;;  %v12204_v3 = vld [vmem:[#allocation50_spill] sm:$0xff]  ;;  %v12205_v15 = vld [vmem:[#allocation51_spill] sm:$0xff]  ;;  %v12207_v18 = vld [vmem:[#allocation53_spill] sm:$0xff] }
 0xe30   : > { %v6148_v6 = vmax.f32 %v6130_v14, 0.0  ;;  %v6147_v7 = vmax.f32 %v6089_v19, 0.0  ;;  %8356 = vmatprep.subr.bf16.mxu1 %v11322_v23  ;;  %v12208_v14 = vld [vmem:[#allocation54_spill] sm:$0xff]  ;;  %v6323_v19 = vpop.permute.xlu0 %6322  ;;  %v12209_v9 = vld [vmem:[#allocation17_spill] sm:$0xff] }
 0xe31   : > { %v6154_v56 = vpack.c.bf16 %v6146_v52, %v6138_v63  ;;  %v6149_v4 = vmax.f32 %v6132_v13, 0.0  ;;  %v12210_v63 = vld [vmem:[#allocation18_spill] sm:$0xff]  ;;  %v12211_v52 = vld [vmem:[#allocation19_spill] sm:$0xff]  ;;  %v12212_v13 = vld [vmem:[#allocation20_spill] sm:$0xff] }
 0xe32   : > { %v6156_v0 = vpack.c.bf16 %v6148_v6, %v6140_v5  ;;  %v6155_v24 = vpack.c.bf16 %v6147_v7, %v6139_v35  ;;  %8335 = vmatpush3.bf16.msra.mxu0 %v11332_v33  ;;  %v11633_v5 = vld [vmem:[%s12018_s15 + $0x40] sm:$0xff]  }
 0xe33   : > { %v6157_v38 = vpack.c.bf16 %v6149_v4, %v6141_v8  ;;  %8357 = vmatpush3.bf16.msra.mxu1 %v11341_v50  ;;  %8336 = vmatprep.subr.bf16.mxu0 %v11346_v41  ;;  %12213 = vst [vmem:[#allocation45_spill] sm:$0xff] %v11633_v5  ;;  %v11639_v35 = vld [vmem:[%s12018_s15 + $0xc0] sm:$0xff]   ;;  %v11659_v8 = vld [vmem:[%s12018_s15 + $0x48] sm:$0xff]  }
 0xe34   : > { %6272 = vmatprep.mubr.bf16.mxu0 %v6155_v24  ;;  %8358 = vmatprep.subr.bf16.mxu1 %v11353_v22  ;;  %12214 = vst [vmem:[#allocation46_spill] sm:$0xff] %v11639_v35  ;;  %v11647_v6 = vld [vmem:[%s12018_s15] sm:$0xff]   ;;  %12217 = vst [vmem:[#allocation49_spill] sm:$0xff] %v11659_v8  ;;  %v11671_v4 = vld [vmem:[%s12018_s15 + $0x8] sm:$0xff]  }
 0xe35   : > { %6313 = vmatprep.mubr.bf16.mxu1 %v6157_v38  ;;  %12215 = vst [vmem:[#allocation47_spill] sm:$0xff] %v11647_v6  ;;  %v11653_v7 = vld [vmem:[%s12018_s15 + $0x80] sm:$0xff]   ;;  %12219 = vst [vmem:[#allocation51_spill] sm:$0xff] %v11671_v4  ;;  %v11683_v24 = vld [vmem:[%s12018_s15 + $0x50] sm:$0xff]  }
 0xe36   : > { %8337 = vmatpush3.bf16.msra.mxu0 %v11359_v48  ;;  %12216 = vst [vmem:[#allocation48_spill] sm:$0xff] %v11653_v7  ;;  %12221 = vst [vmem:[#allocation53_spill] sm:$0xff] %v11683_v24  ;;  %v11689_v38 = vld [vmem:[%s12018_s15 + $0xd0] sm:$0xff]  }
 0xe37   : > { %8359 = vmatpush3.bf16.msra.mxu1 %v11366_v42  ;;  %8338 = vmatprep.subr.bf16.mxu0 %v11371_v47  ;;  %12222 = vst [vmem:[#allocation54_spill] sm:$0xff] %v11689_v38 }
 0xe38   : > { %8360 = vmatprep.subr.bf16.mxu1 %v11377_v28 }
 0xe3a   : > { %8339 = vmatpush3.bf16.msra.mxu0 %v11383_v44 }
 0xe3b   : > { %8361 = vmatpush3.bf16.msra.mxu1 %v11390_v26  ;;  %8340 = vmatprep.subr.bf16.mxu0 %v11395_v12 }
 0xe3c   : > { %8362 = vmatprep.subr.bf16.mxu1 %v12199_v10 }
 0xe3e   : > { %8341 = vmatpush3.bf16.msra.mxu0 %v12200_v43 }
 0xe3f   : > { %8363 = vmatpush3.bf16.msra.mxu1 %v12201_v62  ;;  %8342 = vmatprep.subr.bf16.mxu0 %v12202_v11 }
 0xe40   : > { %8364 = vmatprep.subr.bf16.mxu1 %v12203_v16 }
 0xe42   : > { %8343 = vmatpush3.bf16.msra.mxu0 %v12204_v3 }
 0xe43   : > { %8365 = vmatpush3.bf16.msra.mxu1 %v11438_v60  ;;  %8344 = vmatprep.subr.bf16.mxu0 %v12205_v15 }
 0xe44   : > { %8366 = vmatprep.subr.bf16.mxu1 %v12206_v2 }
 0xe46   : > { %8345 = vmatpush3.bf16.msra.mxu0 %v11455_v46 }
 0xe47   : > { %8367 = vmatpush3.bf16.msra.mxu1 %v11462_v37  ;;  %8346 = vmatprep.subr.bf16.mxu0 %v12207_v18 }
 0xe48   : > { %8368 = vmatprep.subr.bf16.mxu1 %v11473_v34 }
 0xe4a   : > { %8347 = vmatpush3.bf16.msra.mxu0 %v11479_v21 }
 0xe4b   : > { %8369 = vmatpush3.bf16.msra.mxu1 %v12208_v14  ;;  %6327 = vmatprep.subr.bf16.mxu0 %v10967_v30 }
 0xe4c   : > { %6370 = vmatprep.subr.bf16.mxu1 %v10982_v39 }
 0xe4d   : > { %6273 = vmatmul.mubr.bf16.vlgmr.msra.gmra.mrb[28].mxu0 %v6154_v56  ;;  %v11665_v56 = vld [vmem:[%s12018_s15 + $0xc8] sm:$0xff]  }
 0xe4e   : > { %6314 = vmatmul.mubr.bf16.vlgmr.msra.gmra.mrb[28].mxu1 %v6156_v0  ;;  %6328 = vmatpush1.bf16.msra.mxu0 %v10972_v32  ;;  %12218 = vst [vmem:[#allocation50_spill] sm:$0xff] %v11665_v56  ;;  %v11677_v0 = vld [vmem:[%s12018_s15 + $0x88] sm:$0xff]  }
 0xe4f   : > { %6371 = vmatpush1.bf16.msra.mxu1 %v10984_v40  ;;  %6329 = vmatprep.subr.bf16.mxu0 %v10986_v36  ;;  %12220 = vst [vmem:[#allocation52_spill] sm:$0xff] %v11677_v0 }
 0xe50   : > { %6372 = vmatprep.subr.bf16.mxu1 %v10995_v45  ;;  %6359 = vmatprep.mubr.bf16.mxu0 %v12176_v27 }
 0xe51   : > { %6402 = vmatprep.mubr.bf16.mxu1 %v12176_v27 }
 0xe52   : > { %6330 = vmatpush1.bf16.msra.mxu0 %v11005_v49 }
 0xe53   : > { %6373 = vmatpush1.bf16.msra.mxu1 %v11015_v53  ;;  %6413 = vmatprep.subr.bf16.mxu0 %v11019_v55 }
 0xe54   : > { %6456 = vmatprep.subr.bf16.mxu1 %v11028_v58 }
 0xe55   : > { %7871 = vmatmul.mubr.msk.bf16.vlgmr.msra.gmra.mrb[32].mxu0 %vm5073_vm3, %v6323_v19 }
 0xe56   : > { %7872 = vmatmul.mubr.msk.bf16.vlgmr.msra.gmra.mrb[32].mxu1 %vm5073_vm3, %v6323_v19  ;;  %6414 = vmatpush1.bf16.msra.mxu0 %v11039_v61 }
 0xe57   : > { %6457 = vmatpush1.bf16.msra.mxu1 %v11043_v1  ;;  %6415 = vmatprep.subr.bf16.mxu0 %v12209_v9 }
 0xe58   : > { %6458 = vmatprep.subr.bf16.mxu1 %v12210_v63  ;;  %6445 = vmatprep.mubr.bf16.mxu0 %v12176_v27 }
 0xe59   : > { %6488 = vmatprep.mubr.bf16.mxu1 %v12176_v27 }
 0xe5a   : > { %6416 = vmatpush1.bf16.msra.mxu0 %v12211_v52 }
 0xe5b   : > { %6459 = vmatpush1.bf16.msra.mxu1 %v12212_v13  ;;  %8376 = vmatprep.subr.bf16.mxu0 %v11633_v5  ;;  %v12234_v5 = vld [vmem:[#allocation30_spill] sm:$0xff] }
 0xe5c   : > { %8398 = vmatprep.subr.bf16.mxu1 %v11639_v35  ;;  %v12233_v35 = vld [vmem:[#allocation29_spill] sm:$0xff] }
 0xe5d   : > { %7873 = vmatmul.mubr.msk.bf16.vlgmr.msra.gmra.mrb[36].mxu0 %vm5073_vm3, %v6323_v19 }
 0xe5e   : > { %7874 = vmatmul.mubr.msk.bf16.vlgmr.msra.gmra.mrb[36].mxu1 %vm5073_vm3, %v6323_v19  ;;  %8377 = vmatpush3.bf16.msra.mxu0 %v11647_v6  ;;  %v11695_v19 = vld [vmem:[%s12018_s15 + $0x10] sm:$0xff]   ;;  %v12232_v6 = vld [vmem:[#allocation28_spill] sm:$0xff] }
 0xe5f   : > { %8399 = vmatpush3.bf16.msra.mxu1 %v11653_v7  ;;  %8378 = vmatprep.subr.bf16.mxu0 %v11659_v8  ;;  %12223 = vst [vmem:[#allocation57_spill] sm:$0xff] %v11695_v19  ;;  %v12229_v8 = vld [vmem:[#allocation25_spill] sm:$0xff]  ;;  %v12230_v7 = vld [vmem:[#allocation26_spill] sm:$0xff] }
 0xe60   : > { %8400 = vmatprep.subr.bf16.mxu1 %v11665_v56  ;;  %v12227_v56 = vld [vmem:[#allocation23_spill] sm:$0xff] }
 0xe62   : > { %8379 = vmatpush3.bf16.msra.mxu0 %v11671_v4  ;;  %v12226_v4 = vld [vmem:[#allocation22_spill] sm:$0xff] }
 0xe63   : > { %8401 = vmatpush3.bf16.msra.mxu1 %v11677_v0  ;;  %8380 = vmatprep.subr.bf16.mxu0 %v11683_v24  ;;  %v11701_v0 = vld [vmem:[%s12018_s15 + $0x90] sm:$0xff]   ;;  %v12225_v24 = vld [vmem:[#allocation21_spill] sm:$0xff] }
 0xe64   : > { %8402 = vmatprep.subr.bf16.mxu1 %v11689_v38  ;;  %12224 = vst [vmem:[#allocation58_spill] sm:$0xff] %v11701_v0  ;;  %v12228_v38 = vld [vmem:[#allocation24_spill] sm:$0xff] }
 0xe66   : > { %8381 = vmatpush3.bf16.msra.mxu0 %v11695_v19  ;;  %v12231_v19 = vld [vmem:[#allocation27_spill] sm:$0xff] }
 0xe67   : > { %8403 = vmatpush3.bf16.msra.mxu1 %v11701_v0  ;;  %8382 = vmatprep.subr.bf16.mxu0 %v12225_v24  ;;  %v12235_v0 = vld [vmem:[#allocation31_spill] sm:$0xff]  ;;  %v12236_v24 = vld [vmem:[#allocation32_spill] sm:$0xff] }
 0xe68   : > { %8404 = vmatprep.subr.bf16.mxu1 %v12226_v4  ;;  %v12237_v4 = vld [vmem:[#allocation33_spill] sm:$0xff] }
 0xe6a   : > { %8383 = vmatpush3.bf16.msra.mxu0 %v12227_v56  ;;  %v12238_v56 = vld [vmem:[#allocation34_spill] sm:$0xff] }
 0xe6b   : > { %8405 = vmatpush3.bf16.msra.mxu1 %v12228_v38  ;;  %8384 = vmatprep.subr.bf16.mxu0 %v12229_v8  ;;  %v12239_v38 = vld [vmem:[#allocation35_spill] sm:$0xff]  ;;  %v12240_v8 = vld [vmem:[#allocation36_spill] sm:$0xff] }
 0xe6c   : > { %8406 = vmatprep.subr.bf16.mxu1 %v12230_v7  ;;  %v12241_v7 = vld [vmem:[#allocation37_spill] sm:$0xff] }
 0xe6e   : > { %8385 = vmatpush3.bf16.msra.mxu0 %v12231_v19  ;;  %v12242_v19 = vld [vmem:[#allocation38_spill] sm:$0xff] }
 0xe6f   : > { %8407 = vmatpush3.bf16.msra.mxu1 %v12232_v6  ;;  %8386 = vmatprep.subr.bf16.mxu0 %v12233_v35  ;;  %v12243_v6 = vld [vmem:[#allocation39_spill] sm:$0xff]  ;;  %v12244_v35 = vld [vmem:[#allocation40_spill] sm:$0xff] }
 0xe70   : > { %8408 = vmatprep.subr.bf16.mxu1 %v12234_v5  ;;  %v12245_v5 = vld [vmem:[#allocation41_spill] sm:$0xff] }
 0xe72   : > { %8387 = vmatpush3.bf16.msra.mxu0 %v12235_v0  ;;  %v12246_v0 = vld [vmem:[#allocation42_spill] sm:$0xff] }
 0xe73   : > { %8409 = vmatpush3.bf16.msra.mxu1 %v12236_v24  ;;  %8388 = vmatprep.subr.bf16.mxu0 %v12237_v4 }
 0xe74   : > { %8410 = vmatprep.subr.bf16.mxu1 %v12238_v56 }
 0xe76   : > { %8389 = vmatpush3.bf16.msra.mxu0 %v12239_v38 }
 0xe77   : > { %8411 = vmatpush3.bf16.msra.mxu1 %v12240_v8  ;;  %8390 = vmatprep.subr.bf16.mxu0 %v12241_v7  ;;  %v12247_v7 = vld [vmem:[#allocation12_spill] sm:$0xff] }
 0xe78   : > { %8412 = vmatprep.subr.bf16.mxu1 %v12242_v19 }
 0xe7a   : > { %8391 = vmatpush3.bf16.msra.mxu0 %v12243_v6 }
 0xe7b   : > { %8413 = vmatpush3.bf16.msra.mxu1 %v12244_v35  ;;  %8420 = vmatprep.subr.bf16.mxu0 %v12245_v5 }
 0xe7c   : > { %8442 = vmatprep.subr.bf16.mxu1 %v12246_v0 }
 0xf00   : > { %v8304_v24 = vpop.f32.mrb[24].mxu0 }
 0xf01   : > { %v8326_v4 = vpop.f32.mrb[24].mxu1  ;;  %v8305_v13 = vpop.f32.mrb[25].mxu0 }
 0xf02   : > { %v8306_v56 = vadd.f32 %v8305_v13, %v8304_v24  ;;  %v8327_v52 = vpop.f32.mrb[25].mxu1  ;;  %v8307_v38 = vpop.f32.mrb[26].mxu0 }
 0xf03   : > { %v8328_v63 = vadd.f32 %v8327_v52, %v8326_v4  ;;  %v8329_v8 = vpop.f32.mrb[26].mxu1  ;;  %v8308_v9 = vpop.f32.mrb[27].mxu0 }
 0xf04   : > { %v6193_v1 = vadd.f32 %v8306_v56, %v12247_v7  ;;  %v8309_v19 = vadd.f32 %v8308_v9, %v8307_v38  ;;  %v8330_v61 = vpop.f32.mrb[27].mxu1 }
 0xf05   : > { %v8331_v6 = vadd.f32 %v8330_v61, %v8329_v8 }
 0xf06   : > { %v6234_v58 = vadd.f32 %v8328_v63, %v6193_v1  ;;  %v6196_v35 = vadd.f32 %v8309_v19, %v12247_v7  ;;  %v12248_v63 = vld [vmem:[#allocation43_spill] sm:$0xff] }
 0xf08   : > { %v6237_v5 = vadd.f32 %v8331_v6, %v6196_v35 }
 0xf20   : > { %v8348_v55 = vpop.f32.mrb[28].mxu0 }
 0xf21   : > { %v8370_v0 = vpop.f32.mrb[28].mxu1  ;;  %v8349_v53 = vpop.f32.mrb[29].mxu0 }
 0xf22   : > { %v8350_v49 = vadd.f32 %v8349_v53, %v8348_v55  ;;  %v8371_v27 = vpop.f32.mrb[29].mxu1  ;;  %v8351_v13 = vpop.f32.mrb[30].mxu0  ;;  %v12249_v53 = vld [vmem:[#allocation44_spill] sm:$0xff] }
 0xf23   : > { %v8372_v24 = vadd.f32 %v8371_v27, %v8370_v0  ;;  %v8373_v45 = vpop.f32.mrb[30].mxu1  ;;  %v8352_v52 = vpop.f32.mrb[31].mxu0 }
 0xf24   : > { %v6275_v4 = vadd.f32 %v8350_v49, %v6234_v58  ;;  %v8353_v36 = vadd.f32 %v8352_v52, %v8351_v13  ;;  %v8374_v40 = vpop.f32.mrb[31].mxu1 }
 0xf25   : > { %v8375_v56 = vadd.f32 %v8374_v40, %v8373_v45 }
 0xf26   : > { %v6316_v9 = vadd.f32 %v8372_v24, %v6275_v4  ;;  %v6278_v38 = vadd.f32 %v8353_v36, %v6237_v5 }
 0xf28   : > { %v6319_v61 = vadd.f32 %v8375_v56, %v6278_v38  ;;  %v6361_v1 = vpop.f32.mrb[32].mxu0  ;;  %7054 = vrot.lane.b32.xlu1 %v6316_v9, %s9686_s19 }
 0xf29   : > { %v6362_v8 = vadd.f32 %v6361_v1, %v12248_v63  ;;  %v6404_v19 = vpop.f32.mrb[32].mxu1  ;;  %v6363_v6 = vpop.f32.mrb[33].mxu0 }
 0xf2a   : > { %v6405_v55 = vadd.f32 %v6404_v19, %v12249_v53  ;;  %v6364_v27 = vadd.f32 %v6363_v6, %v11283_v57  ;;  %v6406_v35 = vpop.f32.mrb[33].mxu1  ;;  %v6365_v0 = vpop.f32.mrb[34].mxu0  ;;  %7056 = vrot.lane.b32.xlu0 %v6319_v61, %s9686_s19 }
 0xf2b   : > { %v6407_v40 = vadd.f32 %v6406_v35, %v11285_v59  ;;  %v6366_v36 = vadd.f32 %v6365_v0, %v12248_v63  ;;  %v6408_v45 = vpop.f32.mrb[34].mxu1  ;;  %v6367_v49 = vpop.f32.mrb[35].mxu0  ;;  %v6499_v24 = vmax.f32 %v6362_v8, 0.0 }
 0xf2c   : > { %v6409_v58 = vadd.f32 %v6408_v45, %v12249_v53  ;;  %v6368_v5 = vadd.f32 %v6367_v49, %v11283_v57  ;;  %v6410_v13 = vpop.f32.mrb[35].mxu1  ;;  %v6501_v56 = vmax.f32 %v6405_v55, 0.0  ;;  %v6500_v9 = vmax.f32 %v6364_v27, 0.0 }
 0xf2d   : > { %v6507_v52 = vmax.f32 %v6366_v36, 0.0  ;;  %v6411_v4 = vadd.f32 %v6410_v13, %v11285_v59  ;;  %v6502_v61 = vmax.f32 %v6407_v40, 0.0 }
 0xf2e   : > { %v6509_v38 = vmax.f32 %v6409_v58, 0.0  ;;  %v6508_v1 = vmax.f32 %v6368_v5, 0.0 }
 0xf2f   : > { %v6515_v19 = vpack.c.bf16 %v6507_v52, %v6499_v24  ;;  %v6510_v6 = vmax.f32 %v6411_v4, 0.0 }
 0xf30   : > { %v6517_v35 = vpack.c.bf16 %v6509_v38, %v6501_v56  ;;  %v6516_v0 = vpack.c.bf16 %v6508_v1, %v6500_v9  ;;  %v6447_v63 = vpop.f32.mrb[36].mxu0 }
 0xf31   : > { %v6518_v7 = vpack.c.bf16 %v6510_v6, %v6502_v61  ;;  %v6448_v45 = vadd.f32 %v6447_v63, %v11292_v25  ;;  %v6490_v53 = vpop.f32.mrb[36].mxu1  ;;  %v6449_v49 = vpop.f32.mrb[37].mxu0 }
 0xf32   : > { %v6491_v8 = vadd.f32 %v6490_v53, %v11299_v20  ;;  %v6450_v36 = vadd.f32 %v6449_v49, %v11296_v51  ;;  %v6492_v13 = vpop.f32.mrb[37].mxu1  ;;  %v6451_v55 = vpop.f32.mrb[38].mxu0  ;;  %6555 = vmatprep.mubr.bf16.mxu0 %v6516_v0  ;;  %v9618_v49 = vld [vmem:[%s12018_s15 + $0x20] sm:$0xff]  }
 0xf33   : > { %v6493_v27 = vadd.f32 %v6492_v13, %v11301_v31  ;;  %v6452_v40 = vadd.f32 %v6451_v55, %v11292_v25  ;;  %v6494_v58 = vpop.f32.mrb[38].mxu1  ;;  %6596 = vmatprep.mubr.bf16.mxu1 %v6518_v7  ;;  %v6453_v5 = vpop.f32.mrb[39].mxu0  ;;  %6556 = vmatmul.mubr.bf16.vlgmr.msra.gmra.mrb[40].mxu0 %v6515_v19  ;;  %v6503_v53 = vmax.f32 %v6448_v45, 0.0  ;;  %v9617_v45 = vld [vmem:[%s12018_s15 + $0xe0] sm:$0xff]   ;;  %v9621_v13 = vld [vmem:[%s12018_s15 + $0xe8] sm:$0xff]  }
 0xf34   : > { %v6495_v24 = vadd.f32 %v6494_v58, %v11299_v20  ;;  %v6454_v63 = vadd.f32 %v6453_v5, %v11296_v51  ;;  %v6496_v52 = vpop.f32.mrb[39].mxu1  ;;  %6597 = vmatmul.mubr.bf16.vlgmr.msra.gmra.mrb[40].mxu1 %v6517_v35  ;;  %8421 = vmatpush3.bf16.msra.mxu0 %v11306_v54  ;;  %v6505_v9 = vmax.f32 %v6491_v8, 0.0  ;;  %v6504_v7 = vmax.f32 %v6450_v36, 0.0  ;;  %v9619_v8 = vld [vmem:[%s12018_s15 + $0xa0] sm:$0xff]   ;;  %v9620_v36 = vld [vmem:[%s12018_s15 + $0x68] sm:$0xff]   ;;  %v9625_v58 = vld [vmem:[%s12018_s15 + $0xf0] sm:$0xff]  }
 0xf35   : > { %v6511_v4 = vmax.f32 %v6452_v40, 0.0  ;;  %v6497_v56 = vadd.f32 %v6496_v52, %v11301_v31  ;;  %8443 = vmatpush3.bf16.msra.mxu1 %v11311_v29  ;;  %8422 = vmatprep.subr.bf16.mxu0 %v11316_v17  ;;  %v6506_v61 = vmax.f32 %v6493_v27, 0.0  ;;  %v12250_v29 = vld [vmem:[#allocation7_spill] sm:$0xff]  ;;  %v12251_v17 = vld [vmem:[#allocation8_spill] sm:$0xff]  ;;  %v9622_v55 = vld [vmem:[%s12018_s15 + $0x28] sm:$0xff]  }
 0xf36   : > { %v6513_v38 = vmax.f32 %v6495_v24, 0.0  ;;  %v6512_v1 = vmax.f32 %v6454_v63, 0.0  ;;  %8444 = vmatprep.subr.bf16.mxu1 %v11322_v23  ;;  %v12252_v23 = vld [vmem:[#allocation9_spill] sm:$0xff]  ;;  %v9623_v27 = vld [vmem:[%s12018_s15 + $0xa8] sm:$0xff]   ;;  %v9624_v40 = vld [vmem:[%s12018_s15 + $0x70] sm:$0xff]  }
 0xf37   : > { %v6519_v19 = vpack.c.bf16 %v6511_v4, %v6503_v53  ;;  %v6514_v6 = vmax.f32 %v6497_v56, 0.0  ;;  %v9626_v5 = vld [vmem:[%s12018_s15 + $0x30] sm:$0xff]   ;;  %v9628_v63 = vld [vmem:[%s12018_s15 + $0x78] sm:$0xff]   ;;  %v9632_v56 = vld [vmem:[%s12018_s15 + $0x140] sm:$0xff]  }
 0xf38   : > { %v6521_v35 = vpack.c.bf16 %v6513_v38, %v6505_v9  ;;  %v6520_v0 = vpack.c.bf16 %v6512_v1, %v6504_v7  ;;  %8423 = vmatpush3.bf16.msra.mxu0 %v11332_v33  ;;  %v12253_v33 = vmov 0   ;;  %v9627_v24 = vld [vmem:[%s12018_s15 + $0xb0] sm:$0xff]   ;;  %v9629_v52 = vld [vmem:[%s12018_s15 + $0xf8] sm:$0xff]   ;;  %v9633_v9 = vld [vmem:[%s12018_s15 + $0x1c0] sm:$0xff]  }
 0xf39   : > { %v6522_v54 = vpack.c.bf16 %v6514_v6, %v6506_v61  ;;  %8445 = vmatpush3.bf16.msra.mxu1 %v11341_v50  ;;  %8424 = vmatprep.subr.bf16.mxu0 %v11346_v41  ;;  %v12254_v50 = vld [vmem:[#allocation10_spill] sm:$0xff]  ;;  %v6688_v41 = vpop.permute.xlu1 %6687  ;;  %v9630_v53 = vld [vmem:[%s12018_s15 + $0x38] sm:$0xff]  }
 0xf3a   : > { %6637 = vmatprep.mubr.bf16.mxu0 %v6520_v0  ;;  %8446 = vmatprep.subr.bf16.mxu1 %v11353_v22  ;;  %v12257_v22 = vld [vmem:[#allocation14_spill] sm:$0xff]  ;;  %v9631_v4 = vld [vmem:[%s12018_s15 + $0xb8] sm:$0xff]  }
 0xf3b   : > { %6678 = vmatprep.mubr.bf16.mxu1 %v6522_v54 }
 0xf3c   : > { %8425 = vmatpush3.bf16.msra.mxu0 %v11359_v48  ;;  %v12259_v48 = vld [vmem:[#allocation16_spill] sm:$0xff] }
 0xf3d   : > { %8447 = vmatpush3.bf16.msra.mxu1 %v11366_v42  ;;  %8426 = vmatprep.subr.bf16.mxu0 %v11371_v47  ;;  %v12260_v42 = vld [vmem:[#allocation17_spill] sm:$0xff]  ;;  %v12261_v47 = vld [vmem:[#allocation18_spill] sm:$0xff] }
 0xf3e   : > { %8448 = vmatprep.subr.bf16.mxu1 %v11377_v28  ;;  %v12262_v28 = vld [vmem:[#allocation19_spill] sm:$0xff] }
 0xf40   : > { %8427 = vmatpush3.bf16.msra.mxu0 %v11383_v44  ;;  %v12263_v44 = vld [vmem:[#allocation20_spill] sm:$0xff] }
 0xf41   : > { %8449 = vmatpush3.bf16.msra.mxu1 %v11390_v26  ;;  %8428 = vmatprep.subr.bf16.mxu0 %v11395_v12  ;;  %v12264_v26 = vld [vmem:[#allocation45_spill] sm:$0xff]  ;;  %v12265_v12 = vld [vmem:[#allocation46_spill] sm:$0xff] }
 0xf42   : > { %8450 = vmatprep.subr.bf16.mxu1 %v12199_v10  ;;  %v12271_v10 = vld [vmem:[#allocation52_spill] sm:$0xff] }
 0xf44   : > { %8429 = vmatpush3.bf16.msra.mxu0 %v12200_v43  ;;  %v12272_v43 = vld [vmem:[#allocation53_spill] sm:$0xff] }
 0xf45   : > { %8451 = vmatpush3.bf16.msra.mxu1 %v12201_v62  ;;  %8430 = vmatprep.subr.bf16.mxu0 %v12202_v11  ;;  %v12273_v62 = vld [vmem:[#allocation54_spill] sm:$0xff]  ;;  %v12274_v11 = vld [vmem:[#allocation57_spill] sm:$0xff] }
 0xf46   : > { %8452 = vmatprep.subr.bf16.mxu1 %v12203_v16  ;;  %v12275_v16 = vld [vmem:[#allocation58_spill] sm:$0xff] }
 0xf48   : > { %8431 = vmatpush3.bf16.msra.mxu0 %v12204_v3  ;;  %v9612_v3 = vld [vmem:[%s12018_s15 + $0x58] sm:$0xff]  }
 0xf49   : > { %8453 = vmatpush3.bf16.msra.mxu1 %v11438_v60  ;;  %8432 = vmatprep.subr.bf16.mxu0 %v12205_v15  ;;  %v12270_v60 = vld [vmem:[#allocation51_spill] sm:$0xff]  ;;  %v9613_v15 = vld [vmem:[%s12018_s15 + $0xd8] sm:$0xff]  }
 0xf4a   : > { %8454 = vmatprep.subr.bf16.mxu1 %v12206_v2  ;;  %v9614_v2 = vld [vmem:[%s12018_s15 + $0x18] sm:$0xff]  }
 0xf4c   : > { %8433 = vmatpush3.bf16.msra.mxu0 %v11455_v46  ;;  %v12267_v46 = vld [vmem:[#allocation48_spill] sm:$0xff] }
 0xf4d   : > { %8455 = vmatpush3.bf16.msra.mxu1 %v11462_v37  ;;  %8434 = vmatprep.subr.bf16.mxu0 %v12207_v18  ;;  %v12268_v37 = vld [vmem:[#allocation49_spill] sm:$0xff]  ;;  %v9615_v18 = vld [vmem:[%s12018_s15 + $0x98] sm:$0xff]  }
 0xf4e   : > { %8456 = vmatprep.subr.bf16.mxu1 %v11473_v34  ;;  %v12269_v34 = vld [vmem:[#allocation50_spill] sm:$0xff] }
 0xf50   : > { %8435 = vmatpush3.bf16.msra.mxu0 %v11479_v21  ;;  %v12266_v21 = vld [vmem:[#allocation47_spill] sm:$0xff] }
 0xf51   : > { %8457 = vmatpush3.bf16.msra.mxu1 %v12208_v14  ;;  %6692 = vmatprep.subr.bf16.mxu0 %v10967_v30  ;;  %v12255_v30 = vld [vmem:[#allocation11_spill] sm:$0xff]  ;;  %v9616_v14 = vld [vmem:[%s12018_s15 + $0x60] sm:$0xff]  }
 0xf52   : > { %6735 = vmatprep.subr.bf16.mxu1 %v10982_v39  ;;  %v12256_v39 = vld [vmem:[#allocation13_spill] sm:$0xff] }
 0xf53   : > { %6638 = vmatmul.mubr.bf16.vlgmr.msra.gmra.mrb[44].mxu0 %v6519_v19 }
 0xf54   : > { %6679 = vmatmul.mubr.bf16.vlgmr.msra.gmra.mrb[44].mxu1 %v6521_v35  ;;  %6693 = vmatpush1.bf16.msra.mxu0 %v10972_v32  ;;  %v12258_v32 = vld [vmem:[#allocation15_spill] sm:$0xff] }
 0xf55   : > { %6736 = vmatpush1.bf16.msra.mxu1 %v12250_v29  ;;  %6694 = vmatprep.subr.bf16.mxu0 %v12251_v17  ;;  %v12276_v29 = vld [vmem:[#allocation12_spill] sm:$0xff] }
 0xf56   : > { %6737 = vmatprep.subr.bf16.mxu1 %v12252_v23  ;;  %6724 = vmatprep.mubr.bf16.mxu0 %v12253_v33 }
 0xf57   : > { %6767 = vmatprep.mubr.bf16.mxu1 %v12253_v33 }
 0xf58   : > { %6695 = vmatpush1.bf16.msra.mxu0 %v12254_v50 }
 0xf59   : > { %6738 = vmatpush1.bf16.msra.mxu1 %v12255_v30  ;;  %6778 = vmatprep.subr.bf16.mxu0 %v12256_v39 }
 0xf5a   : > { %6821 = vmatprep.subr.bf16.mxu1 %v12257_v22 }
 0xf5b   : > { %7875 = vmatmul.mubr.msk.bf16.vlgmr.msra.gmra.mrb[48].mxu0 %vm5073_vm3, %v6688_v41 }
 0xf5c   : > { %7876 = vmatmul.mubr.msk.bf16.vlgmr.msra.gmra.mrb[48].mxu1 %vm5073_vm3, %v6688_v41  ;;  %6779 = vmatpush1.bf16.msra.mxu0 %v12258_v32 }
 0xf5d   : > { %6822 = vmatpush1.bf16.msra.mxu1 %v12259_v48  ;;  %6780 = vmatprep.subr.bf16.mxu0 %v12260_v42 }
 0xf5e   : > { %6823 = vmatprep.subr.bf16.mxu1 %v12261_v47  ;;  %6810 = vmatprep.mubr.bf16.mxu0 %v12253_v33 }
 0xf5f   : > { %6853 = vmatprep.mubr.bf16.mxu1 %v12253_v33 }
 0xf60   : > { %6781 = vmatpush1.bf16.msra.mxu0 %v12262_v28 }
 0xf61   : > { %6824 = vmatpush1.bf16.msra.mxu1 %v12263_v44  ;;  %8464 = vmatprep.subr.bf16.mxu0 %v12264_v26 }
 0xf62   : > { %8486 = vmatprep.subr.bf16.mxu1 %v12265_v12 }
 0xf63   : > { %7877 = vmatmul.mubr.msk.bf16.vlgmr.msra.gmra.mrb[52].mxu0 %vm5073_vm3, %v6688_v41 }
 0xf64   : > { %7878 = vmatmul.mubr.msk.bf16.vlgmr.msra.gmra.mrb[52].mxu1 %vm5073_vm3, %v6688_v41  ;;  %8465 = vmatpush3.bf16.msra.mxu0 %v12266_v21 }
 0xf65   : > { %8487 = vmatpush3.bf16.msra.mxu1 %v12267_v46  ;;  %8466 = vmatprep.subr.bf16.mxu0 %v12268_v37 }
 0xf66   : > { %8488 = vmatprep.subr.bf16.mxu1 %v12269_v34 }
 0xf68   : > { %8467 = vmatpush3.bf16.msra.mxu0 %v12270_v60 }
 0xf69   : > { %8489 = vmatpush3.bf16.msra.mxu1 %v12271_v10  ;;  %8468 = vmatprep.subr.bf16.mxu0 %v12272_v43 }
 0xf6a   : > { %8490 = vmatprep.subr.bf16.mxu1 %v12273_v62 }
 0xf6c   : > { %8469 = vmatpush3.bf16.msra.mxu0 %v12274_v11  ;;  %v12277_v11 = vld [vmem:[#allocation43_spill] sm:$0xff] }
 0xf6d   : > { %8491 = vmatpush3.bf16.msra.mxu1 %v12275_v16  ;;  %8470 = vmatprep.subr.bf16.mxu0 %v9612_v3 }
 0xf6e   : > { %8492 = vmatprep.subr.bf16.mxu1 %v9613_v15 }
 0xf70   : > { %8471 = vmatpush3.bf16.msra.mxu0 %v9614_v2  ;;  %v12278_v2 = vld [vmem:[#allocation44_spill] sm:$0xff] }
 0xf71   : > { %8493 = vmatpush3.bf16.msra.mxu1 %v9615_v18  ;;  %8472 = vmatprep.subr.bf16.mxu0 %v9616_v14 }
 0xf72   : > { %8494 = vmatprep.subr.bf16.mxu1 %v9617_v45 }
 0xf74   : > { %8473 = vmatpush3.bf16.msra.mxu0 %v9618_v49 }
 0xf75   : > { %8495 = vmatpush3.bf16.msra.mxu1 %v9619_v8  ;;  %8474 = vmatprep.subr.bf16.mxu0 %v9620_v36 }
 0xf76   : > { %8496 = vmatprep.subr.bf16.mxu1 %v9621_v13 }
 0xf78   : > { %8475 = vmatpush3.bf16.msra.mxu0 %v9622_v55 }
 0xf79   : > { %8497 = vmatpush3.bf16.msra.mxu1 %v9623_v27  ;;  %8476 = vmatprep.subr.bf16.mxu0 %v9624_v40 }
 0xf7a   : > { %8498 = vmatprep.subr.bf16.mxu1 %v9625_v58 }
 0xf7c   : > { %8477 = vmatpush3.bf16.msra.mxu0 %v9626_v5 }
 0xf7d   : > { %8499 = vmatpush3.bf16.msra.mxu1 %v9627_v24  ;;  %8478 = vmatprep.subr.bf16.mxu0 %v9628_v63 }
 0xf7e   : > { %8500 = vmatprep.subr.bf16.mxu1 %v9629_v52 }
 0xf80   : > { %8479 = vmatpush3.bf16.msra.mxu0 %v9630_v53 }
 0xf81   : > { %8501 = vmatpush3.bf16.msra.mxu1 %v9631_v4  ;;  %8508 = vmatprep.subr.bf16.mxu0 %v9632_v56 }
 0xf82   : > { %8530 = vmatprep.subr.bf16.mxu1 %v9633_v9 }
0x1006   : > { %v8392_v7 = vpop.f32.mrb[40].mxu0 }
0x1007   : > { %v8414_v38 = vpop.f32.mrb[40].mxu1  ;;  %v8393_v1 = vpop.f32.mrb[41].mxu0 }
0x1008   : > { %v8394_v61 = vadd.f32 %v8393_v1, %v8392_v7  ;;  %v8415_v19 = vpop.f32.mrb[41].mxu1  ;;  %v8395_v6 = vpop.f32.mrb[42].mxu0 }
0x1009   : > { %v8416_v35 = vadd.f32 %v8415_v19, %v8414_v38  ;;  %v8417_v0 = vpop.f32.mrb[42].mxu1  ;;  %v8396_v54 = vpop.f32.mrb[43].mxu0 }
0x100a   : > { %v6558_v17 = vadd.f32 %v8394_v61, %v12276_v29  ;;  %v8397_v23 = vadd.f32 %v8396_v54, %v8395_v6  ;;  %v8418_v33 = vpop.f32.mrb[43].mxu1 }
0x100b   : > { %v8419_v50 = vadd.f32 %v8418_v33, %v8417_v0 }
0x100c   : > { %v6599_v41 = vadd.f32 %v8416_v35, %v6558_v17  ;;  %v6561_v30 = vadd.f32 %v8397_v23, %v12276_v29 }
0x100e   : > { %v6602_v39 = vadd.f32 %v8419_v50, %v6561_v30 }
0x1026   : > { %v8436_v22 = vpop.f32.mrb[44].mxu0 }
0x1027   : > { %v8458_v32 = vpop.f32.mrb[44].mxu1  ;;  %v8437_v48 = vpop.f32.mrb[45].mxu0 }
0x1028   : > { %v8438_v42 = vadd.f32 %v8437_v48, %v8436_v22  ;;  %v8459_v47 = vpop.f32.mrb[45].mxu1  ;;  %v8439_v28 = vpop.f32.mrb[46].mxu0  ;;  %v9634_v48 = vld [vmem:[%s12018_s15 + $0x100] sm:$0xff]  }
0x1029   : > { %v8460_v44 = vadd.f32 %v8459_v47, %v8458_v32  ;;  %v8461_v26 = vpop.f32.mrb[46].mxu1  ;;  %v8440_v12 = vpop.f32.mrb[47].mxu0 }
0x102a   : > { %v6640_v21 = vadd.f32 %v8438_v42, %v6599_v41  ;;  %v8441_v46 = vadd.f32 %v8440_v12, %v8439_v28  ;;  %v8462_v37 = vpop.f32.mrb[47].mxu1 }
0x102b   : > { %v8463_v34 = vadd.f32 %v8462_v37, %v8461_v26 }
0x102c   : > { %v6681_v60 = vadd.f32 %v8460_v44, %v6640_v21  ;;  %v6643_v10 = vadd.f32 %v8441_v46, %v6602_v39  ;;  %v9637_v21 = vld [vmem:[%s12018_s15 + $0x1c8] sm:$0xff]  }
0x102e   : > { %v6684_v43 = vadd.f32 %v8463_v34, %v6643_v10  ;;  %v6726_v62 = vpop.f32.mrb[48].mxu0  ;;  %7062 = vrot.lane.b32.xlu1 %v6681_v60, %s9685_s28  ;;  %v9638_v10 = vld [vmem:[%s12018_s15 + $0x108] sm:$0xff]  }
0x102f   : > { %v6727_v16 = vadd.f32 %v6726_v62, %v12277_v11  ;;  %v6769_v3 = vpop.f32.mrb[48].mxu1  ;;  %v6728_v15 = vpop.f32.mrb[49].mxu0  ;;  %v9639_v62 = vld [vmem:[%s12018_s15 + $0x188] sm:$0xff]  }
0x1030   : > { %v6770_v18 = vadd.f32 %v6769_v3, %v12278_v2  ;;  %v6729_v14 = vadd.f32 %v6728_v15, %v11283_v57  ;;  %v6771_v45 = vpop.f32.mrb[49].mxu1  ;;  %v6730_v49 = vpop.f32.mrb[50].mxu0  ;;  %7064 = vrot.lane.b32.xlu0 %v6684_v43, %s9685_s28  ;;  %v9642_v3 = vld [vmem:[%s12018_s15 + $0x110] sm:$0xff]  }
0x1031   : > { %v6772_v8 = vadd.f32 %v6771_v45, %v11285_v59  ;;  %v6731_v36 = vadd.f32 %v6730_v49, %v12277_v11  ;;  %v6773_v13 = vpop.f32.mrb[50].mxu1  ;;  %v6732_v55 = vpop.f32.mrb[51].mxu0  ;;  %v6864_v5 = vmax.f32 %v6727_v16, 0.0  ;;  %v9640_v11 = vld [vmem:[%s12018_s15 + $0x150] sm:$0xff]   ;;  %v9647_v45 = vld [vmem:[%s12018_s15 + $0x198] sm:$0xff]   ;;  %v9648_v49 = vld [vmem:[%s12018_s15 + $0x160] sm:$0xff]  }
0x1032   : > { %v6774_v27 = vadd.f32 %v6773_v13, %v12278_v2  ;;  %v6733_v40 = vadd.f32 %v6732_v55, %v11283_v57  ;;  %v6775_v58 = vpop.f32.mrb[51].mxu1  ;;  %v6866_v52 = vmax.f32 %v6770_v18, 0.0  ;;  %v6865_v53 = vmax.f32 %v6729_v14, 0.0  ;;  %v9641_v16 = vld [vmem:[%s12018_s15 + $0x1d0] sm:$0xff]   ;;  %v9644_v2 = vld [vmem:[%s12018_s15 + $0x158] sm:$0xff]   ;;  %v9651_v13 = vld [vmem:[%s12018_s15 + $0x1a0] sm:$0xff]  }
0x1033   : > { %v6872_v24 = vmax.f32 %v6731_v36, 0.0  ;;  %v6776_v63 = vadd.f32 %v6775_v58, %v11285_v59  ;;  %v6867_v9 = vmax.f32 %v6772_v8, 0.0  ;;  %v9643_v15 = vld [vmem:[%s12018_s15 + $0x190] sm:$0xff]   ;;  %v9645_v18 = vld [vmem:[%s12018_s15 + $0x1d8] sm:$0xff]   ;;  %v9649_v8 = vld [vmem:[%s12018_s15 + $0x1e0] sm:$0xff]  }
0x1034   : > { %v6874_v4 = vmax.f32 %v6774_v27, 0.0  ;;  %v6873_v56 = vmax.f32 %v6733_v40, 0.0  ;;  %v9646_v14 = vld [vmem:[%s12018_s15 + $0x118] sm:$0xff]   ;;  %v9650_v36 = vld [vmem:[%s12018_s15 + $0x120] sm:$0xff]   ;;  %v9652_v55 = vld [vmem:[%s12018_s15 + $0x168] sm:$0xff]  }
0x1035   : > { %v6880_v7 = vpack.c.bf16 %v6872_v24, %v6864_v5  ;;  %v6875_v38 = vmax.f32 %v6776_v63, 0.0  ;;  %v9653_v27 = vld [vmem:[%s12018_s15 + $0x1e8] sm:$0xff]   ;;  %v9656_v5 = vld [vmem:[%s12018_s15 + $0x170] sm:$0xff]  }
0x1036   : > { %v6882_v1 = vpack.c.bf16 %v6874_v4, %v6866_v52  ;;  %v6881_v61 = vpack.c.bf16 %v6873_v56, %v6865_v53  ;;  %v6812_v19 = vpop.f32.mrb[52].mxu0  ;;  %v9654_v40 = vld [vmem:[%s12018_s15 + $0x128] sm:$0xff]   ;;  %v9657_v24 = vld [vmem:[%s12018_s15 + $0x1f0] sm:$0xff]   ;;  %v9660_v53 = vld [vmem:[%s12018_s15 + $0x178] sm:$0xff]  }
0x1037   : > { %v6883_v6 = vpack.c.bf16 %v6875_v38, %v6867_v9  ;;  %v6813_v35 = vadd.f32 %v6812_v19, %v11292_v25  ;;  %v6855_v0 = vpop.f32.mrb[52].mxu1  ;;  %v6814_v57 = vpop.f32.mrb[53].mxu0  ;;  %v9655_v58 = vld [vmem:[%s12018_s15 + $0x1a8] sm:$0xff]   ;;  %v9658_v63 = vld [vmem:[%s12018_s15 + $0x130] sm:$0xff]   ;;  %v9661_v4 = vld [vmem:[%s12018_s15 + $0x1f8] sm:$0xff]  }
0x1038   : > { %v6856_v54 = vadd.f32 %v6855_v0, %v11299_v20  ;;  %v6815_v17 = vadd.f32 %v6814_v57, %v11296_v51  ;;  %v6857_v59 = vpop.f32.mrb[53].mxu1  ;;  %v6816_v23 = vpop.f32.mrb[54].mxu0  ;;  %6920 = vmatprep.mubr.bf16.mxu0 %v6881_v61  ;;  %v9659_v52 = vld [vmem:[%s12018_s15 + $0x1b0] sm:$0xff]   ;;  %v9662_v56 = vld [vmem:[%s12018_s15 + $0x138] sm:$0xff]  }
0x1039   : > { %v6858_v33 = vadd.f32 %v6857_v59, %v11301_v31  ;;  %v6817_v50 = vadd.f32 %v6816_v23, %v11292_v25  ;;  %v6859_v41 = vpop.f32.mrb[54].mxu1  ;;  %6961 = vmatprep.mubr.bf16.mxu1 %v6883_v6  ;;  %v6818_v30 = vpop.f32.mrb[55].mxu0  ;;  %6921 = vmatmul.mubr.bf16.vlgmr.msra.gmra.mrb[56].mxu0 %v6880_v7  ;;  %v6868_v42 = vmax.f32 %v6813_v35, 0.0  ;;  %v9635_v25 = vld [vmem:[%s12018_s15 + $0x180] sm:$0xff]   ;;  %v9663_v9 = vld [vmem:[%s12018_s15 + $0x1b8] sm:$0xff]  }
0x103a   : > { %v6860_v39 = vadd.f32 %v6859_v41, %v11299_v20  ;;  %v6819_v22 = vadd.f32 %v6818_v30, %v11296_v51  ;;  %v6861_v32 = vpop.f32.mrb[55].mxu1  ;;  %6962 = vmatmul.mubr.bf16.vlgmr.msra.gmra.mrb[56].mxu1 %v6882_v1  ;;  %8509 = vmatpush3.bf16.msra.mxu0 %v9634_v48  ;;  %v9636_v20 = vld [vmem:[%s12018_s15 + $0x148] sm:$0xff]   ;;  %v6870_v51 = vmax.f32 %v6856_v54, 0.0  ;;  %v6869_v44 = vmax.f32 %v6815_v17, 0.0 }
0x103b   : > { %v6876_v47 = vmax.f32 %v6817_v50, 0.0  ;;  %v6862_v28 = vadd.f32 %v6861_v32, %v11301_v31  ;;  %8531 = vmatpush3.bf16.msra.mxu1 %v9635_v25  ;;  %8510 = vmatprep.subr.bf16.mxu0 %v9636_v20  ;;  %v6871_v31 = vmax.f32 %v6858_v33, 0.0  ;;  %v9664_v50 = vld [vmem:[%s12019_s16] ss:$0 sm:$0xff] }
0x103c   : > { %v6878_v26 = vmax.f32 %v6860_v39, 0.0  ;;  %v6877_v12 = vmax.f32 %v6819_v22, 0.0  ;;  %8532 = vmatprep.subr.bf16.mxu1 %v9637_v21 }
0x103d   : > { %v6884_v46 = vpack.c.bf16 %v6876_v47, %v6868_v42  ;;  %v6879_v37 = vmax.f32 %v6862_v28, 0.0 }
0x103e   : > { %v6886_v34 = vpack.c.bf16 %v6878_v26, %v6870_v51  ;;  %v6885_v60 = vpack.c.bf16 %v6877_v12, %v6869_v44  ;;  %8511 = vmatpush3.bf16.msra.mxu0 %v9638_v10  ;;  %v12279_v10 = vld [vmem:[#allocation55_spill] sm:$0xff] }
0x103f   : > { %v6887_v43 = vpack.c.bf16 %v6879_v37, %v6871_v31  ;;  %8533 = vmatpush3.bf16.msra.mxu1 %v9639_v62  ;;  %8512 = vmatprep.subr.bf16.mxu0 %v9640_v11  ;;  %v7057_v37 = vpop.permute.xlu0 %7056 }
0x1040   : > { %7002 = vmatprep.mubr.bf16.mxu0 %v6885_v60  ;;  %8534 = vmatprep.subr.bf16.mxu1 %v9641_v16  ;;  %v12280_v16 = vld [vmem:[#allocation56_spill] sm:$0xff] }
0x1041   : > { %7043 = vmatprep.mubr.bf16.mxu1 %v6887_v43 }
0x1042   : > { %8513 = vmatpush3.bf16.msra.mxu0 %v9642_v3  ;;  %v7077_v3 = vsel %vm5073_vm3, %v12280_v16, %v7057_v37 }
0x1043   : > { %8535 = vmatpush3.bf16.msra.mxu1 %v9643_v15  ;;  %8514 = vmatprep.subr.bf16.mxu0 %v9644_v2 }
0x1044   : > { %8536 = vmatprep.subr.bf16.mxu1 %v9645_v18 }
0x1046   : > { %8515 = vmatpush3.bf16.msra.mxu0 %v9646_v14 }
0x1047   : > { %8537 = vmatpush3.bf16.msra.mxu1 %v9647_v45  ;;  %8516 = vmatprep.subr.bf16.mxu0 %v9648_v49 }
0x1048   : > { %8538 = vmatprep.subr.bf16.mxu1 %v9649_v8 }
0x104a   : > { %8517 = vmatpush3.bf16.msra.mxu0 %v9650_v36 }
0x104b   : > { %8539 = vmatpush3.bf16.msra.mxu1 %v9651_v13  ;;  %8518 = vmatprep.subr.bf16.mxu0 %v9652_v55 }
0x104c   : > { %8540 = vmatprep.subr.bf16.mxu1 %v9653_v27 }
0x104e   : > { %8519 = vmatpush3.bf16.msra.mxu0 %v9654_v40 }
0x104f   : > { %8541 = vmatpush3.bf16.msra.mxu1 %v9655_v58  ;;  %8520 = vmatprep.subr.bf16.mxu0 %v9656_v5 }
0x1050   : > { %8542 = vmatprep.subr.bf16.mxu1 %v9657_v24 }
0x1052   : > { %8521 = vmatpush3.bf16.msra.mxu0 %v9658_v63 }
0x1053   : > { %8543 = vmatpush3.bf16.msra.mxu1 %v9659_v52  ;;  %8522 = vmatprep.subr.bf16.mxu0 %v9660_v53 }
0x1054   : > { %8544 = vmatprep.subr.bf16.mxu1 %v9661_v4 }
0x1056   : > { %8523 = vmatpush3.bf16.msra.mxu0 %v9662_v56 }
0x1057   : > { %8545 = vmatpush3.bf16.msra.mxu1 %v9663_v9 }
0x1059   : > { %7003 = vmatmul.mubr.bf16.vlgmr.msra.gmra.mrb[60].mxu0 %v6884_v46  ;;  %v7055_v46 = vpop.permute.xlu1 %7054 }
0x105a   : > { %7044 = vmatmul.mubr.bf16.vlgmr.msra.gmra.mrb[60].mxu1 %v6886_v34  ;;  %v7076_v43 = vsel %vm5073_vm3, %v12279_v10, %v7055_v46 }
0x10a0   : > { %v7063_v34 = vpop.permute.xlu1 %7062 }
0x10a1   : > { %v7079_v62 = vsel %vm7078_vm4, %v7076_v43, %v7063_v34 }
0x10a2   : > { %v7065_v60 = vpop.permute.xlu0 %7064 }
0x10a3   : > { %v7080_v2 = vsel %vm7078_vm4, %v7077_v3, %v7065_v60 }
0x110c   : > { %v8480_v7 = vpop.f32.mrb[56].mxu0 }
0x110d   : > { %v8502_v38 = vpop.f32.mrb[56].mxu1  ;;  %v8481_v1 = vpop.f32.mrb[57].mxu0 }
0x110e   : > { %v8482_v61 = vadd.f32 %v8481_v1, %v8480_v7  ;;  %v8503_v19 = vpop.f32.mrb[57].mxu1  ;;  %v8483_v6 = vpop.f32.mrb[58].mxu0 }
0x110f   : > { %v8504_v35 = vadd.f32 %v8503_v19, %v8502_v38  ;;  %v8505_v0 = vpop.f32.mrb[58].mxu1  ;;  %v8484_v57 = vpop.f32.mrb[59].mxu0 }
0x1110   : > { %v6923_v54 = vadd.f32 %v8482_v61, %v12276_v29  ;;  %v8485_v17 = vadd.f32 %v8484_v57, %v8483_v6  ;;  %v8506_v59 = vpop.f32.mrb[59].mxu1 }
0x1111   : > { %v8507_v23 = vadd.f32 %v8506_v59, %v8505_v0 }
0x1112   : > { %v6964_v33 = vadd.f32 %v8504_v35, %v6923_v54  ;;  %v6926_v41 = vadd.f32 %v9664_v50, %v8485_v17 }
0x1114   : > { %v6967_v30 = vadd.f32 %v8507_v23, %v6926_v41 }
0x112c   : > { %v8524_v39 = vpop.f32.mrb[60].mxu0 }
0x112d   : > { %v8546_v22 = vpop.f32.mrb[60].mxu1  ;;  %v8525_v32 = vpop.f32.mrb[61].mxu0 }
0x112e   : > { %v8526_v48 = vadd.f32 %v8525_v32, %v8524_v39  ;;  %v8547_v42 = vpop.f32.mrb[61].mxu1  ;;  %v8527_v47 = vpop.f32.mrb[62].mxu0 }
0x112f   : > { %v8548_v28 = vadd.f32 %v8547_v42, %v8546_v22  ;;  %v8549_v25 = vpop.f32.mrb[62].mxu1  ;;  %v8528_v20 = vpop.f32.mrb[63].mxu0 }
0x1130   : > { %v7005_v29 = vadd.f32 %v8526_v48, %v6964_v33  ;;  %v8529_v51 = vadd.f32 %v8528_v20, %v8527_v47  ;;  %v8550_v44 = vpop.f32.mrb[63].mxu1 }
0x1131   : > { %v8551_v26 = vadd.f32 %v8550_v44, %v8549_v25 }
0x1132   : > { %v7046_v12 = vadd.f32 %v8548_v28, %v7005_v29  ;;  %v7008_v21 = vadd.f32 %v8529_v51, %v6967_v30 }
0x1134   : > { %v7049_v31 = vadd.f32 %v8551_v26, %v7008_v21  ;;  %7070 = vrot.lane.b32.xlu1 %v7046_v12, %s9684_s18 }
0x1136   : > { %7072 = vrot.lane.b32.xlu0 %v7049_v31, %s9684_s18 }
0x11a6   : > { %v7071_v11 = vpop.permute.xlu1 %7070 }
0x11a7   : > { %v7082_v15 = vsel %vm7081_vm5, %v7079_v62, %v7071_v11 }
0x11a8   : > { %7084 = vst [vmem:[%s9793_s21] sm:$0xff] %v7082_v15  ;;  %v7073_v18 = vpop.permute.xlu0 %7072 }
0x11a9   : > { %v7083_v14 = vsel %vm7081_vm5, %v7080_v2, %v7073_v18 }
0x11aa   : > { %7085 = vst [vmem:[%s9793_s21 + $0x8] sm:$0xff] %v7083_v14 }
0x11ab PF: > { %s27_s24 = sadd.s32 1, %s9675_s24  }
0x11ac   : > { %p24_p6 = scmp.ge.s32.totalorder %s27_s24, 4  }
0x11ae   :  { %26 = sbr.rel (!%p24_p6) target bundleno = 3 (0x3), region = 186 }

</bundles_post_ra>
